<compile_context>
chip_gen: v7x
topology: tpu7x:2x2x1
jax: 0.10.0
libtpu: 0.0.40
codegen_flags: <defaults>
</compile_context>

<pallas_src>
import math

import jax
import jax.numpy as jnp
from jax.experimental import pallas as pl
from jax.experimental.pallas import tpu as pltpu

_MIB = 1024 * 1024
_N_MLP_CHUNKS = 4  # MLP hidden dim (4*W) processed in chunks of W columns

# Row layout of the packed "small params" array (rows of width W):
#   0 ln1_g | 1 ln1_b | 2 b_q | 3 b_k | 4 b_v | 5 b_attnproj
#   6 ln2_g | 7 ln2_b | 8..11 b_fc (per MLP chunk) | 12 b_mlpproj | [13 b_skiplin]
_R_LN1G, _R_LN1B, _R_BQ, _R_BK, _R_BV, _R_BPROJ = 0, 1, 2, 3, 4, 5
_R_LN2G, _R_LN2B, _R_BFC, _R_BPR, _R_BLIN = 6, 7, 8, 12, 13

# pl.Buffered(1): single-buffer grid-invariant weight operands (halves their VMEM
# footprint).  Falls back to default buffering if this Pallas build rejects it.
try:
    _BUFFER_ONCE = pl.Buffered(1)
except Exception:  # pragma: no cover - older Pallas without Buffered
    _BUFFER_ONCE = None
_SINGLE_BUFFER_OK = [_BUFFER_ONCE is not None]

_CALL_CACHE = {}
_HW_CACHE = {}


# ---------------------------------------------------------------------------
# Hardware-aware heuristics
# ---------------------------------------------------------------------------

def _vmem_budget_bytes():
    """~85% of per-core VMEM: uses v5e/v6e's 128 MiB, leaves headroom on v7x's 64."""
    if "budget" not in _HW_CACHE:
        cap = 64 * _MIB  # conservative fallback (works on every generation)
        try:
            cap = int(pltpu.get_tpu_info().vmem_capacity_bytes)
        except Exception:
            pass
        _HW_CACHE["budget"] = int(0.85 * cap)
    return _HW_CACHE["budget"]


def _min_grid_steps():
    """v7x has 2 TensorCores -> want >=2 'parallel' grid steps; v5e/v6e have 1 TC."""
    if "steps" not in _HW_CACHE:
        steps = 1
        try:
            if "v7" in jax.devices()[0].device_kind.lower():
                steps = 2
        except Exception:
            pass
        _HW_CACHE["steps"] = steps
    return _HW_CACHE["steps"]


# ---------------------------------------------------------------------------
# In-kernel math helpers (pure jnp, traced inside the Pallas kernel body)
# ---------------------------------------------------------------------------

def _layernorm(x, g, b, eps=1e-5):
    mu = jnp.mean(x, axis=-1, keepdims=True)
    xc = x - mu
    var = jnp.mean(xc * xc, axis=-1, keepdims=True)
    return xc * jax.lax.rsqrt(var + eps) * g + b


_GELU_C = math.sqrt(2.0 / math.pi)


def _gelu(x):
    # TODO(synk): nn.GELU() default is erf-based; the tanh approximation is used so
    # the transcendental lands on the EUP slot (per perf review). Max |err| ~1e-3.
    return 0.5 * x * (1.0 + jnp.tanh(_GELU_C * (x + 0.044715 * (x * x * x))))


# ---------------------------------------------------------------------------
# Fused ResidualAttentionBlock kernel
# ---------------------------------------------------------------------------

def _make_block_kernel(heads, T, W, bb, with_skip):
    N = bb * T
    D = W // heads
    scale = 1.0 / math.sqrt(D)
    bf16 = jnp.bfloat16
    f32 = jnp.float32

    def kernel(*refs):
        attn_buf = refs[-1]          # (N, W) bf16 VMEM scratch: concat'd head outputs
        o_ref = refs[-2]
        if with_skip:
            (skip_ref, x_ref, sp, ws_ref, wx_ref,
             wqkv_ref, wproj_ref, wfc_ref, wpr_ref) = refs[:9]
        else:
            (x_ref, sp, wqkv_ref, wproj_ref, wfc_ref, wpr_ref) = refs[:6]

        x2 = x_ref[...].reshape(N, W).astype(f32)

        if with_skip:
            # cat([skip, x], -1) @ Wlin + b == skip @ Wlin[:W] + x @ Wlin[W:] + b
            skip2 = skip_ref[...].reshape(N, W)
            x2 = (jnp.dot(skip2.astype(bf16), ws_ref[...], preferred_element_type=f32)
                  + jnp.dot(x2.astype(bf16), wx_ref[...], preferred_element_type=f32)
                  + sp[_R_BLIN:_R_BLIN + 1, :])

        # ----- attention branch: x = x + proj(MHA(ln1(x))) -----
        h = _layernorm(x2, sp[_R_LN1G:_R_LN1G + 1, :], sp[_R_LN1B:_R_LN1B + 1, :])
        qkv = jnp.dot(h.astype(bf16), wqkv_ref[...],
                      preferred_element_type=f32)                         # (N, 3W)
        # bias added on 128-aligned q/k/v column blocks (no unaligned bias slices)
        q_all = (qkv[:, 0:W] + sp[_R_BQ:_R_BQ + 1, :]).reshape(bb, T, W)
        k_all = (qkv[:, W:2 * W] + sp[_R_BK:_R_BK + 1, :]).reshape(bb, T, W)
        v_all = (qkv[:, 2 * W:3 * W] + sp[_R_BV:_R_BV + 1, :]).reshape(bb, T, W)

        # Per-head attention batched over the bb sequences.  Head outputs are laid
        # head-major into the (N, W) scratch slab so the output projection runs as a
        # single K=W MXU matmul instead of `heads` K=D matmuls + f32 VPU adds.
        # TODO(synk): per-head lane slices at offsets h*D stay unaligned for D<128; a
        # fully head-batched dot_general would need multi-batch-dim / 4-D transposes
        # in-kernel, which is avoided here for lowering robustness.
        # TODO(synk): for large n_ctx switch to KV-tiled online softmax (flash-style)
        # so the (T, T) scores never materialize.
        for hh in range(heads):
            lo = hh * D
            qh = (q_all[:, :, lo:lo + D] * scale).astype(bf16)            # (bb, T, D)
            kh = k_all[:, :, lo:lo + D].astype(bf16)
            vh = v_all[:, :, lo:lo + D].astype(bf16)
            s = jnp.einsum('bqd,bkd->bqk', qh, kh,
                           preferred_element_type=f32)                    # (bb, T, T)
            s = s - jnp.max(s, axis=-1, keepdims=True)
            p = jnp.exp(s)
            p = p / jnp.sum(p, axis=-1, keepdims=True)                    # exact softmax
            oh = jnp.einsum('bqk,bkd->bqd', p.astype(bf16), vh,
                            preferred_element_type=f32)                   # (bb, T, D)
            attn_buf[:, lo:lo + D] = oh.reshape(N, D).astype(bf16)

        x2 = x2 + (jnp.dot(attn_buf[...], wproj_ref[...], preferred_element_type=f32)
                   + sp[_R_BPROJ:_R_BPROJ + 1, :])

        # ----- MLP branch: x = x + W2(gelu(W1(ln2(x)))) -----
        # The 4W hidden dim is processed in W-wide chunks inside a fori_loop so only
        # one (N, W) hidden chunk is live at a time (caps intermediate VMEM on v7x).
        h2 = _layernorm(x2, sp[_R_LN2G:_R_LN2G + 1, :],
                        sp[_R_LN2B:_R_LN2B + 1, :]).astype(bf16)

        def mlp_chunk(c, acc):
            hc = (jnp.dot(h2, wfc_ref[c], preferred_element_type=f32)
                  + sp[pl.ds(_R_BFC + c, 1), :])
            hc = _gelu(hc)
            return acc + jnp.dot(hc.astype(bf16), wpr_ref[c],
                                 preferred_element_type=f32)

        mlp = jax.lax.fori_loop(0, _N_MLP_CHUNKS, mlp_chunk, jnp.zeros((N, W), f32))
        x2 = x2 + mlp + sp[_R_BPR:_R_BPR + 1, :]

        o_ref[...] = x2.reshape(bb, T, W).astype(o_ref.dtype)

    return kernel


# ---------------------------------------------------------------------------
# pallas_call builder / wrapper
# ---------------------------------------------------------------------------

def _choose_block_b(B, T, W, heads, n_act, weight_bytes, budget, min_steps):
    """Largest bb (divisor of B) whose per-step working set fits the VMEM budget,
    keeping >= min_steps grid steps (2 on v7x for its 2 TensorCores, 1 otherwise).
    Weights are budgeted at 2x so the Buffered(1) fallback still fits."""
    def est(bb):
        n = bb * T
        return (2 * (n_act + 1) * n * W * 4      # double-buffered activation blocks
                + 2 * weight_bytes               # weights (worst case: double-buffered)
                + 64 * n * W                     # f32/bf16 intermediates (qkv, h, ...)
                + 12 * bb * heads * T * T)       # per-head scores / probs temporaries

    max_bb = B if B < min_steps else B // min_steps
    best = 1
    for bb in range(1, max_bb + 1):
        if B % bb == 0 and est(bb) <= budget:
            best = bb
    return best


def _build_call(B, T, W, heads, bb, out_dtype, with_skip, single_buffer,
                vmem_limit, in_meta, n_act):
    kernel = _make_block_kernel(heads, T, W, bb, with_skip)
    act_spec = pl.BlockSpec((bb, T, W), lambda b: (b, 0, 0))

    def weight_spec(shape):
        nd = len(shape)
        index_map = lambda b, _nd=nd: (0,) * _nd
        if single_buffer and _BUFFER_ONCE is not None:
            # Grid-invariant operand: single buffer (halves weight VMEM footprint).
            return pl.BlockSpec(shape, index_map, pipeline_mode=_BUFFER_ONCE)
        return pl.BlockSpec(shape, index_map)

    in_specs = [act_spec if i < n_act else weight_spec(shape)
                for i, (shape, _dt) in enumerate(in_meta)]

    call = pl.pallas_call(
        kernel,
        out_shape=jax.ShapeDtypeStruct((B, T, W), out_dtype),
        grid=(B // bb,),
        in_specs=in_specs,
        out_specs=act_spec,
        scratch_shapes=[pltpu.VMEM((bb * T, W), jnp.bfloat16)],
        compiler_params=pltpu.CompilerParams(
            dimension_semantics=("parallel",),
            vmem_limit_bytes=int(vmem_limit)),
    )
    return jax.jit(call)


def _pack_small(block_params, b_lin=None):
    (ln1_g, ln1_b, _wqkv, bqkv, _wproj, bproj,
     ln2_g, ln2_b, _wfc, bfc, _wpr, bpr) = block_params
    W = ln1_g.shape[-1]
    rows = [ln1_g.reshape(1, W), ln1_b.reshape(1, W),
            bqkv.reshape(3, W), bproj.reshape(1, W),
            ln2_g.reshape(1, W), ln2_b.reshape(1, W),
            bfc.reshape(_N_MLP_CHUNKS, W), bpr.reshape(1, W)]
    if b_lin is not None:
        rows.append(b_lin.reshape(1, W))
    return jnp.concatenate(rows, axis=0).astype(jnp.float32)


def _prep_big_weights(block_params):
    (_l1g, _l1b, wqkv, _bq, wproj, _bp, _l2g, _l2b, wfc, _bf, wpr, _br) = block_params
    W = wqkv.shape[0]
    bf16 = jnp.bfloat16
    # Pre-chunk MLP weights so the kernel indexes the leading axis dynamically.
    wfc_c = jnp.transpose(wfc.reshape(W, _N_MLP_CHUNKS, W), (1, 0, 2)).astype(bf16)
    wpr_c = wpr.reshape(_N_MLP_CHUNKS, W, W).astype(bf16)
    return wqkv.astype(bf16), wproj.astype(bf16), wfc_c, wpr_c


def resblock_apply(x, block_params, heads, skip=None, skip_linear=None):
    """One pre-LN ResidualAttentionBlock.  If `skip` is given, the decoder's
    cat([skip, x], -1) @ Wlin + b is fused into the same kernel."""
    B, T, W = x.shape
    assert W % heads == 0
    with_skip = skip is not None

    wqkv_b, wproj_b, wfc_c, wpr_c = _prep_big_weights(block_params)
    if with_skip:
        w_lin, b_lin = skip_linear
        small = _pack_small(block_params, b_lin=b_lin)
        ws = w_lin[:W, :].astype(jnp.bfloat16)   # skip half of the (2W, W) weight
        wx = w_lin[W:, :].astype(jnp.bfloat16)   # x half
        inputs = [skip, x, small, ws, wx, wqkv_b, wproj_b, wfc_c, wpr_c]
        n_act = 2
    else:
        small = _pack_small(block_params)
        inputs = [x, small, wqkv_b, wproj_b, wfc_c, wpr_c]
        n_act = 1

    weight_bytes = sum(int(a.size) * a.dtype.itemsize for a in inputs[n_act:])
    budget = _vmem_budget_bytes()
    bb = _choose_block_b(B, T, W, heads, n_act, weight_bytes, budget,
                         _min_grid_steps())
    in_meta = tuple((tuple(int(d) for d in a.shape), str(a.dtype)) for a in inputs)

    modes = (True, False) if _SINGLE_BUFFER_OK[0] else (False,)
    for single_buffer in modes:
        key = (B, T, W, heads, bb, str(x.dtype), with_skip, single_buffer,
               budget, in_meta)
        try:
            fn = _CALL_CACHE.get(key)
            first_build = fn is None
            if first_build:
                fn = _build_call(B, T, W, heads, bb, x.dtype, with_skip,
                                 single_buffer, budget, in_meta, n_act)
                _CALL_CACHE[key] = fn
            out = fn(*inputs)
            if single_buffer and first_build:
                jax.block_until_ready(out)   # surface failures while we can fall back
            return out
        except Exception:
            _CALL_CACHE.pop(key, None)
            if not single_buffer:
                raise
            # pipeline_mode=pl.Buffered(1) unsupported -> default double buffering
            # (bb was chosen assuming 2x weight VMEM, so this still fits).
            _SINGLE_BUFFER_OK[0] = False
    raise RuntimeError("unreachable")


# ---------------------------------------------------------------------------
# Deterministic synthetic parameters (nn.Linear-style uniform init)
# ---------------------------------------------------------------------------

def _init_linear(key, fan_in, fan_out):
    k1, k2 = jax.random.split(key)
    bound = 1.0 / math.sqrt(fan_in)
    w = jax.random.uniform(k1, (fan_in, fan_out), jnp.float32, -bound, bound)
    b = jax.random.uniform(k2, (1, fan_out), jnp.float32, -bound, bound)
    return w, b


def _init_resblock(key, width):
    k_qkv, k_proj, k_fc, k_pr = jax.random.split(key, 4)
    ln1_g = jnp.ones((1, width), jnp.float32)
    ln1_b = jnp.zeros((1, width), jnp.float32)
    ln2_g = jnp.ones((1, width), jnp.float32)
    ln2_b = jnp.zeros((1, width), jnp.float32)
    wqkv, bqkv = _init_linear(k_qkv, width, 3 * width)
    wproj, bproj = _init_linear(k_proj, width, width)
    wfc, bfc = _init_linear(k_fc, width, 4 * width)
    wpr, bpr = _init_linear(k_pr, 4 * width, width)
    return (ln1_g, ln1_b, wqkv, bqkv, wproj, bproj,
            ln2_g, ln2_b, wfc, bfc, wpr, bpr)


def init_residual_transformer(key, width, num_layers):
    keys = jax.random.split(key, 3 * num_layers + 1)
    it = iter(keys)
    encoder = [_init_resblock(next(it), width) for _ in range(num_layers)]
    middle = _init_resblock(next(it), width)
    decoder = []
    for _ in range(num_layers):
        block = _init_resblock(next(it), width)
        w_lin, b_lin = _init_linear(next(it), 2 * width, width)
        decoder.append((block, w_lin, b_lin))
    return {"encoder": encoder, "middle": middle, "decoder": decoder}


# ---------------------------------------------------------------------------
# Full ResidualTransformer forward (matches the PyTorch module's forward)
# ---------------------------------------------------------------------------

def residual_transformer_forward(x, params, heads):
    # TODO(synk): cross-pallas_call prefetch of layer i+1's weights (P10) would hide
    # the per-layer weight DMA for small-batch shapes; not implemented here.
    enc_outputs = []
    for p in params["encoder"]:
        x = resblock_apply(x, p, heads)
        enc_outputs.append(x)
    x = resblock_apply(x, params["middle"], heads)
    for block, w_lin, b_lin in params["decoder"]:
        skip = enc_outputs.pop()
        # cat([skip, x], -1) @ Wlin + b fused into the decoder resblock kernel.
        x = resblock_apply(x, block, heads, skip=skip, skip_linear=(w_lin, b_lin))
    return x


if __name__ == "__main__":
    # small config consistent with the module's forward (width = TPU lane width)
    n_ctx, width, heads, num_layers = 16, 128, 4, 2
    batch = 2

    key = jax.random.PRNGKey(0)
    k_params, k_x = jax.random.split(key)
    params = init_residual_transformer(k_params, width, num_layers)
    x = jax.random.normal(k_x, (batch, n_ctx, width), jnp.float32)

    out = residual_transformer_forward(x, params, heads)
    out = jax.block_until_ready(out)
    assert out.shape == (batch, n_ctx, width)
    assert bool(jnp.all(jnp.isfinite(out)))
    print("KERNEL_OK")
</pallas_src>

<mosaic_0001>
module attributes {stable_mosaic.version = 11 : i64} {
  func.func @kernel(%arg0: i32, %arg1: memref<2x16x128xf32, #tpu.memory_space<vmem>>, %arg2: memref<13x128xf32, #tpu.memory_space<vmem>>, %arg3: memref<128x384xbf16, #tpu.memory_space<vmem>>, %arg4: memref<128x128xbf16, #tpu.memory_space<vmem>>, %arg5: memref<4x128x128xbf16, #tpu.memory_space<vmem>>, %arg6: memref<4x128x128xbf16, #tpu.memory_space<vmem>>, %arg7: memref<2x16x128xf32, #tpu.memory_space<vmem>>, %arg8: memref<32x128xbf16, #tpu.memory_space<vmem>>) attributes {dimension_semantics = [#tpu.dimension_semantics<parallel>], iteration_bounds = array<i64: 1>, scalar_prefetch = 0 : i64, scratch_operands = 1 : i64, tpu.core_type = #tpu.core_type<tc>, window_params = [{transform_indices = @transform_0, window_bounds = array<i64: 2, 16, 128>}, {pipeline_mode = #tpu.pipeline_mode<synchronous>, transform_indices = @transform_1, window_bounds = array<i64: 13, 128>}, {pipeline_mode = #tpu.pipeline_mode<synchronous>, transform_indices = @transform_2, window_bounds = array<i64: 128, 384>}, {pipeline_mode = #tpu.pipeline_mode<synchronous>, transform_indices = @transform_3, window_bounds = array<i64: 128, 128>}, {pipeline_mode = #tpu.pipeline_mode<synchronous>, transform_indices = @transform_4, window_bounds = array<i64: 4, 128, 128>}, {pipeline_mode = #tpu.pipeline_mode<synchronous>, transform_indices = @transform_5, window_bounds = array<i64: 4, 128, 128>}, {transform_indices = @transform_6, window_bounds = array<i64: 2, 16, 128>}]} {
    %c0 = arith.constant 0 : index
    %c0_0 = arith.constant 0 : index
    %c0_1 = arith.constant 0 : index
    %0 = vector.load %arg1[%c0, %c0_0, %c0_1] : memref<2x16x128xf32, #tpu.memory_space<vmem>>, vector<2x16x128xf32>
    %1 = vector.shape_cast %0 : vector<2x16x128xf32> to vector<32x128xf32>
    %c0_2 = arith.constant 0 : index
    %c0_3 = arith.constant 0 : index
    %2 = vector.load %arg2[%c0_2, %c0_3] : memref<13x128xf32, #tpu.memory_space<vmem>>, vector<1x128xf32>
    %c1 = arith.constant 1 : index
    %c0_4 = arith.constant 0 : index
    %3 = vector.load %arg2[%c1, %c0_4] : memref<13x128xf32, #tpu.memory_space<vmem>>, vector<1x128xf32>
    %cst = arith.constant dense<0.000000e+00> : vector<32xf32>
    %4 = vector.multi_reduction <add>, %1, %cst [1] : vector<32x128xf32> to vector<32xf32>
    %5 = vector.shape_cast %4 : vector<32xf32> to vector<32x1xf32>
    %cst_5 = arith.constant 1.280000e+02 : f32
    %6 = vector.broadcast %cst_5 : f32 to vector<32x1xf32>
    %7 = arith.divf %5, %6 : vector<32x1xf32>
    %8 = vector.broadcast %7 : vector<32x1xf32> to vector<32x128xf32>
    %9 = arith.subf %1, %8 : vector<32x128xf32>
    %10 = arith.mulf %9, %9 : vector<32x128xf32>
    %cst_6 = arith.constant dense<0.000000e+00> : vector<32xf32>
    %11 = vector.multi_reduction <add>, %10, %cst_6 [1] : vector<32x128xf32> to vector<32xf32>
    %12 = vector.shape_cast %11 : vector<32xf32> to vector<32x1xf32>
    %cst_7 = arith.constant 1.280000e+02 : f32
    %13 = vector.broadcast %cst_7 : f32 to vector<32x1xf32>
    %14 = arith.divf %12, %13 : vector<32x1xf32>
    %cst_8 = arith.constant 9.99999974E-6 : f32
    %15 = vector.broadcast %cst_8 : f32 to vector<32x1xf32>
    %16 = arith.addf %14, %15 : vector<32x1xf32>
    %17 = math.rsqrt %16 : vector<32x1xf32>
    %18 = vector.broadcast %17 : vector<32x1xf32> to vector<32x128xf32>
    %19 = arith.mulf %9, %18 : vector<32x128xf32>
    %20 = vector.broadcast %2 : vector<1x128xf32> to vector<32x128xf32>
    %21 = arith.mulf %19, %20 : vector<32x128xf32>
    %22 = vector.broadcast %3 : vector<1x128xf32> to vector<32x128xf32>
    %23 = arith.addf %21, %22 : vector<32x128xf32>
    %24 = arith.truncf %23 : vector<32x128xf32> to vector<32x128xbf16>
    %c0_9 = arith.constant 0 : index
    %c0_10 = arith.constant 0 : index
    %25 = vector.load %arg3[%c0_9, %c0_10] : memref<128x384xbf16, #tpu.memory_space<vmem>>, vector<128x384xbf16>
    %cst_11 = arith.constant dense<0.000000e+00> : vector<32x384xf32>
    %26 = tpu.matmul %24, %25, %cst_11 {dimension_numbers = #tpu.dot_dimension_numbers<[1], [0], [0], [1], [0, 0, 1, 1], [], []>} : vector<32x128xbf16>, vector<128x384xbf16>, vector<32x384xf32> -> vector<32x384xf32>
    %27 = vector.extract_strided_slice %26 {offsets = [0, 0], sizes = [32, 128], strides = [1, 1]} : vector<32x384xf32> to vector<32x128xf32>
    %c2 = arith.constant 2 : index
    %c0_12 = arith.constant 0 : index
    %28 = vector.load %arg2[%c2, %c0_12] : memref<13x128xf32, #tpu.memory_space<vmem>>, vector<1x128xf32>
    %29 = vector.broadcast %28 : vector<1x128xf32> to vector<32x128xf32>
    %30 = arith.addf %27, %29 : vector<32x128xf32>
    %31 = vector.shape_cast %30 : vector<32x128xf32> to vector<2x16x128xf32>
    %32 = vector.extract_strided_slice %26 {offsets = [0, 128], sizes = [32, 128], strides = [1, 1]} : vector<32x384xf32> to vector<32x128xf32>
    %c3 = arith.constant 3 : index
    %c0_13 = arith.constant 0 : index
    %33 = vector.load %arg2[%c3, %c0_13] : memref<13x128xf32, #tpu.memory_space<vmem>>, vector<1x128xf32>
    %34 = vector.broadcast %33 : vector<1x128xf32> to vector<32x128xf32>
    %35 = arith.addf %32, %34 : vector<32x128xf32>
    %36 = vector.shape_cast %35 : vector<32x128xf32> to vector<2x16x128xf32>
    %37 = vector.extract_strided_slice %26 {offsets = [0, 256], sizes = [32, 128], strides = [1, 1]} : vector<32x384xf32> to vector<32x128xf32>
    %c4 = arith.constant 4 : index
    %c0_14 = arith.constant 0 : index
    %38 = vector.load %arg2[%c4, %c0_14] : memref<13x128xf32, #tpu.memory_space<vmem>>, vector<1x128xf32>
    %39 = vector.broadcast %38 : vector<1x128xf32> to vector<32x128xf32>
    %40 = arith.addf %37, %39 : vector<32x128xf32>
    %41 = vector.shape_cast %40 : vector<32x128xf32> to vector<2x16x128xf32>
    %42 = vector.extract_strided_slice %31 {offsets = [0, 0, 0], sizes = [2, 16, 32], strides = [1, 1, 1]} : vector<2x16x128xf32> to vector<2x16x32xf32>
    %cst_15 = arith.constant 0.176776692 : f32
    %43 = vector.broadcast %cst_15 : f32 to vector<2x16x32xf32>
    %44 = arith.mulf %42, %43 : vector<2x16x32xf32>
    %45 = arith.truncf %44 : vector<2x16x32xf32> to vector<2x16x32xbf16>
    %46 = vector.extract_strided_slice %36 {offsets = [0, 0, 0], sizes = [2, 16, 32], strides = [1, 1, 1]} : vector<2x16x128xf32> to vector<2x16x32xf32>
    %47 = arith.truncf %46 : vector<2x16x32xf32> to vector<2x16x32xbf16>
    %48 = vector.extract_strided_slice %41 {offsets = [0, 0, 0], sizes = [2, 16, 32], strides = [1, 1, 1]} : vector<2x16x128xf32> to vector<2x16x32xf32>
    %49 = arith.truncf %48 : vector<2x16x32xf32> to vector<2x16x32xbf16>
    "tpu.trace_start"() <{level = 10 : i32, message = "bqd,bkd->bqk"}> : () -> ()
    %cst_16 = arith.constant dense<0.000000e+00> : vector<2x16x16xf32>
    %50 = tpu.matmul %45, %47, %cst_16 {dimension_numbers = #tpu.dot_dimension_numbers<[2], [2], [1], [1], [0, 0, 0, 1, 1, 1], [0], [0]>} : vector<2x16x32xbf16>, vector<2x16x32xbf16>, vector<2x16x16xf32> -> vector<2x16x16xf32>
    "tpu.trace_stop"() : () -> ()
    %cst_17 = arith.constant dense<0xFF800000> : vector<2x16xf32>
    %51 = vector.multi_reduction <maximumf>, %50, %cst_17 [2] : vector<2x16x16xf32> to vector<2x16xf32>
    %52 = vector.shape_cast %51 : vector<2x16xf32> to vector<2x16x1xf32>
    %53 = vector.broadcast %52 : vector<2x16x1xf32> to vector<2x16x16xf32>
    %54 = arith.subf %50, %53 : vector<2x16x16xf32>
    %55 = math.exp %54 : vector<2x16x16xf32>
    %cst_18 = arith.constant dense<0.000000e+00> : vector<2x16xf32>
    %56 = vector.multi_reduction <add>, %55, %cst_18 [2] : vector<2x16x16xf32> to vector<2x16xf32>
    %57 = vector.shape_cast %56 : vector<2x16xf32> to vector<2x16x1xf32>
    %58 = vector.broadcast %57 : vector<2x16x1xf32> to vector<2x16x16xf32>
    %59 = arith.divf %55, %58 : vector<2x16x16xf32>
    %60 = arith.truncf %59 : vector<2x16x16xf32> to vector<2x16x16xbf16>
    "tpu.trace_start"() <{level = 10 : i32, message = "bqk,bkd->bqd"}> : () -> ()
    %cst_19 = arith.constant dense<0.000000e+00> : vector<2x16x32xf32>
    %61 = tpu.matmul %60, %49, %cst_19 {dimension_numbers = #tpu.dot_dimension_numbers<[2], [1], [1], [2], [0, 0, 0, 1, 1, 2], [0], [0]>} : vector<2x16x16xbf16>, vector<2x16x32xbf16>, vector<2x16x32xf32> -> vector<2x16x32xf32>
    "tpu.trace_stop"() : () -> ()
    %62 = vector.shape_cast %61 : vector<2x16x32xf32> to vector<32x32xf32>
    %63 = arith.truncf %62 : vector<32x32xf32> to vector<32x32xbf16>
    %c0_20 = arith.constant 0 : index
    %c0_21 = arith.constant 0 : index
    %64 = vector.load %arg8[%c0_20, %c0_21] : memref<32x128xbf16, #tpu.memory_space<vmem>>, vector<32x32xbf16>
    tpu.vector_store %arg8[%c0_20, %c0_21], %63 {strides = array<i32>} : memref<32x128xbf16, #tpu.memory_space<vmem>>, vector<32x32xbf16>,
    %65 = vector.extract_strided_slice %31 {offsets = [0, 0, 32], sizes = [2, 16, 32], strides = [1, 1, 1]} : vector<2x16x128xf32> to vector<2x16x32xf32>
    %cst_22 = arith.constant 0.176776692 : f32
    %66 = vector.broadcast %cst_22 : f32 to vector<2x16x32xf32>
    %67 = arith.mulf %65, %66 : vector<2x16x32xf32>
    %68 = arith.truncf %67 : vector<2x16x32xf32> to vector<2x16x32xbf16>
    %69 = vector.extract_strided_slice %36 {offsets = [0, 0, 32], sizes = [2, 16, 32], strides = [1, 1, 1]} : vector<2x16x128xf32> to vector<2x16x32xf32>
    %70 = arith.truncf %69 : vector<2x16x32xf32> to vector<2x16x32xbf16>
    %71 = vector.extract_strided_slice %41 {offsets = [0, 0, 32], sizes = [2, 16, 32], strides = [1, 1, 1]} : vector<2x16x128xf32> to vector<2x16x32xf32>
    %72 = arith.truncf %71 : vector<2x16x32xf32> to vector<2x16x32xbf16>
    "tpu.trace_start"() <{level = 10 : i32, message = "bqd,bkd->bqk"}> : () -> ()
    %cst_23 = arith.constant dense<0.000000e+00> : vector<2x16x16xf32>
    %73 = tpu.matmul %68, %70, %cst_23 {dimension_numbers = #tpu.dot_dimension_numbers<[2], [2], [1], [1], [0, 0, 0, 1, 1, 1], [0], [0]>} : vector<2x16x32xbf16>, vector<2x16x32xbf16>, vector<2x16x16xf32> -> vector<2x16x16xf32>
    "tpu.trace_stop"() : () -> ()
    %cst_24 = arith.constant dense<0xFF800000> : vector<2x16xf32>
    %74 = vector.multi_reduction <maximumf>, %73, %cst_24 [2] : vector<2x16x16xf32> to vector<2x16xf32>
    %75 = vector.shape_cast %74 : vector<2x16xf32> to vector<2x16x1xf32>
    %76 = vector.broadcast %75 : vector<2x16x1xf32> to vector<2x16x16xf32>
    %77 = arith.subf %73, %76 : vector<2x16x16xf32>
    %78 = math.exp %77 : vector<2x16x16xf32>
    %cst_25 = arith.constant dense<0.000000e+00> : vector<2x16xf32>
    %79 = vector.multi_reduction <add>, %78, %cst_25 [2] : vector<2x16x16xf32> to vector<2x16xf32>
    %80 = vector.shape_cast %79 : vector<2x16xf32> to vector<2x16x1xf32>
    %81 = vector.broadcast %80 : vector<2x16x1xf32> to vector<2x16x16xf32>
    %82 = arith.divf %78, %81 : vector<2x16x16xf32>
    %83 = arith.truncf %82 : vector<2x16x16xf32> to vector<2x16x16xbf16>
    "tpu.trace_start"() <{level = 10 : i32, message = "bqk,bkd->bqd"}> : () -> ()
    %cst_26 = arith.constant dense<0.000000e+00> : vector<2x16x32xf32>
    %84 = tpu.matmul %83, %72, %cst_26 {dimension_numbers = #tpu.dot_dimension_numbers<[2], [1], [1], [2], [0, 0, 0, 1, 1, 2], [0], [0]>} : vector<2x16x16xbf16>, vector<2x16x32xbf16>, vector<2x16x32xf32> -> vector<2x16x32xf32>
    "tpu.trace_stop"() : () -> ()
    %85 = vector.shape_cast %84 : vector<2x16x32xf32> to vector<32x32xf32>
    %86 = arith.truncf %85 : vector<32x32xf32> to vector<32x32xbf16>
    %c0_27 = arith.constant 0 : index
    %c32 = arith.constant 32 : index
    %87 = vector.load %arg8[%c0_27, %c32] : memref<32x128xbf16, #tpu.memory_space<vmem>>, vector<32x32xbf16>
    tpu.vector_store %arg8[%c0_27, %c32], %86 {strides = array<i32>} : memref<32x128xbf16, #tpu.memory_space<vmem>>, vector<32x32xbf16>,
    %88 = vector.extract_strided_slice %31 {offsets = [0, 0, 64], sizes = [2, 16, 32], strides = [1, 1, 1]} : vector<2x16x128xf32> to vector<2x16x32xf32>
    %cst_28 = arith.constant 0.176776692 : f32
    %89 = vector.broadcast %cst_28 : f32 to vector<2x16x32xf32>
    %90 = arith.mulf %88, %89 : vector<2x16x32xf32>
    %91 = arith.truncf %90 : vector<2x16x32xf32> to vector<2x16x32xbf16>
    %92 = vector.extract_strided_slice %36 {offsets = [0, 0, 64], sizes = [2, 16, 32], strides = [1, 1, 1]} : vector<2x16x128xf32> to vector<2x16x32xf32>
    %93 = arith.truncf %92 : vector<2x16x32xf32> to vector<2x16x32xbf16>
    %94 = vector.extract_strided_slice %41 {offsets = [0, 0, 64], sizes = [2, 16, 32], strides = [1, 1, 1]} : vector<2x16x128xf32> to vector<2x16x32xf32>
    %95 = arith.truncf %94 : vector<2x16x32xf32> to vector<2x16x32xbf16>
    "tpu.trace_start"() <{level = 10 : i32, message = "bqd,bkd->bqk"}> : () -> ()
    %cst_29 = arith.constant dense<0.000000e+00> : vector<2x16x16xf32>
    %96 = tpu.matmul %91, %93, %cst_29 {dimension_numbers = #tpu.dot_dimension_numbers<[2], [2], [1], [1], [0, 0, 0, 1, 1, 1], [0], [0]>} : vector<2x16x32xbf16>, vector<2x16x32xbf16>, vector<2x16x16xf32> -> vector<2x16x16xf32>
    "tpu.trace_stop"() : () -> ()
    %cst_30 = arith.constant dense<0xFF800000> : vector<2x16xf32>
    %97 = vector.multi_reduction <maximumf>, %96, %cst_30 [2] : vector<2x16x16xf32> to vector<2x16xf32>
    %98 = vector.shape_cast %97 : vector<2x16xf32> to vector<2x16x1xf32>
    %99 = vector.broadcast %98 : vector<2x16x1xf32> to vector<2x16x16xf32>
    %100 = arith.subf %96, %99 : vector<2x16x16xf32>
    %101 = math.exp %100 : vector<2x16x16xf32>
    %cst_31 = arith.constant dense<0.000000e+00> : vector<2x16xf32>
    %102 = vector.multi_reduction <add>, %101, %cst_31 [2] : vector<2x16x16xf32> to vector<2x16xf32>
    %103 = vector.shape_cast %102 : vector<2x16xf32> to vector<2x16x1xf32>
    %104 = vector.broadcast %103 : vector<2x16x1xf32> to vector<2x16x16xf32>
    %105 = arith.divf %101, %104 : vector<2x16x16xf32>
    %106 = arith.truncf %105 : vector<2x16x16xf32> to vector<2x16x16xbf16>
    "tpu.trace_start"() <{level = 10 : i32, message = "bqk,bkd->bqd"}> : () -> ()
    %cst_32 = arith.constant dense<0.000000e+00> : vector<2x16x32xf32>
    %107 = tpu.matmul %106, %95, %cst_32 {dimension_numbers = #tpu.dot_dimension_numbers<[2], [1], [1], [2], [0, 0, 0, 1, 1, 2], [0], [0]>} : vector<2x16x16xbf16>, vector<2x16x32xbf16>, vector<2x16x32xf32> -> vector<2x16x32xf32>
    "tpu.trace_stop"() : () -> ()
    %108 = vector.shape_cast %107 : vector<2x16x32xf32> to vector<32x32xf32>
    %109 = arith.truncf %108 : vector<32x32xf32> to vector<32x32xbf16>
    %c0_33 = arith.constant 0 : index
    %c64 = arith.constant 64 : index
    %110 = vector.load %arg8[%c0_33, %c64] : memref<32x128xbf16, #tpu.memory_space<vmem>>, vector<32x32xbf16>
    tpu.vector_store %arg8[%c0_33, %c64], %109 {strides = array<i32>} : memref<32x128xbf16, #tpu.memory_space<vmem>>, vector<32x32xbf16>,
    %111 = vector.extract_strided_slice %31 {offsets = [0, 0, 96], sizes = [2, 16, 32], strides = [1, 1, 1]} : vector<2x16x128xf32> to vector<2x16x32xf32>
    %cst_34 = arith.constant 0.176776692 : f32
    %112 = vector.broadcast %cst_34 : f32 to vector<2x16x32xf32>
    %113 = arith.mulf %111, %112 : vector<2x16x32xf32>
    %114 = arith.truncf %113 : vector<2x16x32xf32> to vector<2x16x32xbf16>
    %115 = vector.extract_strided_slice %36 {offsets = [0, 0, 96], sizes = [2, 16, 32], strides = [1, 1, 1]} : vector<2x16x128xf32> to vector<2x16x32xf32>
    %116 = arith.truncf %115 : vector<2x16x32xf32> to vector<2x16x32xbf16>
    %117 = vector.extract_strided_slice %41 {offsets = [0, 0, 96], sizes = [2, 16, 32], strides = [1, 1, 1]} : vector<2x16x128xf32> to vector<2x16x32xf32>
    %118 = arith.truncf %117 : vector<2x16x32xf32> to vector<2x16x32xbf16>
    "tpu.trace_start"() <{level = 10 : i32, message = "bqd,bkd->bqk"}> : () -> ()
    %cst_35 = arith.constant dense<0.000000e+00> : vector<2x16x16xf32>
    %119 = tpu.matmul %114, %116, %cst_35 {dimension_numbers = #tpu.dot_dimension_numbers<[2], [2], [1], [1], [0, 0, 0, 1, 1, 1], [0], [0]>} : vector<2x16x32xbf16>, vector<2x16x32xbf16>, vector<2x16x16xf32> -> vector<2x16x16xf32>
    "tpu.trace_stop"() : () -> ()
    %cst_36 = arith.constant dense<0xFF800000> : vector<2x16xf32>
    %120 = vector.multi_reduction <maximumf>, %119, %cst_36 [2] : vector<2x16x16xf32> to vector<2x16xf32>
    %121 = vector.shape_cast %120 : vector<2x16xf32> to vector<2x16x1xf32>
    %122 = vector.broadcast %121 : vector<2x16x1xf32> to vector<2x16x16xf32>
    %123 = arith.subf %119, %122 : vector<2x16x16xf32>
    %124 = math.exp %123 : vector<2x16x16xf32>
    %cst_37 = arith.constant dense<0.000000e+00> : vector<2x16xf32>
    %125 = vector.multi_reduction <add>, %124, %cst_37 [2] : vector<2x16x16xf32> to vector<2x16xf32>
    %126 = vector.shape_cast %125 : vector<2x16xf32> to vector<2x16x1xf32>
    %127 = vector.broadcast %126 : vector<2x16x1xf32> to vector<2x16x16xf32>
    %128 = arith.divf %124, %127 : vector<2x16x16xf32>
    %129 = arith.truncf %128 : vector<2x16x16xf32> to vector<2x16x16xbf16>
    "tpu.trace_start"() <{level = 10 : i32, message = "bqk,bkd->bqd"}> : () -> ()
    %cst_38 = arith.constant dense<0.000000e+00> : vector<2x16x32xf32>
    %130 = tpu.matmul %129, %118, %cst_38 {dimension_numbers = #tpu.dot_dimension_numbers<[2], [1], [1], [2], [0, 0, 0, 1, 1, 2], [0], [0]>} : vector<2x16x16xbf16>, vector<2x16x32xbf16>, vector<2x16x32xf32> -> vector<2x16x32xf32>
    "tpu.trace_stop"() : () -> ()
    %131 = vector.shape_cast %130 : vector<2x16x32xf32> to vector<32x32xf32>
    %132 = arith.truncf %131 : vector<32x32xf32> to vector<32x32xbf16>
    %c0_39 = arith.constant 0 : index
    %c96 = arith.constant 96 : index
    %133 = vector.load %arg8[%c0_39, %c96] : memref<32x128xbf16, #tpu.memory_space<vmem>>, vector<32x32xbf16>
    tpu.vector_store %arg8[%c0_39, %c96], %132 {strides = array<i32>} : memref<32x128xbf16, #tpu.memory_space<vmem>>, vector<32x32xbf16>,
    %c0_40 = arith.constant 0 : index
    %c0_41 = arith.constant 0 : index
    %134 = vector.load %arg8[%c0_40, %c0_41] : memref<32x128xbf16, #tpu.memory_space<vmem>>, vector<32x128xbf16>
    %c0_42 = arith.constant 0 : index
    %c0_43 = arith.constant 0 : index
    %135 = vector.load %arg4[%c0_42, %c0_43] : memref<128x128xbf16, #tpu.memory_space<vmem>>, vector<128x128xbf16>
    %cst_44 = arith.constant dense<0.000000e+00> : vector<32x128xf32>
    %136 = tpu.matmul %134, %135, %cst_44 {dimension_numbers = #tpu.dot_dimension_numbers<[1], [0], [0], [1], [0, 0, 1, 1], [], []>} : vector<32x128xbf16>, vector<128x128xbf16>, vector<32x128xf32> -> vector<32x128xf32>
    %c5 = arith.constant 5 : index
    %c0_45 = arith.constant 0 : index
    %137 = vector.load %arg2[%c5, %c0_45] : memref<13x128xf32, #tpu.memory_space<vmem>>, vector<1x128xf32>
    %138 = vector.broadcast %137 : vector<1x128xf32> to vector<32x128xf32>
    %139 = arith.addf %136, %138 : vector<32x128xf32>
    %140 = arith.addf %1, %139 : vector<32x128xf32>
    %c6 = arith.constant 6 : index
    %c0_46 = arith.constant 0 : index
    %141 = vector.load %arg2[%c6, %c0_46] : memref<13x128xf32, #tpu.memory_space<vmem>>, vector<1x128xf32>
    %c7 = arith.constant 7 : index
    %c0_47 = arith.constant 0 : index
    %142 = vector.load %arg2[%c7, %c0_47] : memref<13x128xf32, #tpu.memory_space<vmem>>, vector<1x128xf32>
    %cst_48 = arith.constant dense<0.000000e+00> : vector<32xf32>
    %143 = vector.multi_reduction <add>, %140, %cst_48 [1] : vector<32x128xf32> to vector<32xf32>
    %144 = vector.shape_cast %143 : vector<32xf32> to vector<32x1xf32>
    %cst_49 = arith.constant 1.280000e+02 : f32
    %145 = vector.broadcast %cst_49 : f32 to vector<32x1xf32>
    %146 = arith.divf %144, %145 : vector<32x1xf32>
    %147 = vector.broadcast %146 : vector<32x1xf32> to vector<32x128xf32>
    %148 = arith.subf %140, %147 : vector<32x128xf32>
    %149 = arith.mulf %148, %148 : vector<32x128xf32>
    %cst_50 = arith.constant dense<0.000000e+00> : vector<32xf32>
    %150 = vector.multi_reduction <add>, %149, %cst_50 [1] : vector<32x128xf32> to vector<32xf32>
    %151 = vector.shape_cast %150 : vector<32xf32> to vector<32x1xf32>
    %cst_51 = arith.constant 1.280000e+02 : f32
    %152 = vector.broadcast %cst_51 : f32 to vector<32x1xf32>
    %153 = arith.divf %151, %152 : vector<32x1xf32>
    %cst_52 = arith.constant 9.99999974E-6 : f32
    %154 = vector.broadcast %cst_52 : f32 to vector<32x1xf32>
    %155 = arith.addf %153, %154 : vector<32x1xf32>
    %156 = math.rsqrt %155 : vector<32x1xf32>
    %157 = vector.broadcast %156 : vector<32x1xf32> to vector<32x128xf32>
    %158 = arith.mulf %148, %157 : vector<32x128xf32>
    %159 = vector.broadcast %141 : vector<1x128xf32> to vector<32x128xf32>
    %160 = arith.mulf %158, %159 : vector<32x128xf32>
    %161 = vector.broadcast %142 : vector<1x128xf32> to vector<32x128xf32>
    %162 = arith.addf %160, %161 : vector<32x128xf32>
    %163 = arith.truncf %162 : vector<32x128xf32> to vector<32x128xbf16>
    %cst_53 = arith.constant 0.000000e+00 : f32
    %164 = vector.broadcast %cst_53 : f32 to vector<32x128xf32>
    %c0_i32 = arith.constant 0 : i32
    %c4_i32 = arith.constant 4 : i32
    %165 = arith.addi %c0_i32, %c4_i32 : i32
    %c1_i32 = arith.constant 1 : i32
    %166 = scf.for %arg9 = %c0_i32 to %165 step %c1_i32 iter_args(%arg10 = %164) -> (vector<32x128xf32>)  : i32 {
      %173 = arith.index_cast %arg9 : i32 to index
      %c0_59 = arith.constant 0 : index
      %c0_60 = arith.constant 0 : index
      %174 = vector.load %arg5[%173, %c0_59, %c0_60] : memref<4x128x128xbf16, #tpu.memory_space<vmem>>, vector<1x128x128xbf16>
      %175 = vector.shape_cast %174 : vector<1x128x128xbf16> to vector<128x128xbf16>
      %cst_61 = arith.constant dense<0.000000e+00> : vector<32x128xf32>
      %176 = tpu.matmul %163, %175, %cst_61 {dimension_numbers = #tpu.dot_dimension_numbers<[1], [0], [0], [1], [0, 0, 1, 1], [], []>} : vector<32x128xbf16>, vector<128x128xbf16>, vector<32x128xf32> -> vector<32x128xf32>
      %c8_i32 = arith.constant 8 : i32
      %177 = arith.addi %c8_i32, %arg9 : i32
      %178 = arith.index_cast %177 : i32 to index
      %c0_62 = arith.constant 0 : index
      %179 = vector.load %arg2[%178, %c0_62] : memref<13x128xf32, #tpu.memory_space<vmem>>, vector<1x128xf32>
      %180 = vector.broadcast %179 : vector<1x128xf32> to vector<32x128xf32>
      %181 = arith.addf %176, %180 : vector<32x128xf32>
      %cst_63 = arith.constant 5.000000e-01 : f32
      %182 = vector.broadcast %cst_63 : f32 to vector<32x128xf32>
      %183 = arith.mulf %182, %181 : vector<32x128xf32>
      %184 = arith.mulf %181, %181 : vector<32x128xf32>
      %185 = arith.mulf %184, %181 : vector<32x128xf32>
      %cst_64 = arith.constant 4.471500e-02 : f32
      %186 = vector.broadcast %cst_64 : f32 to vector<32x128xf32>
      %187 = arith.mulf %186, %185 : vector<32x128xf32>
      %188 = arith.addf %181, %187 : vector<32x128xf32>
      %cst_65 = arith.constant 0.797884583 : f32
      %189 = vector.broadcast %cst_65 : f32 to vector<32x128xf32>
      %190 = arith.mulf %189, %188 : vector<32x128xf32>
      %191 = math.tanh %190 : vector<32x128xf32>
      %cst_66 = arith.constant 1.000000e+00 : f32
      %192 = vector.broadcast %cst_66 : f32 to vector<32x128xf32>
      %193 = arith.addf %192, %191 : vector<32x128xf32>
      %194 = arith.mulf %183, %193 : vector<32x128xf32>
      %195 = arith.truncf %194 : vector<32x128xf32> to vector<32x128xbf16>
      %196 = arith.index_cast %arg9 : i32 to index
      %c0_67 = arith.constant 0 : index
      %c0_68 = arith.constant 0 : index
      %197 = vector.load %arg6[%196, %c0_67, %c0_68] : memref<4x128x128xbf16, #tpu.memory_space<vmem>>, vector<1x128x128xbf16>
      %198 = vector.shape_cast %197 : vector<1x128x128xbf16> to vector<128x128xbf16>
      %cst_69 = arith.constant dense<0.000000e+00> : vector<32x128xf32>
      %199 = tpu.matmul %195, %198, %cst_69 {dimension_numbers = #tpu.dot_dimension_numbers<[1], [0], [0], [1], [0, 0, 1, 1], [], []>} : vector<32x128xbf16>, vector<128x128xbf16>, vector<32x128xf32> -> vector<32x128xf32>
      %200 = arith.addf %arg10, %199 : vector<32x128xf32>
      scf.yield %200 : vector<32x128xf32>
    }
    %c4_i32_54 = arith.constant 4 : i32
    %167 = arith.addf %140, %166 : vector<32x128xf32>
    %c12 = arith.constant 12 : index
    %c0_55 = arith.constant 0 : index
    %168 = vector.load %arg2[%c12, %c0_55] : memref<13x128xf32, #tpu.memory_space<vmem>>, vector<1x128xf32>
    %169 = vector.broadcast %168 : vector<1x128xf32> to vector<32x128xf32>
    %170 = arith.addf %167, %169 : vector<32x128xf32>
    %171 = vector.shape_cast %170 : vector<32x128xf32> to vector<2x16x128xf32>
    %c0_56 = arith.constant 0 : index
    %c0_57 = arith.constant 0 : index
    %c0_58 = arith.constant 0 : index
    %172 = vector.load %arg7[%c0_56, %c0_57, %c0_58] : memref<2x16x128xf32, #tpu.memory_space<vmem>>, vector<2x16x128xf32>
    tpu.vector_store %arg7[%c0_56, %c0_57, %c0_58], %171 {strides = array<i32>} : memref<2x16x128xf32, #tpu.memory_space<vmem>>, vector<2x16x128xf32>,
    return
  }
  func.func @transform_0(%arg0: i32) -> (i32, i32, i32) {
    %c0_i32 = arith.constant 0 : i32
    %c0_i32_0 = arith.constant 0 : i32
    %c0_i32_1 = arith.constant 0 : i32
    return %arg0, %c0_i32, %c0_i32_0 : i32, i32, i32
  }
  func.func @transform_1(%arg0: i32) -> (i32, i32) {
    %c0_i32 = arith.constant 0 : i32
    %c0_i32_0 = arith.constant 0 : i32
    %c0_i32_1 = arith.constant 0 : i32
    return %c0_i32, %c0_i32_0 : i32, i32
  }
  func.func @transform_2(%arg0: i32) -> (i32, i32) {
    %c0_i32 = arith.constant 0 : i32
    %c0_i32_0 = arith.constant 0 : i32
    %c0_i32_1 = arith.constant 0 : i32
    return %c0_i32, %c0_i32_0 : i32, i32
  }
  func.func @transform_3(%arg0: i32) -> (i32, i32) {
    %c0_i32 = arith.constant 0 : i32
    %c0_i32_0 = arith.constant 0 : i32
    %c0_i32_1 = arith.constant 0 : i32
    return %c0_i32, %c0_i32_0 : i32, i32
  }
  func.func @transform_4(%arg0: i32) -> (i32, i32, i32) {
    %c0_i32 = arith.constant 0 : i32
    %c0_i32_0 = arith.constant 0 : i32
    %c0_i32_1 = arith.constant 0 : i32
    %c0_i32_2 = arith.constant 0 : i32
    return %c0_i32, %c0_i32_0, %c0_i32_1 : i32, i32, i32
  }
  func.func @transform_5(%arg0: i32) -> (i32, i32, i32) {
    %c0_i32 = arith.constant 0 : i32
    %c0_i32_0 = arith.constant 0 : i32
    %c0_i32_1 = arith.constant 0 : i32
    %c0_i32_2 = arith.constant 0 : i32
    return %c0_i32, %c0_i32_0, %c0_i32_1 : i32, i32, i32
  }
  func.func @transform_6(%arg0: i32) -> (i32, i32, i32) {
    %c0_i32 = arith.constant 0 : i32
    %c0_i32_0 = arith.constant 0 : i32
    %c0_i32_1 = arith.constant 0 : i32
    return %arg0, %c0_i32, %c0_i32_0 : i32, i32, i32
  }
}

module attributes {stable_mosaic.version = 11 : i64} {
  func.func @kernel(%arg0: i32, %arg1: memref<2x16x128xf32, #tpu.memory_space<vmem>>, %arg2: memref<13x128xf32, #tpu.memory_space<vmem>>, %arg3: memref<128x384xbf16, #tpu.memory_space<vmem>>, %arg4: memref<128x128xbf16, #tpu.memory_space<vmem>>, %arg5: memref<4x128x128xbf16, #tpu.memory_space<vmem>>, %arg6: memref<4x128x128xbf16, #tpu.memory_space<vmem>>, %arg7: memref<2x16x128xf32, #tpu.memory_space<vmem>>, %arg8: memref<32x128xbf16, #tpu.memory_space<vmem>>) attributes {dimension_semantics = [#tpu.dimension_semantics<parallel>], iteration_bounds = array<i64: 1>, scalar_prefetch = 0 : i64, scratch_operands = 1 : i64, tpu.core_type = #tpu.core_type<tc>, window_params = [{transform_indices = @transform_0, window_bounds = array<i64: 2, 16, 128>}, {pipeline_mode = #tpu.pipeline_mode<synchronous>, transform_indices = @transform_1, window_bounds = array<i64: 13, 128>}, {pipeline_mode = #tpu.pipeline_mode<synchronous>, transform_indices = @transform_2, window_bounds = array<i64: 128, 384>}, {pipeline_mode = #tpu.pipeline_mode<synchronous>, transform_indices = @transform_3, window_bounds = array<i64: 128, 128>}, {pipeline_mode = #tpu.pipeline_mode<synchronous>, transform_indices = @transform_4, window_bounds = array<i64: 4, 128, 128>}, {pipeline_mode = #tpu.pipeline_mode<synchronous>, transform_indices = @transform_5, window_bounds = array<i64: 4, 128, 128>}, {transform_indices = @transform_6, window_bounds = array<i64: 2, 16, 128>}]} {
    %c0 = arith.constant 0 : index
    %c0_0 = arith.constant 0 : index
    %c0_1 = arith.constant 0 : index
    %0 = vector.load %arg1[%c0, %c0_0, %c0_1] : memref<2x16x128xf32, #tpu.memory_space<vmem>>, vector<2x16x128xf32>
    %1 = vector.shape_cast %0 : vector<2x16x128xf32> to vector<32x128xf32>
    %c0_2 = arith.constant 0 : index
    %c0_3 = arith.constant 0 : index
    %2 = vector.load %arg2[%c0_2, %c0_3] : memref<13x128xf32, #tpu.memory_space<vmem>>, vector<1x128xf32>
    %c1 = arith.constant 1 : index
    %c0_4 = arith.constant 0 : index
    %3 = vector.load %arg2[%c1, %c0_4] : memref<13x128xf32, #tpu.memory_space<vmem>>, vector<1x128xf32>
    %cst = arith.constant dense<0.000000e+00> : vector<32xf32>
    %4 = vector.multi_reduction <add>, %1, %cst [1] : vector<32x128xf32> to vector<32xf32>
    %5 = vector.shape_cast %4 : vector<32xf32> to vector<32x1xf32>
    %cst_5 = arith.constant 1.280000e+02 : f32
    %6 = vector.broadcast %cst_5 : f32 to vector<32x1xf32>
    %7 = arith.divf %5, %6 : vector<32x1xf32>
    %8 = vector.broadcast %7 : vector<32x1xf32> to vector<32x128xf32>
    %9 = arith.subf %1, %8 : vector<32x128xf32>
    %10 = arith.mulf %9, %9 : vector<32x128xf32>
    %cst_6 = arith.constant dense<0.000000e+00> : vector<32xf32>
    %11 = vector.multi_reduction <add>, %10, %cst_6 [1] : vector<32x128xf32> to vector<32xf32>
    %12 = vector.shape_cast %11 : vector<32xf32> to vector<32x1xf32>
    %cst_7 = arith.constant 1.280000e+02 : f32
    %13 = vector.broadcast %cst_7 : f32 to vector<32x1xf32>
    %14 = arith.divf %12, %13 : vector<32x1xf32>
    %cst_8 = arith.constant 9.99999974E-6 : f32
    %15 = vector.broadcast %cst_8 : f32 to vector<32x1xf32>
    %16 = arith.addf %14, %15 : vector<32x1xf32>
    %17 = math.rsqrt %16 : vector<32x1xf32>
    %18 = vector.broadcast %17 : vector<32x1xf32> to vector<32x128xf32>
    %19 = arith.mulf %9, %18 : vector<32x128xf32>
    %20 = vector.broadcast %2 : vector<1x128xf32> to vector<32x128xf32>
    %21 = arith.mulf %19, %20 : vector<32x128xf32>
    %22 = vector.broadcast %3 : vector<1x128xf32> to vector<32x128xf32>
    %23 = arith.addf %21, %22 : vector<32x128xf32>
    %24 = arith.truncf %23 : vector<32x128xf32> to vector<32x128xbf16>
    %c0_9 = arith.constant 0 : index
    %c0_10 = arith.constant 0 : index
    %25 = vector.load %arg3[%c0_9, %c0_10] : memref<128x384xbf16, #tpu.memory_space<vmem>>, vector<128x384xbf16>
    %cst_11 = arith.constant dense<0.000000e+00> : vector<32x384xf32>
    %26 = tpu.matmul %24, %25, %cst_11 {dimension_numbers = #tpu.dot_dimension_numbers<[1], [0], [0], [1], [0, 0, 1, 1], [], []>} : vector<32x128xbf16>, vector<128x384xbf16>, vector<32x384xf32> -> vector<32x384xf32>
    %27 = vector.extract_strided_slice %26 {offsets = [0, 0], sizes = [32, 128], strides = [1, 1]} : vector<32x384xf32> to vector<32x128xf32>
    %c2 = arith.constant 2 : index
    %c0_12 = arith.constant 0 : index
    %28 = vector.load %arg2[%c2, %c0_12] : memref<13x128xf32, #tpu.memory_space<vmem>>, vector<1x128xf32>
    %29 = vector.broadcast %28 : vector<1x128xf32> to vector<32x128xf32>
    %30 = arith.addf %27, %29 : vector<32x128xf32>
    %31 = vector.shape_cast %30 : vector<32x128xf32> to vector<2x16x128xf32>
    %32 = vector.extract_strided_slice %26 {offsets = [0, 128], sizes = [32, 128], strides = [1, 1]} : vector<32x384xf32> to vector<32x128xf32>
    %c3 = arith.constant 3 : index
    %c0_13 = arith.constant 0 : index
    %33 = vector.load %arg2[%c3, %c0_13] : memref<13x128xf32, #tpu.memory_space<vmem>>, vector<1x128xf32>
    %34 = vector.broadcast %33 : vector<1x128xf32> to vector<32x128xf32>
    %35 = arith.addf %32, %34 : vector<32x128xf32>
    %36 = vector.shape_cast %35 : vector<32x128xf32> to vector<2x16x128xf32>
    %37 = vector.extract_strided_slice %26 {offsets = [0, 256], sizes = [32, 128], strides = [1, 1]} : vector<32x384xf32> to vector<32x128xf32>
    %c4 = arith.constant 4 : index
    %c0_14 = arith.constant 0 : index
    %38 = vector.load %arg2[%c4, %c0_14] : memref<13x128xf32, #tpu.memory_space<vmem>>, vector<1x128xf32>
    %39 = vector.broadcast %38 : vector<1x128xf32> to vector<32x128xf32>
    %40 = arith.addf %37, %39 : vector<32x128xf32>
    %41 = vector.shape_cast %40 : vector<32x128xf32> to vector<2x16x128xf32>
    %42 = vector.extract_strided_slice %31 {offsets = [0, 0, 0], sizes = [2, 16, 32], strides = [1, 1, 1]} : vector<2x16x128xf32> to vector<2x16x32xf32>
    %cst_15 = arith.constant 0.176776692 : f32
    %43 = vector.broadcast %cst_15 : f32 to vector<2x16x32xf32>
    %44 = arith.mulf %42, %43 : vector<2x16x32xf32>
    %45 = arith.truncf %44 : vector<2x16x32xf32> to vector<2x16x32xbf16>
    %46 = vector.extract_strided_slice %36 {offsets = [0, 0, 0], sizes = [2, 16, 32], strides = [1, 1, 1]} : vector<2x16x128xf32> to vector<2x16x32xf32>
    %47 = arith.truncf %46 : vector<2x16x32xf32> to vector<2x16x32xbf16>
    %48 = vector.extract_strided_slice %41 {offsets = [0, 0, 0], sizes = [2, 16, 32], strides = [1, 1, 1]} : vector<2x16x128xf32> to vector<2x16x32xf32>
    %49 = arith.truncf %48 : vector<2x16x32xf32> to vector<2x16x32xbf16>
    "tpu.trace_start"() <{level = 10 : i32, message = "bqd,bkd->bqk"}> : () -> ()
    %cst_16 = arith.constant dense<0.000000e+00> : vector<2x16x16xf32>
    %50 = tpu.matmul %45, %47, %cst_16 {dimension_numbers = #tpu.dot_dimension_numbers<[2], [2], [1], [1], [0, 0, 0, 1, 1, 1], [0], [0]>} : vector<2x16x32xbf16>, vector<2x16x32xbf16>, vector<2x16x16xf32> -> vector<2x16x16xf32>
    "tpu.trace_stop"() : () -> ()
    %cst_17 = arith.constant dense<0xFF800000> : vector<2x16xf32>
    %51 = vector.multi_reduction <maximumf>, %50, %cst_17 [2] : vector<2x16x16xf32> to vector<2x16xf32>
    %52 = vector.shape_cast %51 : vector<2x16xf32> to vector<2x16x1xf32>
    %53 = vector.broadcast %52 : vector<2x16x1xf32> to vector<2x16x16xf32>
    %54 = arith.subf %50, %53 : vector<2x16x16xf32>
    %55 = math.exp %54 : vector<2x16x16xf32>
    %cst_18 = arith.constant dense<0.000000e+00> : vector<2x16xf32>
    %56 = vector.multi_reduction <add>, %55, %cst_18 [2] : vector<2x16x16xf32> to vector<2x16xf32>
    %57 = vector.shape_cast %56 : vector<2x16xf32> to vector<2x16x1xf32>
    %58 = vector.broadcast %57 : vector<2x16x1xf32> to vector<2x16x16xf32>
    %59 = arith.divf %55, %58 : vector<2x16x16xf32>
    %60 = arith.truncf %59 : vector<2x16x16xf32> to vector<2x16x16xbf16>
    "tpu.trace_start"() <{level = 10 : i32, message = "bqk,bkd->bqd"}> : () -> ()
    %cst_19 = arith.constant dense<0.000000e+00> : vector<2x16x32xf32>
    %61 = tpu.matmul %60, %49, %cst_19 {dimension_numbers = #tpu.dot_dimension_numbers<[2], [1], [1], [2], [0, 0, 0, 1, 1, 2], [0], [0]>} : vector<2x16x16xbf16>, vector<2x16x32xbf16>, vector<2x16x32xf32> -> vector<2x16x32xf32>
    "tpu.trace_stop"() : () -> ()
    %62 = vector.shape_cast %61 : vector<2x16x32xf32> to vector<32x32xf32>
    %63 = arith.truncf %62 : vector<32x32xf32> to vector<32x32xbf16>
    %c0_20 = arith.constant 0 : index
    %c0_21 = arith.constant 0 : index
    %64 = vector.load %arg8[%c0_20, %c0_21] : memref<32x128xbf16, #tpu.memory_space<vmem>>, vector<32x32xbf16>
    tpu.vector_store %arg8[%c0_20, %c0_21], %63 {strides = array<i32>} : memref<32x128xbf16, #tpu.memory_space<vmem>>, vector<32x32xbf16>,
    %65 = vector.extract_strided_slice %31 {offsets = [0, 0, 32], sizes = [2, 16, 32], strides = [1, 1, 1]} : vector<2x16x128xf32> to vector<2x16x32xf32>
    %cst_22 = arith.constant 0.176776692 : f32
    %66 = vector.broadcast %cst_22 : f32 to vector<2x16x32xf32>
    %67 = arith.mulf %65, %66 : vector<2x16x32xf32>
    %68 = arith.truncf %67 : vector<2x16x32xf32> to vector<2x16x32xbf16>
    %69 = vector.extract_strided_slice %36 {offsets = [0, 0, 32], sizes = [2, 16, 32], strides = [1, 1, 1]} : vector<2x16x128xf32> to vector<2x16x32xf32>
    %70 = arith.truncf %69 : vector<2x16x32xf32> to vector<2x16x32xbf16>
    %71 = vector.extract_strided_slice %41 {offsets = [0, 0, 32], sizes = [2, 16, 32], strides = [1, 1, 1]} : vector<2x16x128xf32> to vector<2x16x32xf32>
    %72 = arith.truncf %71 : vector<2x16x32xf32> to vector<2x16x32xbf16>
    "tpu.trace_start"() <{level = 10 : i32, message = "bqd,bkd->bqk"}> : () -> ()
    %cst_23 = arith.constant dense<0.000000e+00> : vector<2x16x16xf32>
    %73 = tpu.matmul %68, %70, %cst_23 {dimension_numbers = #tpu.dot_dimension_numbers<[2], [2], [1], [1], [0, 0, 0, 1, 1, 1], [0], [0]>} : vector<2x16x32xbf16>, vector<2x16x32xbf16>, vector<2x16x16xf32> -> vector<2x16x16xf32>
    "tpu.trace_stop"() : () -> ()
    %cst_24 = arith.constant dense<0xFF800000> : vector<2x16xf32>
    %74 = vector.multi_reduction <maximumf>, %73, %cst_24 [2] : vector<2x16x16xf32> to vector<2x16xf32>
    %75 = vector.shape_cast %74 : vector<2x16xf32> to vector<2x16x1xf32>
    %76 = vector.broadcast %75 : vector<2x16x1xf32> to vector<2x16x16xf32>
    %77 = arith.subf %73, %76 : vector<2x16x16xf32>
    %78 = math.exp %77 : vector<2x16x16xf32>
    %cst_25 = arith.constant dense<0.000000e+00> : vector<2x16xf32>
    %79 = vector.multi_reduction <add>, %78, %cst_25 [2] : vector<2x16x16xf32> to vector<2x16xf32>
    %80 = vector.shape_cast %79 : vector<2x16xf32> to vector<2x16x1xf32>
    %81 = vector.broadcast %80 : vector<2x16x1xf32> to vector<2x16x16xf32>
    %82 = arith.divf %78, %81 : vector<2x16x16xf32>
    %83 = arith.truncf %82 : vector<2x16x16xf32> to vector<2x16x16xbf16>
    "tpu.trace_start"() <{level = 10 : i32, message = "bqk,bkd->bqd"}> : () -> ()
    %cst_26 = arith.constant dense<0.000000e+00> : vector<2x16x32xf32>
    %84 = tpu.matmul %83, %72, %cst_26 {dimension_numbers = #tpu.dot_dimension_numbers<[2], [1], [1], [2], [0, 0, 0, 1, 1, 2], [0], [0]>} : vector<2x16x16xbf16>, vector<2x16x32xbf16>, vector<2x16x32xf32> -> vector<2x16x32xf32>
    "tpu.trace_stop"() : () -> ()
    %85 = vector.shape_cast %84 : vector<2x16x32xf32> to vector<32x32xf32>
    %86 = arith.truncf %85 : vector<32x32xf32> to vector<32x32xbf16>
    %c0_27 = arith.constant 0 : index
    %c32 = arith.constant 32 : index
    %87 = vector.load %arg8[%c0_27, %c32] : memref<32x128xbf16, #tpu.memory_space<vmem>>, vector<32x32xbf16>
    tpu.vector_store %arg8[%c0_27, %c32], %86 {strides = array<i32>} : memref<32x128xbf16, #tpu.memory_space<vmem>>, vector<32x32xbf16>,
    %88 = vector.extract_strided_slice %31 {offsets = [0, 0, 64], sizes = [2, 16, 32], strides = [1, 1, 1]} : vector<2x16x128xf32> to vector<2x16x32xf32>
    %cst_28 = arith.constant 0.176776692 : f32
    %89 = vector.broadcast %cst_28 : f32 to vector<2x16x32xf32>
    %90 = arith.mulf %88, %89 : vector<2x16x32xf32>
    %91 = arith.truncf %90 : vector<2x16x32xf32> to vector<2x16x32xbf16>
    %92 = vector.extract_strided_slice %36 {offsets = [0, 0, 64], sizes = [2, 16, 32], strides = [1, 1, 1]} : vector<2x16x128xf32> to vector<2x16x32xf32>
    %93 = arith.truncf %92 : vector<2x16x32xf32> to vector<2x16x32xbf16>
    %94 = vector.extract_strided_slice %41 {offsets = [0, 0, 64], sizes = [2, 16, 32], strides = [1, 1, 1]} : vector<2x16x128xf32> to vector<2x16x32xf32>
    %95 = arith.truncf %94 : vector<2x16x32xf32> to vector<2x16x32xbf16>
    "tpu.trace_start"() <{level = 10 : i32, message = "bqd,bkd->bqk"}> : () -> ()
    %cst_29 = arith.constant dense<0.000000e+00> : vector<2x16x16xf32>
    %96 = tpu.matmul %91, %93, %cst_29 {dimension_numbers = #tpu.dot_dimension_numbers<[2], [2], [1], [1], [0, 0, 0, 1, 1, 1], [0], [0]>} : vector<2x16x32xbf16>, vector<2x16x32xbf16>, vector<2x16x16xf32> -> vector<2x16x16xf32>
    "tpu.trace_stop"() : () -> ()
    %cst_30 = arith.constant dense<0xFF800000> : vector<2x16xf32>
    %97 = vector.multi_reduction <maximumf>, %96, %cst_30 [2] : vector<2x16x16xf32> to vector<2x16xf32>
    %98 = vector.shape_cast %97 : vector<2x16xf32> to vector<2x16x1xf32>
    %99 = vector.broadcast %98 : vector<2x16x1xf32> to vector<2x16x16xf32>
    %100 = arith.subf %96, %99 : vector<2x16x16xf32>
    %101 = math.exp %100 : vector<2x16x16xf32>
    %cst_31 = arith.constant dense<0.000000e+00> : vector<2x16xf32>
    %102 = vector.multi_reduction <add>, %101, %cst_31 [2] : vector<2x16x16xf32> to vector<2x16xf32>
    %103 = vector.shape_cast %102 : vector<2x16xf32> to vector<2x16x1xf32>
    %104 = vector.broadcast %103 : vector<2x16x1xf32> to vector<2x16x16xf32>
    %105 = arith.divf %101, %104 : vector<2x16x16xf32>
    %106 = arith.truncf %105 : vector<2x16x16xf32> to vector<2x16x16xbf16>
    "tpu.trace_start"() <{level = 10 : i32, message = "bqk,bkd->bqd"}> : () -> ()
    %cst_32 = arith.constant dense<0.000000e+00> : vector<2x16x32xf32>
    %107 = tpu.matmul %106, %95, %cst_32 {dimension_numbers = #tpu.dot_dimension_numbers<[2], [1], [1], [2], [0, 0, 0, 1, 1, 2], [0], [0]>} : vector<2x16x16xbf16>, vector<2x16x32xbf16>, vector<2x16x32xf32> -> vector<2x16x32xf32>
    "tpu.trace_stop"() : () -> ()
    %108 = vector.shape_cast %107 : vector<2x16x32xf32> to vector<32x32xf32>
    %109 = arith.truncf %108 : vector<32x32xf32> to vector<32x32xbf16>
    %c0_33 = arith.constant 0 : index
    %c64 = arith.constant 64 : index
    %110 = vector.load %arg8[%c0_33, %c64] : memref<32x128xbf16, #tpu.memory_space<vmem>>, vector<32x32xbf16>
    tpu.vector_store %arg8[%c0_33, %c64], %109 {strides = array<i32>} : memref<32x128xbf16, #tpu.memory_space<vmem>>, vector<32x32xbf16>,
    %111 = vector.extract_strided_slice %31 {offsets = [0, 0, 96], sizes = [2, 16, 32], strides = [1, 1, 1]} : vector<2x16x128xf32> to vector<2x16x32xf32>
    %cst_34 = arith.constant 0.176776692 : f32
    %112 = vector.broadcast %cst_34 : f32 to vector<2x16x32xf32>
    %113 = arith.mulf %111, %112 : vector<2x16x32xf32>
    %114 = arith.truncf %113 : vector<2x16x32xf32> to vector<2x16x32xbf16>
    %115 = vector.extract_strided_slice %36 {offsets = [0, 0, 96], sizes = [2, 16, 32], strides = [1, 1, 1]} : vector<2x16x128xf32> to vector<2x16x32xf32>
    %116 = arith.truncf %115 : vector<2x16x32xf32> to vector<2x16x32xbf16>
    %117 = vector.extract_strided_slice %41 {offsets = [0, 0, 96], sizes = [2, 16, 32], strides = [1, 1, 1]} : vector<2x16x128xf32> to vector<2x16x32xf32>
    %118 = arith.truncf %117 : vector<2x16x32xf32> to vector<2x16x32xbf16>
    "tpu.trace_start"() <{level = 10 : i32, message = "bqd,bkd->bqk"}> : () -> ()
    %cst_35 = arith.constant dense<0.000000e+00> : vector<2x16x16xf32>
    %119 = tpu.matmul %114, %116, %cst_35 {dimension_numbers = #tpu.dot_dimension_numbers<[2], [2], [1], [1], [0, 0, 0, 1, 1, 1], [0], [0]>} : vector<2x16x32xbf16>, vector<2x16x32xbf16>, vector<2x16x16xf32> -> vector<2x16x16xf32>
    "tpu.trace_stop"() : () -> ()
    %cst_36 = arith.constant dense<0xFF800000> : vector<2x16xf32>
    %120 = vector.multi_reduction <maximumf>, %119, %cst_36 [2] : vector<2x16x16xf32> to vector<2x16xf32>
    %121 = vector.shape_cast %120 : vector<2x16xf32> to vector<2x16x1xf32>
    %122 = vector.broadcast %121 : vector<2x16x1xf32> to vector<2x16x16xf32>
    %123 = arith.subf %119, %122 : vector<2x16x16xf32>
    %124 = math.exp %123 : vector<2x16x16xf32>
    %cst_37 = arith.constant dense<0.000000e+00> : vector<2x16xf32>
    %125 = vector.multi_reduction <add>, %124, %cst_37 [2] : vector<2x16x16xf32> to vector<2x16xf32>
    %126 = vector.shape_cast %125 : vector<2x16xf32> to vector<2x16x1xf32>
    %127 = vector.broadcast %126 : vector<2x16x1xf32> to vector<2x16x16xf32>
    %128 = arith.divf %124, %127 : vector<2x16x16xf32>
    %129 = arith.truncf %128 : vector<2x16x16xf32> to vector<2x16x16xbf16>
    "tpu.trace_start"() <{level = 10 : i32, message = "bqk,bkd->bqd"}> : () -> ()
    %cst_38 = arith.constant dense<0.000000e+00> : vector<2x16x32xf32>
    %130 = tpu.matmul %129, %118, %cst_38 {dimension_numbers = #tpu.dot_dimension_numbers<[2], [1], [1], [2], [0, 0, 0, 1, 1, 2], [0], [0]>} : vector<2x16x16xbf16>, vector<2x16x32xbf16>, vector<2x16x32xf32> -> vector<2x16x32xf32>
    "tpu.trace_stop"() : () -> ()
    %131 = vector.shape_cast %130 : vector<2x16x32xf32> to vector<32x32xf32>
    %132 = arith.truncf %131 : vector<32x32xf32> to vector<32x32xbf16>
    %c0_39 = arith.constant 0 : index
    %c96 = arith.constant 96 : index
    %133 = vector.load %arg8[%c0_39, %c96] : memref<32x128xbf16, #tpu.memory_space<vmem>>, vector<32x32xbf16>
    tpu.vector_store %arg8[%c0_39, %c96], %132 {strides = array<i32>} : memref<32x128xbf16, #tpu.memory_space<vmem>>, vector<32x32xbf16>,
    %c0_40 = arith.constant 0 : index
    %c0_41 = arith.constant 0 : index
    %134 = vector.load %arg8[%c0_40, %c0_41] : memref<32x128xbf16, #tpu.memory_space<vmem>>, vector<32x128xbf16>
    %c0_42 = arith.constant 0 : index
    %c0_43 = arith.constant 0 : index
    %135 = vector.load %arg4[%c0_42, %c0_43] : memref<128x128xbf16, #tpu.memory_space<vmem>>, vector<128x128xbf16>
    %cst_44 = arith.constant dense<0.000000e+00> : vector<32x128xf32>
    %136 = tpu.matmul %134, %135, %cst_44 {dimension_numbers = #tpu.dot_dimension_numbers<[1], [0], [0], [1], [0, 0, 1, 1], [], []>} : vector<32x128xbf16>, vector<128x128xbf16>, vector<32x128xf32> -> vector<32x128xf32>
    %c5 = arith.constant 5 : index
    %c0_45 = arith.constant 0 : index
    %137 = vector.load %arg2[%c5, %c0_45] : memref<13x128xf32, #tpu.memory_space<vmem>>, vector<1x128xf32>
    %138 = vector.broadcast %137 : vector<1x128xf32> to vector<32x128xf32>
    %139 = arith.addf %136, %138 : vector<32x128xf32>
    %140 = arith.addf %1, %139 : vector<32x128xf32>
    %c6 = arith.constant 6 : index
    %c0_46 = arith.constant 0 : index
    %141 = vector.load %arg2[%c6, %c0_46] : memref<13x128xf32, #tpu.memory_space<vmem>>, vector<1x128xf32>
    %c7 = arith.constant 7 : index
    %c0_47 = arith.constant 0 : index
    %142 = vector.load %arg2[%c7, %c0_47] : memref<13x128xf32, #tpu.memory_space<vmem>>, vector<1x128xf32>
    %cst_48 = arith.constant dense<0.000000e+00> : vector<32xf32>
    %143 = vector.multi_reduction <add>, %140, %cst_48 [1] : vector<32x128xf32> to vector<32xf32>
    %144 = vector.shape_cast %143 : vector<32xf32> to vector<32x1xf32>
    %cst_49 = arith.constant 1.280000e+02 : f32
    %145 = vector.broadcast %cst_49 : f32 to vector<32x1xf32>
    %146 = arith.divf %144, %145 : vector<32x1xf32>
    %147 = vector.broadcast %146 : vector<32x1xf32> to vector<32x128xf32>
    %148 = arith.subf %140, %147 : vector<32x128xf32>
    %149 = arith.mulf %148, %148 : vector<32x128xf32>
    %cst_50 = arith.constant dense<0.000000e+00> : vector<32xf32>
    %150 = vector.multi_reduction <add>, %149, %cst_50 [1] : vector<32x128xf32> to vector<32xf32>
    %151 = vector.shape_cast %150 : vector<32xf32> to vector<32x1xf32>
    %cst_51 = arith.constant 1.280000e+02 : f32
    %152 = vector.broadcast %cst_51 : f32 to vector<32x1xf32>
    %153 = arith.divf %151, %152 : vector<32x1xf32>
    %cst_52 = arith.constant 9.99999974E-6 : f32
    %154 = vector.broadcast %cst_52 : f32 to vector<32x1xf32>
    %155 = arith.addf %153, %154 : vector<32x1xf32>
    %156 = math.rsqrt %155 : vector<32x1xf32>
    %157 = vector.broadcast %156 : vector<32x1xf32> to vector<32x128xf32>
    %158 = arith.mulf %148, %157 : vector<32x128xf32>
    %159 = vector.broadcast %141 : vector<1x128xf32> to vector<32x128xf32>
    %160 = arith.mulf %158, %159 : vector<32x128xf32>
    %161 = vector.broadcast %142 : vector<1x128xf32> to vector<32x128xf32>
    %162 = arith.addf %160, %161 : vector<32x128xf32>
    %163 = arith.truncf %162 : vector<32x128xf32> to vector<32x128xbf16>
    %cst_53 = arith.constant 0.000000e+00 : f32
    %164 = vector.broadcast %cst_53 : f32 to vector<32x128xf32>
    %c0_i32 = arith.constant 0 : i32
    %c4_i32 = arith.constant 4 : i32
    %165 = arith.addi %c0_i32, %c4_i32 : i32
    %c1_i32 = arith.constant 1 : i32
    %166 = scf.for %arg9 = %c0_i32 to %165 step %c1_i32 iter_args(%arg10 = %164) -> (vector<32x128xf32>)  : i32 {
      %173 = arith.index_cast %arg9 : i32 to index
      %c0_59 = arith.constant 0 : index
      %c0_60 = arith.constant 0 : index
      %174 = vector.load %arg5[%173, %c0_59, %c0_60] : memref<4x128x128xbf16, #tpu.memory_space<vmem>>, vector<1x128x128xbf16>
      %175 = vector.shape_cast %174 : vector<1x128x128xbf16> to vector<128x128xbf16>
      %cst_61 = arith.constant dense<0.000000e+00> : vector<32x128xf32>
      %176 = tpu.matmul %163, %175, %cst_61 {dimension_numbers = #tpu.dot_dimension_numbers<[1], [0], [0], [1], [0, 0, 1, 1], [], []>} : vector<32x128xbf16>, vector<128x128xbf16>, vector<32x128xf32> -> vector<32x128xf32>
      %c8_i32 = arith.constant 8 : i32
      %177 = arith.addi %c8_i32, %arg9 : i32
      %178 = arith.index_cast %177 : i32 to index
      %c0_62 = arith.constant 0 : index
      %179 = vector.load %arg2[%178, %c0_62] : memref<13x128xf32, #tpu.memory_space<vmem>>, vector<1x128xf32>
      %180 = vector.broadcast %179 : vector<1x128xf32> to vector<32x128xf32>
      %181 = arith.addf %176, %180 : vector<32x128xf32>
      %cst_63 = arith.constant 5.000000e-01 : f32
      %182 = vector.broadcast %cst_63 : f32 to vector<32x128xf32>
      %183 = arith.mulf %182, %181 : vector<32x128xf32>
      %184 = arith.mulf %181, %181 : vector<32x128xf32>
      %185 = arith.mulf %184, %181 : vector<32x128xf32>
      %cst_64 = arith.constant 4.471500e-02 : f32
      %186 = vector.broadcast %cst_64 : f32 to vector<32x128xf32>
      %187 = arith.mulf %186, %185 : vector<32x128xf32>
      %188 = arith.addf %181, %187 : vector<32x128xf32>
      %cst_65 = arith.constant 0.797884583 : f32
      %189 = vector.broadcast %cst_65 : f32 to vector<32x128xf32>
      %190 = arith.mulf %189, %188 : vector<32x128xf32>
      %191 = math.tanh %190 : vector<32x128xf32>
      %cst_66 = arith.constant 1.000000e+00 : f32
      %192 = vector.broadcast %cst_66 : f32 to vector<32x128xf32>
      %193 = arith.addf %192, %191 : vector<32x128xf32>
      %194 = arith.mulf %183, %193 : vector<32x128xf32>
      %195 = arith.truncf %194 : vector<32x128xf32> to vector<32x128xbf16>
      %196 = arith.index_cast %arg9 : i32 to index
      %c0_67 = arith.constant 0 : index
      %c0_68 = arith.constant 0 : index
      %197 = vector.load %arg6[%196, %c0_67, %c0_68] : memref<4x128x128xbf16, #tpu.memory_space<vmem>>, vector<1x128x128xbf16>
      %198 = vector.shape_cast %197 : vector<1x128x128xbf16> to vector<128x128xbf16>
      %cst_69 = arith.constant dense<0.000000e+00> : vector<32x128xf32>
      %199 = tpu.matmul %195, %198, %cst_69 {dimension_numbers = #tpu.dot_dimension_numbers<[1], [0], [0], [1], [0, 0, 1, 1], [], []>} : vector<32x128xbf16>, vector<128x128xbf16>, vector<32x128xf32> -> vector<32x128xf32>
      %200 = arith.addf %arg10, %199 : vector<32x128xf32>
      scf.yield %200 : vector<32x128xf32>
    }
    %c4_i32_54 = arith.constant 4 : i32
    %167 = arith.addf %140, %166 : vector<32x128xf32>
    %c12 = arith.constant 12 : index
    %c0_55 = arith.constant 0 : index
    %168 = vector.load %arg2[%c12, %c0_55] : memref<13x128xf32, #tpu.memory_space<vmem>>, vector<1x128xf32>
    %169 = vector.broadcast %168 : vector<1x128xf32> to vector<32x128xf32>
    %170 = arith.addf %167, %169 : vector<32x128xf32>
    %171 = vector.shape_cast %170 : vector<32x128xf32> to vector<2x16x128xf32>
    %c0_56 = arith.constant 0 : index
    %c0_57 = arith.constant 0 : index
    %c0_58 = arith.constant 0 : index
    %172 = vector.load %arg7[%c0_56, %c0_57, %c0_58] : memref<2x16x128xf32, #tpu.memory_space<vmem>>, vector<2x16x128xf32>
    tpu.vector_store %arg7[%c0_56, %c0_57, %c0_58], %171 {strides = array<i32>} : memref<2x16x128xf32, #tpu.memory_space<vmem>>, vector<2x16x128xf32>,
    return
  }
  func.func @transform_0(%arg0: i32) -> (i32, i32, i32) {
    %c0_i32 = arith.constant 0 : i32
    %c0_i32_0 = arith.constant 0 : i32
    %c0_i32_1 = arith.constant 0 : i32
    return %arg0, %c0_i32, %c0_i32_0 : i32, i32, i32
  }
  func.func @transform_1(%arg0: i32) -> (i32, i32) {
    %c0_i32 = arith.constant 0 : i32
    %c0_i32_0 = arith.constant 0 : i32
    %c0_i32_1 = arith.constant 0 : i32
    return %c0_i32, %c0_i32_0 : i32, i32
  }
  func.func @transform_2(%arg0: i32) -> (i32, i32) {
    %c0_i32 = arith.constant 0 : i32
    %c0_i32_0 = arith.constant 0 : i32
    %c0_i32_1 = arith.constant 0 : i32
    return %c0_i32, %c0_i32_0 : i32, i32
  }
  func.func @transform_3(%arg0: i32) -> (i32, i32) {
    %c0_i32 = arith.constant 0 : i32
    %c0_i32_0 = arith.constant 0 : i32
    %c0_i32_1 = arith.constant 0 : i32
    return %c0_i32, %c0_i32_0 : i32, i32
  }
  func.func @transform_4(%arg0: i32) -> (i32, i32, i32) {
    %c0_i32 = arith.constant 0 : i32
    %c0_i32_0 = arith.constant 0 : i32
    %c0_i32_1 = arith.constant 0 : i32
    %c0_i32_2 = arith.constant 0 : i32
    return %c0_i32, %c0_i32_0, %c0_i32_1 : i32, i32, i32
  }
  func.func @transform_5(%arg0: i32) -> (i32, i32, i32) {
    %c0_i32 = arith.constant 0 : i32
    %c0_i32_0 = arith.constant 0 : i32
    %c0_i32_1 = arith.constant 0 : i32
    %c0_i32_2 = arith.constant 0 : i32
    return %c0_i32, %c0_i32_0, %c0_i32_1 : i32, i32, i32
  }
  func.func @transform_6(%arg0: i32) -> (i32, i32, i32) {
    %c0_i32 = arith.constant 0 : i32
    %c0_i32_0 = arith.constant 0 : i32
    %c0_i32_1 = arith.constant 0 : i32
    return %arg0, %c0_i32, %c0_i32_0 : i32, i32, i32
  }
}

</mosaic_0001>

<bundles_post_ra>
// kernel: tpu_custom_call.1
= control target key start
LH: loop header
LB: loop body
LE: loop exit
PB: predicated region body
PF: predicated region fallthrough
CT: control target
= control target key end

     0   :  { %11 = vsyncpa [#allocation4], 0  ;;  %s3216_s0 = inlined_call_operand.hbm [shape: f32[2,16,128], index: 0, kind: input, shape index: {}]   ;;  %s3217_s1 = inlined_call_operand.hbm [shape: f32[13,128], index: 1, kind: input, shape index: {}]   ;;  %s3218_s2 = inlined_call_operand.hbm [shape: bf16[128,384], index: 2, kind: input, shape index: {}]   ;;  %s3219_s3 = inlined_call_operand.hbm [shape: bf16[128,128], index: 3, kind: input, shape index: {}]   ;;  %s3220_s4 = inlined_call_operand.hbm [shape: bf16[4,128,128], index: 4, kind: input, shape index: {}]   ;;  %s3221_s5 = inlined_call_operand.hbm [shape: bf16[4,128,128], index: 5, kind: input, shape index: {}]   ;;  %s3222_s6 = inlined_call_operand.hbm [shape: f32[2,16,128], index: 6, kind: output, shape index: {}]  }
   0x1   :  { %12 = vsyncpa [#allocation7], 0 }
   0x2   :  { %13 = vsyncpa [#allocation10], 0 }
   0x3   :  { %14 = vsyncpa [#allocation13], 0 }
   0x4   :  { %15 = vsyncpa [#allocation5], 0  ;;  %s2756_s21 = smov [#allocation6]   ;;  %s2757_s23 = smov [#allocation9]  }
   0x5   :  { %s33_s22 = sshll.u32 %s2756_s21, 4  ;;  %s57_s24 = sshll.u32 %s2757_s23, 4  ;;  %s34_s22 = int_to_ptr.vmem [resolvable:$true] %s33_s22  ;;  %s2809_s24 = int_to_ptr.vmem [resolvable:$true] %s57_s24 }
   0x6   :  { %s2552_s27 = scalar_lea.hbm %s3217_s1, 256 }
   0x7   :  { %p2553_p0 = scmp.ne.s32.totalorder %s3217_s1, %s2552_s27  ;;  %p2556_p1 = scmp.lt.u32.totalorder %s2552_s27, %s3217_s1 }
   0x9   :  { %p2558_p2 = pnand %p2556_p1, %p2553_p0 }
   0xb   :  { %2561 = shalt.err (!%p2558_p2)
}
   0xc   :  { %s2562_s8 = scalar_lea.vmem %s34_s22, 256  ;;  %p2567_p4 = scmp.lt.s32.totalorder %s34_s22, %s34_s22 }
   0xd   :  { %p2563_p3 = scmp.ne.s32.totalorder %s34_s22, %s2562_s8  ;;  %p2568_p5 = scmp.lt.s32.totalorder %s2562_s8, %s2562_s8 }
   0xf   :  { %p2569_p6 = por %p2568_p5, %p2567_p4 }
  0x11   :  { %p2570_p7 = pnand %p2569_p6, %p2563_p3 }
  0x13   :  { %2573 = shalt.err (!%p2570_p7)
}
  0x14   :  { %s2758_s9 = smov 128   ;;  %s2759_s10 = smov 8  }
  0x15   :  { %39 = dma.hbm_to_vmem [thread:$0]  %s3217_s1, 256, %s34_s22, [#allocation7], %s2758_s9, %s2758_s9, %s2759_s10  }
  0x16   :  { %s2574_s15 = scalar_lea.hbm %s3219_s3, 1024 }
  0x17   :  { %p2575_p8 = scmp.ne.s32.totalorder %s3219_s3, %s2574_s15  ;;  %p2578_p9 = scmp.lt.u32.totalorder %s2574_s15, %s3219_s3 }
  0x19   :  { %p2580_p10 = pnand %p2578_p9, %p2575_p8 }
  0x1b   :  { %2583 = shalt.err (!%p2580_p10)
}
  0x1c   :  { %s2584_s20 = scalar_lea.vmem %s2809_s24, 1024  ;;  %p2589_p12 = scmp.lt.s32.totalorder %s2809_s24, %s2809_s24 }
  0x1d   :  { %p2585_p11 = scmp.ne.s32.totalorder %s2809_s24, %s2584_s20  ;;  %p2590_p13 = scmp.lt.s32.totalorder %s2584_s20, %s2584_s20 }
  0x1f   :  { %p2591_p0 = por %p2590_p13, %p2589_p12 }
  0x21   :  { %p2592_p1 = pnand %p2591_p0, %p2585_p11 }
  0x23   :  { %2595 = shalt.err (!%p2592_p1)
}
  0x24   :  { %s2760_s1 = smov 64   ;;  %s2761_s21 = smov 4  }
  0x25   :  { %63 = dma.hbm_to_vmem [thread:$0]  %s3219_s3, 1024, %s2809_s24, [#allocation10], %s2760_s1, %s2760_s1, %s2761_s21  }
  0x26   :  { %s2762_s25 = smov [#allocation3]   ;;  %s2763_s27 = smov [#allocation8]  }
  0x27   :  { %s21_s26 = sshll.u32 %s2762_s25, 4  ;;  %s45_s28 = sshll.u32 %s2763_s27, 4  ;;  %s22_s26 = int_to_ptr.vmem [resolvable:$true] %s21_s26  ;;  %s2846_s28 = int_to_ptr.vmem [resolvable:$true] %s45_s28 }
  0x28   :  { %s2596_s7 = scalar_lea.hbm %s3216_s0, 512 }
  0x29   :  { %p2597_p2 = scmp.ne.s32.totalorder %s3216_s0, %s2596_s7  ;;  %p2600_p3 = scmp.lt.u32.totalorder %s2596_s7, %s3216_s0 }
  0x2b   :  { %p2602_p4 = pnand %p2600_p3, %p2597_p2 }
  0x2d   :  { %2605 = shalt.err (!%p2602_p4)
}
  0x2e   :  { %s2606_s3 = scalar_lea.vmem %s22_s26, 512  ;;  %p2611_p6 = scmp.lt.s32.totalorder %s22_s26, %s22_s26 }
  0x2f   :  { %p2607_p5 = scmp.ne.s32.totalorder %s22_s26, %s2606_s3  ;;  %p2612_p7 = scmp.lt.s32.totalorder %s2606_s3, %s2606_s3 }
  0x31   :  { %p2613_p8 = por %p2612_p7, %p2611_p6 }
  0x33   :  { %p2614_p9 = pnand %p2613_p8, %p2607_p5 }
  0x35   :  { %2617 = shalt.err (!%p2614_p9)
}
  0x36   :  { %27 = dma.hbm_to_vmem [thread:$0]  %s3216_s0, 512, %s22_s26, [#allocation4], %s2758_s9, %s2758_s9, %s2759_s10  }
  0x37   :  { %s2618_s17 = scalar_lea.hbm %s3218_s2, 3072 }
  0x38   :  { %p2619_p10 = scmp.ne.s32.totalorder %s3218_s2, %s2618_s17  ;;  %p2622_p11 = scmp.lt.u32.totalorder %s2618_s17, %s3218_s2 }
  0x3a   :  { %p2624_p12 = pnand %p2622_p11, %p2619_p10 }
  0x3c   :  { %2627 = shalt.err (!%p2624_p12)
}
  0x3d   :  { %s2628_s23 = scalar_lea.vmem %s2846_s28, 3072  ;;  %p2633_p0 = scmp.lt.s32.totalorder %s2846_s28, %s2846_s28 }
  0x3e   :  { %p2629_p13 = scmp.ne.s32.totalorder %s2846_s28, %s2628_s23  ;;  %p2634_p1 = scmp.lt.s32.totalorder %s2628_s23, %s2628_s23 }
  0x40   :  { %p2635_p2 = por %p2634_p1, %p2633_p0 }
  0x42   :  { %p2636_p3 = pnand %p2635_p2, %p2629_p13 }
  0x44   :  { %2639 = shalt.err (!%p2636_p3)
}
  0x45   :  { %s2764_s0 = smov 192   ;;  %s2765_s25 = smov 12  }
  0x46   :  { %51 = dma.hbm_to_vmem [thread:$0]  %s3218_s2, 3072, %s2846_s28, [#allocation7], %s2764_s0, %s2764_s0, %s2765_s25  }
  0x47   :  { %s2766_s29 = smov [#allocation11]   ;;  %s2767_s7 = smov [#allocation12]  }
  0x48   :  { %s69_s30 = sshll.u32 %s2766_s29, 4  ;;  %s81_s8 = sshll.u32 %s2767_s7, 4  ;;  %s70_s30 = int_to_ptr.vmem [resolvable:$true] %s69_s30  ;;  %s2880_s8 = int_to_ptr.vmem [resolvable:$true] %s81_s8 }
  0x49   :  { %s2640_s13 = scalar_lea.hbm %s3220_s4, 4096 }
  0x4a   :  { %p2641_p4 = scmp.ne.s32.totalorder %s3220_s4, %s2640_s13  ;;  %p2644_p5 = scmp.lt.u32.totalorder %s2640_s13, %s3220_s4 }
  0x4c   :  { %p2646_p6 = pnand %p2644_p5, %p2641_p4 }
  0x4e   :  { %2649 = shalt.err (!%p2646_p6)
}
  0x4f   :  { %s2650_s2 = scalar_lea.vmem %s70_s30, 4096  ;;  %p2655_p8 = scmp.lt.s32.totalorder %s70_s30, %s70_s30 }
  0x50   :  { %p2651_p7 = scmp.ne.s32.totalorder %s70_s30, %s2650_s2  ;;  %p2656_p9 = scmp.lt.s32.totalorder %s2650_s2, %s2650_s2 }
  0x52   :  { %p2657_p10 = por %p2656_p9, %p2655_p8 }
  0x54   :  { %p2658_p11 = pnand %p2657_p10, %p2651_p7 }
  0x56   :  { %2661 = shalt.err (!%p2658_p11)
}
  0x57   :  { %75 = dma.hbm_to_vmem [thread:$0]  %s3220_s4, 4096, %s70_s30, [#allocation10], %s2760_s1, %s2760_s1, %s2761_s21  }
  0x58   :  { %s2662_s19 = scalar_lea.hbm %s3221_s5, 4096 }
  0x59   :  { %p2663_p12 = scmp.ne.s32.totalorder %s3221_s5, %s2662_s19  ;;  %p2666_p13 = scmp.lt.u32.totalorder %s2662_s19, %s3221_s5 }
  0x5b   :  { %p2668_p0 = pnand %p2666_p13, %p2663_p12 }
  0x5d   :  { %2671 = shalt.err (!%p2668_p0)
}
  0x5e   :  { %s2672_s25 = scalar_lea.vmem %s2880_s8, 4096  ;;  %p2677_p2 = scmp.lt.s32.totalorder %s2880_s8, %s2880_s8 }
  0x5f   :  { %p2673_p1 = scmp.ne.s32.totalorder %s2880_s8, %s2672_s25  ;;  %p2678_p3 = scmp.lt.s32.totalorder %s2672_s25, %s2672_s25 }
  0x61   :  { %p2679_p4 = por %p2678_p3, %p2677_p2 }
  0x63   :  { %p2680_p5 = pnand %p2679_p4, %p2673_p1 }
  0x65   :  { %2683 = shalt.err (!%p2680_p5)
}
  0x66   :  { %87 = dma.hbm_to_vmem [thread:$0]  %s3221_s5, 4096, %s2880_s8, [#allocation13], %s2760_s1, %s2760_s1, %s2761_s21  }
  0x67   :  { %2726 = dma.done.wait [#allocation4], 512  }
  0x68   :  { %2727 = vsyncadd [#allocation4], 4294966784 }
  0x69   :  { %2728 = dma.done.wait [#allocation7], 3328  }
  0x6a   :  { %2729 = vsyncadd [#allocation7], 4294963968 }
  0x6b   :  { %2730 = dma.done.wait [#allocation10], 5120  }
  0x6c   :  { %2731 = vsyncadd [#allocation10], 4294962176 }
  0x6d   :  { %2732 = dma.done.wait [#allocation13], 4096  }
  0x6e   :  { %2733 = vsyncadd [#allocation13], 4294963200  ;;  %v107_v0 = vld [vmem:[#allocation3] sm:$0xff]  ;;  %v109_v1 = vld [vmem:[#allocation3 + $0x10] sm:$0xff]  ;;  %v2768_v39 = vmov 0   ;;  %vm2770_vm0 = vmmov 0  }
  0x6f   :  { %v108_v2 = vld [vmem:[#allocation3 + $0x8] sm:$0xff]  ;;  %113 = vadd.xlane.f32.xlu0 %v107_v0  ;;  %117 = vadd.xlane.f32.xlu1 %v109_v1  ;;  %v110_v3 = vld [vmem:[#allocation3 + $0x18] sm:$0xff]  ;;  %v2404_v4 = vld [vmem:[#allocation8 + $0x4] ss:$12 sps:$4 sm:$0xff]   ;;  %vm475_vm1 = vcmask 261120   ;;  %vm570_vm2 = vcmask 130048  }
  0x70   :  { %v2406_v5 = vld [vmem:[#allocation8] ss:$12 sps:$4 sm:$0xff]   ;;  %v2407_v6 = vld [vmem:[#allocation8 + $0x1c] ss:$12 sps:$4 sm:$0xff]   ;;  %336 = vmatprep.subr.bf16.mxu0 %v2404_v4  ;;  %v2410_v24 = vld [vmem:[#allocation8 + $0x18] ss:$12 sps:$4 sm:$0xff]   ;;  %368 = vmatprep.mubr.bf16.mxu0 %v2768_v39 }
  0x71   :  { %v2409_v7 = vld [vmem:[#allocation8 + $0x8] ss:$12 sps:$4 sm:$0xff]   ;;  %337 = vmatpush1.bf16.msra.mxu0 %v2406_v5  ;;  %v2413_v26 = vld [vmem:[#allocation8 + $0x20] ss:$12 sps:$4 sm:$0xff]   ;;  %v2414_v27 = vld [vmem:[#allocation8 + $0x30] ss:$12 sps:$4 sm:$0xff]  }
  0x72   :  { %2170 = vmatprep.subr.bf16.mxu1 %v2409_v7  ;;  %338 = vmatprep.subr.bf16.mxu0 %v2407_v6  ;;  %v2411_v25 = vld [vmem:[#allocation8 + $0x34] ss:$12 sps:$4 sm:$0xff]   ;;  %v2415_v28 = vld [vmem:[#allocation8 + $0x4c] ss:$12 sps:$4 sm:$0xff]   ;;  %v2419_v31 = vld [vmem:[#allocation8 + $0x64] ss:$12 sps:$4 sm:$0xff]  }
  0x73   :  { %115 = vadd.xlane.f32.xlu0 %v108_v2  ;;  %119 = vadd.xlane.f32.xlu1 %v110_v3  ;;  %v2417_v29 = vld [vmem:[#allocation8 + $0x38] ss:$12 sps:$4 sm:$0xff]   ;;  %v2418_v30 = vld [vmem:[#allocation8 + $0x48] ss:$12 sps:$4 sm:$0xff]   ;;  %v2421_v32 = vld [vmem:[#allocation8 + $0x50] ss:$12 sps:$4 sm:$0xff]  }
  0x74   :  { %2171 = vmatpush3.bf16.msra.mxu1 %v2409_v7  ;;  %v2422_v33 = vld [vmem:[#allocation8 + $0x60] ss:$12 sps:$4 sm:$0xff]   ;;  %v2423_v34 = vld [vmem:[#allocation8 + $0x7c] ss:$12 sps:$4 sm:$0xff]   ;;  %v2426_v36 = vld [vmem:[#allocation8 + $0x78] ss:$12 sps:$4 sm:$0xff]  }
  0x75   :  { %339 = vmatpush1.bf16.msra.mxu0 %v2410_v24  ;;  %2172 = vmatprep.subr.bf16.mxu1 %v2413_v26  ;;  %v2425_v35 = vld [vmem:[#allocation8 + $0x68] ss:$12 sps:$4 sm:$0xff]   ;;  %v2429_v38 = vld [vmem:[#allocation8 + $0x80] ss:$12 sps:$4 sm:$0xff]   ;;  %v2430_v40 = vld [vmem:[#allocation8 + $0x90] ss:$12 sps:$4 sm:$0xff]  }
  0x76   :  { %340 = vmatprep.subr.bf16.mxu0 %v2411_v25  ;;  %v2427_v37 = vld [vmem:[#allocation8 + $0x94] ss:$12 sps:$4 sm:$0xff]   ;;  %v2431_v41 = vld [vmem:[#allocation8 + $0xac] ss:$12 sps:$4 sm:$0xff]   ;;  %v2435_v44 = vld [vmem:[#allocation8 + $0xb0] ss:$12 sps:$4 sm:$0xff]  }
  0x77   :  { %v2433_v42 = vld [vmem:[#allocation8 + $0x98] ss:$12 sps:$4 sm:$0xff]   ;;  %v2434_v43 = vld [vmem:[#allocation8 + $0xa8] ss:$12 sps:$4 sm:$0xff]   ;;  %v2018_v59 = vld [vmem:[#allocation6] ss:$0 sm:$0xff] }
  0x78   :  { %2173 = vmatpush3.bf16.msra.mxu1 %v2413_v26  ;;  %v2046_v25 = vld [vmem:[#allocation6 + $0x4] ss:$0 sm:$0xff]  ;;  %s2771_s5 = smov 96   ;;  %s2772_s21 = smov 32   ;;  %vm967_vm3 = vcmask 523520   ;;  %vm1222_vm4 = vcmask 785920  }
  0x79   :  { %341 = vmatpush1.bf16.msra.mxu0 %v2414_v27  ;;  %2174 = vmatprep.subr.bf16.mxu1 %v2417_v29  ;;  %vm1477_vm5 = vcmask 1048320  }
  0x7a   :  { %342 = vmatprep.subr.bf16.mxu0 %v2415_v28 }
  0x7c   :  { %2175 = vmatpush3.bf16.msra.mxu1 %v2417_v29 }
  0x7d   :  { %343 = vmatpush1.bf16.msra.mxu0 %v2418_v30  ;;  %2176 = vmatprep.subr.bf16.mxu1 %v2421_v32 }
  0x7e   :  { %344 = vmatprep.subr.bf16.mxu0 %v2419_v31 }
  0x80   :  { %2177 = vmatpush3.bf16.msra.mxu1 %v2421_v32 }
  0x81   :  { %345 = vmatpush1.bf16.msra.mxu0 %v2422_v33  ;;  %2178 = vmatprep.subr.bf16.mxu1 %v2425_v35 }
  0x82   :  { %346 = vmatprep.subr.bf16.mxu0 %v2423_v34 }
  0x84   :  { %2179 = vmatpush3.bf16.msra.mxu1 %v2425_v35 }
  0x85   :  { %347 = vmatpush1.bf16.msra.mxu0 %v2426_v36  ;;  %2180 = vmatprep.subr.bf16.mxu1 %v2429_v38 }
  0x86   :  { %348 = vmatprep.subr.bf16.mxu0 %v2427_v37 }
  0x88   :  { %2181 = vmatpush3.bf16.msra.mxu1 %v2429_v38 }
  0x89   :  { %349 = vmatpush1.bf16.msra.mxu0 %v2430_v40  ;;  %2182 = vmatprep.subr.bf16.mxu1 %v2433_v42 }
  0x8a   :  { %350 = vmatprep.subr.bf16.mxu0 %v2431_v41 }
  0x8c   :  { %2183 = vmatpush3.bf16.msra.mxu1 %v2433_v42 }
  0x8d   :  { %351 = vmatpush1.bf16.msra.mxu0 %v2434_v43  ;;  %2184 = vmatprep.subr.bf16.mxu1 %v2435_v44 }
  0x90   :  { %2185 = vmatpush3.bf16.msra.mxu1 %v2435_v44 }
  0xfc   :  { %v114_v8 = vpop.xlane.xlu0 %113  ;;  %v118_v9 = vpop.xlane.xlu1 %117 }
  0xfd   :  { %v122_v10 = vmul.f32 0.0078125, %v114_v8  ;;  %v124_v11 = vmul.f32 0.0078125, %v118_v9 }
  0xff   :  { %v2917_v12 = vsub.f32 %v107_v0, %v122_v10  ;;  %v2919_v13 = vsub.f32 %v109_v1, %v124_v11  ;;  %v2019_v0 = vld [vmem:[#allocation6 + $0x1] ss:$0 sm:$0xff] }
 0x100   :  { %v116_v14 = vpop.xlane.xlu0 %115  ;;  %v120_v15 = vpop.xlane.xlu1 %119 }
 0x101   :  { %v123_v16 = vmul.f32 0.0078125, %v116_v14  ;;  %v130_v17 = vmul.f32 %v2917_v12, %v2917_v12  ;;  %v125_v18 = vmul.f32 0.0078125, %v120_v15  ;;  %v132_v21 = vmul.f32 %v2919_v13, %v2919_v13 }
 0x102   :  { %v2769_v14 = vmov 0.0  }
 0x103   :  { %v2923_v19 = vsub.f32 %v108_v2, %v123_v16  ;;  %134 = vadd.xlane.f32.xlu0 %v130_v17  ;;  %v2925_v20 = vsub.f32 %v110_v3, %v125_v18  ;;  %2190 = vmatprep.subr.bf16.mxu0 %v2769_v14  ;;  %v2045_v18 = vld [vmem:[#allocation6 + $0x3] ss:$0 sm:$0xff] }
 0x104   :  { %2202 = vmatprep.subr.bf16.mxu1 %v2769_v14 }
 0x105   :  { %v131_v22 = vmul.f32 %v2923_v19, %v2923_v19  ;;  %v133_v23 = vmul.f32 %v2925_v20, %v2925_v20 }
 0x107   :  { %138 = vadd.xlane.f32.xlu0 %v132_v21  ;;  %136 = vadd.xlane.f32.xlu1 %v131_v22 }
 0x10b   :  { %140 = vadd.xlane.f32.xlu1 %v133_v23 }
 0x190   :  { %v135_v45 = vpop.xlane.xlu0 %134 }
 0x191   :  { %v142_v46 = vmul.f32 0.0078125, %v135_v45 }
 0x193   :  { %v146_v47 = vadd.f32 1e-05, %v142_v46 }
 0x194   :  { %v137_v48 = vpop.xlane.xlu1 %136  ;;  %v139_v49 = vpop.xlane.xlu0 %138 }
 0x195   :  { %2444 = vrsqrt.f32 %v146_v47  ;;  %v143_v50 = vmul.f32 0.0078125, %v137_v48  ;;  %v144_v51 = vmul.f32 0.0078125, %v139_v49 }
 0x197   :  { %v147_v52 = vadd.f32 1e-05, %v143_v50  ;;  %v148_v53 = vadd.f32 1e-05, %v144_v51 }
 0x198   :  { %v141_v54 = vpop.xlane.xlu1 %140 }
 0x199   :  { %2446 = vrsqrt.f32 %v147_v52  ;;  %v145_v55 = vmul.f32 0.0078125, %v141_v54 }
 0x19a   :  { %2448 = vrsqrt.f32 %v148_v53 }
 0x19b   :  { %v149_v56 = vadd.f32 1e-05, %v145_v55 }
 0x19d   :  { %2450 = vrsqrt.f32 %v149_v56 }
 0x19f   :  { %v2445_v57 = vpop.eup %2444 }
 0x1a0   :  { %v154_v58 = vmul.f32 %v2445_v57, %v2917_v12 }
 0x1a2   :  { %v162_v63 = vmul.f32 %v2018_v59, %v154_v58 }
 0x1a3   :  { %v2447_v60 = vpop.eup %2446 }
 0x1a4   :  { %v2449_v61 = vpop.eup %2448  ;;  %v155_v62 = vmul.f32 %v2447_v60, %v2923_v19  ;;  %v170_v4 = vadd.f32 %v2019_v0, %v162_v63 }
 0x1a5   :  { %v156_v1 = vmul.f32 %v2449_v61, %v2919_v13  ;;  %v2044_v13 = vld [vmem:[#allocation6 + $0x2] ss:$0 sm:$0xff] }
 0x1a6   :  { %v163_v2 = vmul.f32 %v2018_v59, %v155_v62 }
 0x1a7   :  { %v2451_v3 = vpop.eup %2450  ;;  %v164_v7 = vmul.f32 %v2018_v59, %v156_v1 }
 0x1a8   :  { %v171_v5 = vadd.f32 %v2019_v0, %v163_v2  ;;  %v157_v6 = vmul.f32 %v2451_v3, %v2925_v20 }
 0x1a9   :  { %v172_v10 = vadd.f32 %v2019_v0, %v164_v7 }
 0x1aa   :  { %v174_v8 = vpack.c.bf16 %v171_v5, %v170_v4  ;;  %v165_v9 = vmul.f32 %v2018_v59, %v157_v6 }
 0x1ac   :  { %369 = vmatmul.mubr.bf16.vlgmr.msra.gmra.mrb[0].mxu0 %v174_v8  ;;  %2186 = vmatprep.mubr.bf16.mxu1 %v174_v8  ;;  %v173_v11 = vadd.f32 %v2019_v0, %v165_v9 }
 0x1ad   :  { %378 = vmatprep.mubr.bf16.mxu0 %v2768_v39 }
 0x1ae   :  { %v175_v12 = vpack.c.bf16 %v173_v11, %v172_v10 }
 0x1b0   :  { %2187 = vmatmul.mubr.bf16.vlgmr.msra.gmra.mrb[0].mxu1 %v175_v12 }
 0x1b1   :  { %2204 = vmatprep.mubr.msk.bf16.mxu1 %vm2770_vm0, %v2769_v14 }
 0x1b4   :  { %379 = vmatmul.mubr.bf16.gmra.mrb[4].mxu0 %v175_v12 }
 0x1b5   :  { %2192 = vmatprep.mubr.msk.bf16.mxu0 %vm2770_vm0, %v2769_v14 }
 0x27f   :  { %v370_v15 = vpop.f32.mrb[0].mxu0 }
 0x280   :  { %v443_v16 = vadd.f32 %v2044_v13, %v370_v15  ;;  %v372_v17 = vpop.f32.mrb[1].mxu0 }
 0x281   :  { %v374_v19 = vpop.f32.mrb[2].mxu0  ;;  %v452_v22 = vadd.f32 %v2045_v18, %v372_v17 }
 0x282   :  { %v444_v20 = vadd.f32 %v2044_v13, %v374_v19  ;;  %v376_v21 = vpop.f32.mrb[3].mxu0  ;;  %v465_v26 = vmul.f32 0.17677669, %v443_v16 }
 0x283   :  { %v453_v23 = vadd.f32 %v2045_v18, %v376_v21  ;;  %v2188_v24 = vpop.f32.mrb[0].mxu1 }
 0x284   :  { %v466_v27 = vmul.f32 0.17677669, %v444_v20  ;;  %v423_v28 = vpop.f32.mrb[1].mxu1  ;;  %v463_v32 = vadd.f32 %v2188_v24, %v2046_v25 }
 0x285   :  { %v2943_v29 = vpack.c.bf16 %v453_v23, %v452_v22  ;;  %v2189_v30 = vpop.f32.mrb[2].mxu1  ;;  %v461_v35 = vadd.f32 %v2046_v25, %v423_v28 }
 0x286   :  { %v2945_v31 = vpack.c.bf16 %v466_v27, %v465_v26  ;;  %v464_v33 = vadd.f32 %v2189_v30, %v2046_v25  ;;  %v426_v34 = vpop.f32.mrb[3].mxu1 }
 0x287   :  { %v462_v36 = vadd.f32 %v2046_v25, %v426_v34  ;;  %v380_v37 = vpop.f32.mrb[4].mxu0  ;;  %v480_v38 = vsel %vm475_vm1, %v2943_v29, 0 }
 0x288   :  { %v2949_v39 = vpack.c.bf16 %v464_v33, %v463_v32  ;;  %v445_v40 = vadd.f32 %v2044_v13, %v380_v37  ;;  %v382_v41 = vpop.f32.mrb[5].mxu0  ;;  %2191 = vmatpush3.bf16.xpose.msra.mxu0 %v480_v38 }
 0x289   :  { %v2951_v42 = vpack.c.bf16 %v462_v36, %v461_v35  ;;  %v384_v43 = vpop.f32.mrb[6].mxu0  ;;  %2196 = vmatprep.subr.bf16.mxu0 %v2769_v14  ;;  %v454_v46 = vadd.f32 %v2045_v18, %v382_v41 }
 0x28a   :  { %v446_v44 = vadd.f32 %v2044_v13, %v384_v43  ;;  %v386_v45 = vpop.f32.mrb[7].mxu0  ;;  %v467_v48 = vmul.f32 0.17677669, %v445_v40 }
 0x28b   :  { %v455_v47 = vadd.f32 %v2045_v18, %v386_v45  ;;  %2203 = vmatpush3.bf16.msra.mxu1 %v2951_v42 }
 0x28c   :  { %v468_v49 = vmul.f32 0.17677669, %v446_v44  ;;  %2214 = vmatprep.subr.bf16.mxu1 %v2769_v14 }
 0x28d   :  { %v2956_v50 = vpack.c.bf16 %v455_v47, %v454_v46 }
 0x28e   :  { %v2958_v51 = vpack.c.bf16 %v468_v49, %v467_v48 }
 0x28f   :  { %2193 = vmatmul.mubr.msk.bf16.vlgmr.msra.gmra.mrb[8].mxu0 %vm475_vm1, %v2945_v31  ;;  %v527_v52 = vsel %vm475_vm1, %v2956_v50, 0 }
 0x290   :  { %2197 = vmatpush3.bf16.xpose.msra.mxu0 %v527_v52  ;;  %2198 = vmatprep.mubr.msk.bf16.mxu0 %vm2770_vm0, %v2769_v14 }
 0x291   :  { %2208 = vmatprep.subr.bf16.mxu0 %v2769_v14 }
 0x297   :  { %2199 = vmatmul.mubr.msk.bf16.vlgmr.msra.gmra.mrb[12].mxu0 %vm475_vm1, %v2958_v51 }
 0x298   :  { %2209 = vmatpush3.bf16.msra.mxu0 %v2949_v39  ;;  %2210 = vmatprep.mubr.msk.bf16.mxu0 %vm2770_vm0, %v2769_v14 }
 0x299   :  { %2220 = vmatprep.subr.bf16.mxu0 %v2769_v14 }
 0x362   :  { %v516_v53 = vpop.f32.mrb[8].mxu0 }
 0x363   :  { %v2194_v54 = vpop.f32.mrb[9].mxu0  ;;  %v571_v55 = vsel %vm570_vm2, %v516_v53, -inf }
 0x364   :  { %572 = vmax.xlane.f32.xlu0 %v571_v55  ;;  %v519_v56 = vpop.f32.mrb[10].mxu0 }
 0x365   :  { %v2195_v57 = vpop.f32.mrb[11].mxu0  ;;  %v574_v58 = vsel %vm570_vm2, %v519_v56, -inf }
 0x366   :  { %575 = vmax.xlane.f32.xlu1 %v574_v58 }
 0x36a   :  { %v563_v59 = vpop.f32.mrb[12].mxu0 }
 0x36b   :  { %v2200_v60 = vpop.f32.mrb[13].mxu0  ;;  %v577_v61 = vsel %vm570_vm2, %v563_v59, -inf }
 0x36c   :  { %578 = vmax.xlane.f32.xlu0 %v577_v61  ;;  %v566_v62 = vpop.f32.mrb[14].mxu0 }
 0x36d   :  { %v2201_v63 = vpop.f32.mrb[15].mxu0  ;;  %v580_v0 = vsel %vm570_vm2, %v566_v62, -inf }
 0x36e   :  { %581 = vmax.xlane.f32.xlu1 %v580_v0 }
 0x3f1   :  { %v573_v1 = vpop.xlane.xlu0 %572 }
 0x3f2   :  { %v583_v2 = vsub.f32 %v516_v53, %v573_v1 }
 0x3f3   :  { %v576_v3 = vpop.xlane.xlu1 %575 }
 0x3f4   :  { %v587_v4 = vmul.f32 1.442695, %v583_v2  ;;  %v584_v5 = vsub.f32 %v519_v56, %v576_v3 }
 0x3f6   :  { %2452 = vpow2.f32 %v587_v4  ;;  %v589_v6 = vmul.f32 1.442695, %v584_v5 }
 0x3f8   :  { %2454 = vpow2.f32 %v589_v6 }
 0x3f9   :  { %v579_v7 = vpop.xlane.xlu0 %578 }
 0x3fa   :  { %v585_v8 = vsub.f32 %v563_v59, %v579_v7 }
 0x3fb   :  { %v582_v17 = vpop.xlane.xlu1 %581 }
 0x3fc   :  { %v591_v9 = vmul.f32 1.442695, %v585_v8  ;;  %v586_v18 = vsub.f32 %v566_v62, %v582_v17 }
 0x3fe   :  { %2456 = vpow2.f32 %v591_v9  ;;  %v593_v19 = vmul.f32 1.442695, %v586_v18 }
 0x400   :  { %v2453_v10 = vpop.eup %2452  ;;  %2458 = vpow2.f32 %v593_v19 }
 0x401   :  { %v595_v11 = vsel %vm570_vm2, %v2453_v10, 0.0 }
 0x402   :  { %v2455_v12 = vpop.eup %2454  ;;  %596 = vadd.xlane.f32.xlu0 %v595_v11 }
 0x403   :  { %v598_v13 = vsel %vm570_vm2, %v2455_v12, 0.0 }
 0x404   :  { %599 = vadd.xlane.f32.xlu1 %v598_v13 }
 0x408   :  { %v2457_v15 = vpop.eup %2456 }
 0x409   :  { %v601_v16 = vsel %vm570_vm2, %v2457_v15, 0.0 }
 0x40a   :  { %602 = vadd.xlane.f32.xlu0 %v601_v16  ;;  %v2459_v20 = vpop.eup %2458 }
 0x40b   :  { %v604_v21 = vsel %vm570_vm2, %v2459_v20, 0.0 }
 0x415   :  { %766 = vrot.lane.b32.xlu1 %v2956_v50, %s2771_s5 }
 0x420   :  { %713 = vrot.lane.b32.xlu0 %v2943_v29, %s2771_s5 }
 0x439   :  { %605 = vadd.xlane.f32.xlu1 %v604_v21 }
 0x44a   :  { %710 = vrot.lane.b32.xlu1 %v2945_v31, %s2771_s5 }
 0x44e   :  { %763 = vrot.lane.b32.xlu1 %v2958_v51, %s2771_s5 }
 0x48f   :  { %v597_v22 = vpop.xlane.xlu0 %596 }
 0x490   :  { %2460 = vrcp.f32 %v597_v22 }
 0x491   :  { %v600_v23 = vpop.xlane.xlu1 %599 }
 0x492   :  { %2462 = vrcp.f32 %v600_v23 }
 0x495   :  { %v767_v34 = vpop.permute.xlu1 %766 }
 0x496   :  { %v772_v44 = vsel %vm475_vm1, %v767_v34, 0 }
 0x497   :  { %v603_v24 = vpop.xlane.xlu0 %602 }
 0x498   :  { %2464 = vrcp.f32 %v603_v24 }
 0x49a   :  { %v2461_v25 = vpop.eup %2460 }
 0x49b   :  { %v608_v27 = vmul.f32 %v2461_v25, %v2453_v10  ;;  %v714_v30 = vpop.permute.xlu0 %713 }
 0x49c   :  { %v2463_v26 = vpop.eup %2462  ;;  %v719_v33 = vsel %vm475_vm1, %v714_v30, 0 }
 0x49d   :  { %v610_v28 = vmul.f32 %v2463_v26, %v2455_v12 }
 0x49f   :  { %v615_v32 = vpack.c.bf16 %v610_v28, %v608_v27 }
 0x4a1   :  { %2205 = vmatmul.mubr.msk.bf16.vlgmr.msra.gmra.mrb[4].mxu1 %vm570_vm2, %v615_v32 }
 0x4a2   :  { %2215 = vmatpush3.bf16.xpose.msra.mxu1 %v719_v33  ;;  %2216 = vmatprep.mubr.msk.bf16.mxu1 %vm2770_vm0, %v2769_v14  ;;  %v2465_v37 = vpop.eup %2464 }
 0x4a3   :  { %2226 = vmatprep.subr.bf16.mxu1 %v2769_v14  ;;  %v612_v40 = vmul.f32 %v2465_v37, %v2457_v15 }
 0x4c6   :  { %v606_v35 = vpop.xlane.xlu1 %605 }
 0x4c7   :  { %2466 = vrcp.f32 %v606_v35 }
 0x4ca   :  { %v711_v36 = vpop.permute.xlu1 %710 }
 0x4cb   :  { %2217 = vmatmul.mubr.msk.bf16.vlgmr.msra.gmra.mrb[8].mxu1 %vm475_vm1, %v711_v36 }
 0x4cc   :  { %2228 = vmatprep.mubr.msk.bf16.mxu1 %vm2770_vm0, %v2769_v14 }
 0x4ce   :  { %v764_v45 = vpop.permute.xlu1 %763 }
 0x4d1   :  { %v2467_v38 = vpop.eup %2466 }
 0x4d2   :  { %v614_v41 = vmul.f32 %v2467_v38, %v2459_v20 }
 0x4d4   :  { %v616_v43 = vpack.c.bf16 %v614_v41, %v612_v40 }
 0x4d6   :  { %2211 = vmatmul.mubr.msk.bf16.vlgmr.msra.gmra.mrb[16].mxu0 %vm570_vm2, %v616_v43 }
 0x4d7   :  { %2221 = vmatpush3.bf16.xpose.msra.mxu0 %v772_v44  ;;  %2222 = vmatprep.mubr.msk.bf16.mxu0 %vm2770_vm0, %v2769_v14 }
 0x4d8   :  { %2232 = vmatprep.subr.bf16.mxu0 %v2769_v14 }
 0x4de   :  { %2223 = vmatmul.mubr.msk.bf16.vlgmr.msra.gmra.mrb[20].mxu0 %vm475_vm1, %v764_v45 }
 0x4df   :  { %2234 = vmatprep.mubr.msk.bf16.mxu0 %vm2770_vm0, %v2769_v14 }
 0x574   :  { %v654_v46 = vpop.f32.mrb[4].mxu1 }
 0x575   :  { %v2206_v47 = vpop.f32.mrb[5].mxu1 }
 0x576   :  { %v657_v48 = vpop.f32.mrb[6].mxu1 }
 0x577   :  { %v705_v49 = vpack.c.bf16 %v657_v48, %v654_v46  ;;  %v2207_v52 = vpop.f32.mrb[7].mxu1 }
 0x579   :  { %707 = vst.msk [vmem:[#allocation2] sm:$0xff] %vm475_vm1, %v705_v49 }
 0x59e   :  { %v755_v53 = vpop.f32.mrb[8].mxu1 }
 0x59f   :  { %v2218_v54 = vpop.f32.mrb[9].mxu1  ;;  %v815_v55 = vsel %vm570_vm2, %v755_v53, -inf }
 0x5a0   :  { %816 = vmax.xlane.f32.xlu0 %v815_v55  ;;  %v758_v56 = vpop.f32.mrb[10].mxu1 }
 0x5a1   :  { %v2219_v57 = vpop.f32.mrb[11].mxu1  ;;  %v818_v58 = vsel %vm570_vm2, %v758_v56, -inf }
 0x5a2   :  { %819 = vmax.xlane.f32.xlu1 %v818_v58 }
 0x5a9   :  { %v698_v59 = vpop.f32.mrb[16].mxu0 }
 0x5aa   :  { %v2212_v60 = vpop.f32.mrb[17].mxu0 }
 0x5ab   :  { %v701_v61 = vpop.f32.mrb[18].mxu0 }
 0x5ac   :  { %v706_v62 = vpack.c.bf16 %v701_v61, %v698_v59  ;;  %v2213_v63 = vpop.f32.mrb[19].mxu0 }
 0x5ae   :  { %708 = vst.msk [vmem:[#allocation2 + $0x8] sm:$0xff] %vm475_vm1, %v706_v62 }
 0x5b1   :  { %v808_v0 = vpop.f32.mrb[20].mxu0 }
 0x5b2   :  { %v2224_v1 = vpop.f32.mrb[21].mxu0  ;;  %v821_v2 = vsel %vm570_vm2, %v808_v0, -inf }
 0x5b3   :  { %822 = vmax.xlane.f32.xlu0 %v821_v2  ;;  %v811_v3 = vpop.f32.mrb[22].mxu0 }
 0x5b4   :  { %v2225_v4 = vpop.f32.mrb[23].mxu0  ;;  %v824_v5 = vsel %vm570_vm2, %v811_v3, -inf }
 0x5b7   :  { %825 = vmax.xlane.f32.xlu0 %v824_v5 }
 0x62d   :  { %v817_v6 = vpop.xlane.xlu0 %816 }
 0x62e   :  { %v827_v7 = vsub.f32 %v755_v53, %v817_v6 }
 0x62f   :  { %v820_v8 = vpop.xlane.xlu1 %819 }
 0x630   :  { %v831_v9 = vmul.f32 1.442695, %v827_v7  ;;  %v828_v10 = vsub.f32 %v758_v56, %v820_v8 }
 0x632   :  { %2468 = vpow2.f32 %v831_v9  ;;  %v833_v11 = vmul.f32 1.442695, %v828_v10 }
 0x634   :  { %2470 = vpow2.f32 %v833_v11 }
 0x63c   :  { %v2469_v12 = vpop.eup %2468 }
 0x63d   :  { %v839_v13 = vsel %vm570_vm2, %v2469_v12, 0.0 }
 0x63e   :  { %v2471_v15 = vpop.eup %2470  ;;  %840 = vadd.xlane.f32.xlu0 %v839_v13 }
 0x63f   :  { %v842_v16 = vsel %vm570_vm2, %v2471_v15, 0.0 }
 0x640   :  { %843 = vadd.xlane.f32.xlu1 %v842_v16  ;;  %v823_v17 = vpop.xlane.xlu0 %822 }
 0x641   :  { %v829_v18 = vsub.f32 %v808_v0, %v823_v17 }
 0x643   :  { %v835_v19 = vmul.f32 1.442695, %v829_v18 }
 0x644   :  { %v826_v22 = vpop.xlane.xlu0 %825 }
 0x645   :  { %2472 = vpow2.f32 %v835_v19  ;;  %v830_v23 = vsub.f32 %v811_v3, %v826_v22 }
 0x647   :  { %v837_v24 = vmul.f32 1.442695, %v830_v23 }
 0x649   :  { %2474 = vpow2.f32 %v837_v24 }
 0x64f   :  { %v2473_v20 = vpop.eup %2472 }
 0x650   :  { %v845_v21 = vsel %vm570_vm2, %v2473_v20, 0.0 }
 0x651   :  { %910 = vrot.lane.b32.xlu1 %v2949_v39, %s2771_s5  ;;  %846 = vadd.xlane.f32.xlu0 %v845_v21 }
 0x653   :  { %v2475_v25 = vpop.eup %2474 }
 0x654   :  { %v848_v26 = vsel %vm570_vm2, %v2475_v25, 0.0 }
 0x655   :  { %972 = vrot.lane.b32.xlu1 %v2943_v29, %s2760_s1 }
 0x667   :  { %862 = vrot.lane.b32.xlu0 %v2951_v42, %s2771_s5 }
 0x66b   :  { %970 = vrot.lane.b32.xlu0 %v2945_v31, %s2760_s1 }
 0x679   :  { %849 = vadd.xlane.f32.xlu1 %v848_v26 }
 0x68a   :  { %1023 = vrot.lane.b32.xlu1 %v2956_v50, %s2760_s1 }
 0x68e   :  { %1021 = vrot.lane.b32.xlu1 %v2958_v51, %s2760_s1 }
 0x6cb   :  { %v841_v30 = vpop.xlane.xlu0 %840 }
 0x6cd   :  { %v844_v27 = vpop.xlane.xlu1 %843 }
 0x6ce   :  { %2476 = vrcp.f32 %v844_v27 }
 0x6cf   :  { %2478 = vrcp.f32 %v841_v30 }
 0x6d1   :  { %v911_v28 = vpop.permute.xlu1 %910 }
 0x6d2   :  { %2233 = vmatpush3.bf16.msra.mxu0 %v911_v28 }
 0x6d3   :  { %2244 = vmatprep.subr.bf16.mxu0 %v2769_v14 }
 0x6d5   :  { %v973_v40 = vpop.permute.xlu1 %972 }
 0x6d6   :  { %v978_v41 = vsel %vm475_vm1, %v973_v40, 0 }
 0x6d8   :  { %v2477_v32 = vpop.eup %2476 }
 0x6d9   :  { %v2479_v34 = vpop.eup %2478  ;;  %v854_v35 = vmul.f32 %v2477_v32, %v2471_v15 }
 0x6da   :  { %v852_v36 = vmul.f32 %v2479_v34, %v2469_v12 }
 0x6dc   :  { %v859_v38 = vpack.c.bf16 %v854_v35, %v852_v36 }
 0x6de   :  { %v847_v33 = vpop.xlane.xlu0 %846 }
 0x6df   :  { %2480 = vrcp.f32 %v847_v33 }
 0x6e2   :  { %v863_v37 = vpop.permute.xlu0 %862 }
 0x6e3   :  { %2227 = vmatpush3.bf16.msra.mxu1 %v863_v37 }
 0x6e4   :  { %2238 = vmatprep.subr.bf16.mxu1 %v2769_v14 }
 0x6e6   :  { %2229 = vmatmul.mubr.msk.bf16.vlgmr.msra.gmra.mrb[12].mxu1 %vm570_vm2, %v859_v38  ;;  %v971_v43 = vpop.permute.xlu0 %970 }
 0x6e7   :  { %2240 = vmatprep.mubr.msk.bf16.mxu1 %vm2770_vm0, %v2769_v14 }
 0x6e9   :  { %v2481_v45 = vpop.eup %2480 }
 0x6ea   :  { %v856_v47 = vmul.f32 %v2481_v45, %v2473_v20 }
 0x6ec   :  { %2239 = vmatpush3.bf16.xpose.msra.mxu1 %v978_v41 }
 0x6ed   :  { %2250 = vmatprep.subr.bf16.mxu1 %v2769_v14 }
 0x6f3   :  { %2241 = vmatmul.mubr.msk.bf16.vlgmr.msra.gmra.mrb[16].mxu1 %vm475_vm1, %v971_v43 }
 0x6f4   :  { %2252 = vmatprep.mubr.msk.bf16.mxu1 %vm2770_vm0, %v2769_v14 }
 0x706   :  { %v850_v44 = vpop.xlane.xlu1 %849 }
 0x707   :  { %2482 = vrcp.f32 %v850_v44 }
 0x70a   :  { %v1024_v49 = vpop.permute.xlu1 %1023 }
 0x70b   :  { %v1029_v53 = vsel %vm475_vm1, %v1024_v49, 0 }
 0x70e   :  { %v1022_v54 = vpop.permute.xlu1 %1021 }
 0x711   :  { %v2483_v46 = vpop.eup %2482 }
 0x712   :  { %v858_v48 = vmul.f32 %v2483_v46, %v2475_v25 }
 0x714   :  { %v860_v52 = vpack.c.bf16 %v858_v48, %v856_v47 }
 0x716   :  { %2235 = vmatmul.mubr.msk.bf16.vlgmr.msra.gmra.mrb[24].mxu0 %vm570_vm2, %v860_v52 }
 0x717   :  { %2245 = vmatpush3.bf16.xpose.msra.mxu0 %v1029_v53  ;;  %2246 = vmatprep.mubr.msk.bf16.mxu0 %vm2770_vm0, %v2769_v14 }
 0x718   :  { %2256 = vmatprep.subr.bf16.mxu0 %v2769_v14 }
 0x71e   :  { %2247 = vmatmul.mubr.msk.bf16.vlgmr.msra.gmra.mrb[28].mxu0 %vm475_vm1, %v1022_v54 }
 0x71f   :  { %2258 = vmatprep.mubr.msk.bf16.mxu0 %vm2770_vm0, %v2769_v14 }
 0x7b9   :  { %v3045_v55 = vpop.f32.mrb[12].mxu1 }
 0x7ba   :  { %v2230_v56 = vpop.f32.mrb[13].mxu1 }
 0x7bb   :  { %v3047_v57 = vpop.f32.mrb[14].mxu1 }
 0x7bc   :  { %v957_v58 = vpack.c.bf16 %v3047_v57, %v3045_v55  ;;  %v2231_v59 = vpop.f32.mrb[15].mxu1 }
 0x7c6   :  { %v1014_v60 = vpop.f32.mrb[16].mxu1 }
 0x7c7   :  { %v2242_v61 = vpop.f32.mrb[17].mxu1  ;;  %v1072_v62 = vsel %vm570_vm2, %v1014_v60, -inf }
 0x7c8   :  { %1073 = vmax.xlane.f32.xlu0 %v1072_v62  ;;  %v1017_v63 = vpop.f32.mrb[18].mxu1 }
 0x7c9   :  { %v2243_v0 = vpop.f32.mrb[19].mxu1  ;;  %v1075_v1 = vsel %vm570_vm2, %v1017_v63, -inf }
 0x7ca   :  { %1076 = vmax.xlane.f32.xlu1 %v1075_v1 }
 0x7e9   :  { %v3053_v2 = vpop.f32.mrb[24].mxu0 }
 0x7ea   :  { %v2236_v3 = vpop.f32.mrb[25].mxu0 }
 0x7eb   :  { %v3055_v4 = vpop.f32.mrb[26].mxu0 }
 0x7ec   :  { %v958_v5 = vpack.c.bf16 %v3055_v4, %v3053_v2  ;;  %v2237_v6 = vpop.f32.mrb[27].mxu0 }
 0x7f1   :  { %v1065_v7 = vpop.f32.mrb[28].mxu0 }
 0x7f2   :  { %v2248_v8 = vpop.f32.mrb[29].mxu0  ;;  %v1078_v9 = vsel %vm570_vm2, %v1065_v7, -inf }
 0x7f3   :  { %1079 = vmax.xlane.f32.xlu0 %v1078_v9  ;;  %v1068_v10 = vpop.f32.mrb[30].mxu0 }
 0x7f4   :  { %v2249_v11 = vpop.f32.mrb[31].mxu0  ;;  %v1081_v12 = vsel %vm570_vm2, %v1068_v10, -inf }
 0x7f7   :  { %1082 = vmax.xlane.f32.xlu0 %v1081_v12 }
 0x855   :  { %v1074_v13 = vpop.xlane.xlu0 %1073 }
 0x856   :  { %v1084_v15 = vsub.f32 %v1014_v60, %v1074_v13 }
 0x857   :  { %v1077_v16 = vpop.xlane.xlu1 %1076 }
 0x858   :  { %v1088_v17 = vmul.f32 1.442695, %v1084_v15  ;;  %v1085_v18 = vsub.f32 %v1017_v63, %v1077_v16 }
 0x85a   :  { %2484 = vpow2.f32 %v1088_v17  ;;  %v1090_v19 = vmul.f32 1.442695, %v1085_v18 }
 0x85c   :  { %2486 = vpow2.f32 %v1090_v19 }
 0x864   :  { %v2485_v20 = vpop.eup %2484 }
 0x865   :  { %v1096_v21 = vsel %vm570_vm2, %v2485_v20, 0.0 }
 0x866   :  { %v2487_v22 = vpop.eup %2486  ;;  %1097 = vadd.xlane.f32.xlu0 %v1096_v21 }
 0x867   :  { %v1099_v23 = vsel %vm570_vm2, %v2487_v22, 0.0 }
 0x868   :  { %1100 = vadd.xlane.f32.xlu1 %v1099_v23 }
 0x879   :  { %1165 = vrot.lane.b32.xlu1 %v2949_v39, %s2760_s1 }
 0x87d   :  { %1227 = vrot.lane.b32.xlu1 %v2943_v29, %s2772_s21 }
 0x880   :  { %v1080_v24 = vpop.xlane.xlu0 %1079 }
 0x881   :  { %v1086_v25 = vsub.f32 %v1065_v7, %v1080_v24 }
 0x883   :  { %v1092_v26 = vmul.f32 1.442695, %v1086_v25 }
 0x884   :  { %v1083_v27 = vpop.xlane.xlu0 %1082 }
 0x885   :  { %2488 = vpow2.f32 %v1092_v26  ;;  %v1087_v28 = vsub.f32 %v1068_v10, %v1083_v27 }
 0x887   :  { %v1094_v32 = vmul.f32 1.442695, %v1087_v28 }
 0x889   :  { %2490 = vpow2.f32 %v1094_v32 }
 0x88f   :  { %v2489_v30 = vpop.eup %2488 }
 0x890   :  { %v1102_v33 = vsel %vm570_vm2, %v2489_v30, 0.0 }
 0x891   :  { %1103 = vadd.xlane.f32.xlu0 %v1102_v33 }
 0x893   :  { %v2491_v34 = vpop.eup %2490 }
 0x894   :  { %v1105_v35 = vsel %vm570_vm2, %v2491_v34, 0.0 }
 0x8a1   :  { %1106 = vadd.xlane.f32.xlu1 %v1105_v35 }
 0x8a7   :  { %1118 = vrot.lane.b32.xlu0 %v2951_v42, %s2760_s1 }
 0x8ab   :  { %1225 = vrot.lane.b32.xlu0 %v2945_v31, %s2772_s21 }
 0x8b2   :  { %1278 = vrot.lane.b32.xlu1 %v2956_v50, %s2772_s21 }
 0x8b6   :  { %1276 = vrot.lane.b32.xlu1 %v2958_v51, %s2772_s21 }
 0x8f3   :  { %v1098_v37 = vpop.xlane.xlu0 %1097 }
 0x8f5   :  { %v1101_v29 = vpop.xlane.xlu1 %1100 }
 0x8f6   :  { %2492 = vrcp.f32 %v1101_v29 }
 0x8f7   :  { %2494 = vrcp.f32 %v1098_v37 }
 0x8f9   :  { %v1166_v36 = vpop.permute.xlu1 %1165 }
 0x8fa   :  { %2257 = vmatpush3.bf16.msra.mxu0 %v1166_v36 }
 0x8fb   :  { %2268 = vmatprep.subr.bf16.mxu0 %v2769_v14 }
 0x8fd   :  { %v1228_v50 = vpop.permute.xlu1 %1227 }
 0x8fe   :  { %v1233_v51 = vsel %vm475_vm1, %v1228_v50, 0 }
 0x900   :  { %v2493_v38 = vpop.eup %2492 }
 0x901   :  { %v2495_v41 = vpop.eup %2494  ;;  %v1111_v43 = vmul.f32 %v2493_v38, %v2487_v22 }
 0x902   :  { %v1109_v44 = vmul.f32 %v2495_v41, %v2485_v20 }
 0x904   :  { %v1116_v45 = vpack.c.bf16 %v1111_v43, %v1109_v44 }
 0x91e   :  { %v1104_v40 = vpop.xlane.xlu0 %1103 }
 0x91f   :  { %2496 = vrcp.f32 %v1104_v40 }
 0x922   :  { %v1119_v31 = vpop.permute.xlu0 %1118 }
 0x923   :  { %2251 = vmatpush3.bf16.msra.mxu1 %v1119_v31 }
 0x924   :  { %2262 = vmatprep.subr.bf16.mxu1 %v2769_v14 }
 0x926   :  { %2253 = vmatmul.mubr.msk.bf16.vlgmr.msra.gmra.mrb[20].mxu1 %vm570_vm2, %v1116_v45  ;;  %v1226_v47 = vpop.permute.xlu0 %1225 }
 0x927   :  { %2264 = vmatprep.mubr.msk.bf16.mxu1 %vm2770_vm0, %v2769_v14 }
 0x929   :  { %v2497_v48 = vpop.eup %2496 }
 0x92a   :  { %v1113_v52 = vmul.f32 %v2497_v48, %v2489_v30 }
 0x92c   :  { %2263 = vmatpush3.bf16.xpose.msra.mxu1 %v1233_v51 }
 0x92d   :  { %2274 = vmatprep.subr.bf16.mxu1 %v2769_v14 }
 0x92e   :  { %v1107_v46 = vpop.xlane.xlu1 %1106 }
 0x92f   :  { %2498 = vrcp.f32 %v1107_v46 }
 0x932   :  { %v1279_v54 = vpop.permute.xlu1 %1278 }
 0x933   :  { %2265 = vmatmul.mubr.msk.bf16.vlgmr.msra.gmra.mrb[24].mxu1 %vm475_vm1, %v1226_v47  ;;  %v1284_v59 = vsel %vm475_vm1, %v1279_v54, 0 }
 0x934   :  { %2276 = vmatprep.mubr.msk.bf16.mxu1 %vm2770_vm0, %v2769_v14 }
 0x936   :  { %v1277_v60 = vpop.permute.xlu1 %1276 }
 0x939   :  { %v2499_v49 = vpop.eup %2498 }
 0x93a   :  { %v1115_v53 = vmul.f32 %v2499_v49, %v2491_v34 }
 0x93c   :  { %v1117_v56 = vpack.c.bf16 %v1115_v53, %v1113_v52 }
 0x93e   :  { %2259 = vmatmul.mubr.msk.bf16.vlgmr.msra.gmra.mrb[32].mxu0 %vm570_vm2, %v1117_v56 }
 0x93f   :  { %2269 = vmatpush3.bf16.xpose.msra.mxu0 %v1284_v59  ;;  %2270 = vmatprep.mubr.msk.bf16.mxu0 %vm2770_vm0, %v2769_v14  ;;  %v2436_v59 = vld [vmem:[#allocation9] sm:$0xff]  }
 0x940   :  { %2280 = vmatprep.subr.bf16.mxu0 %v2769_v14 }
 0x946   :  { %2271 = vmatmul.mubr.msk.bf16.vlgmr.msra.gmra.mrb[36].mxu0 %vm475_vm1, %v1277_v60  ;;  %v2437_v60 = vld [vmem:[#allocation9 + $0x8] sm:$0xff]  }
 0x947   :  { %2282 = vmatprep.mubr.msk.bf16.mxu0 %vm2770_vm0, %v2769_v14 }
 0x9f9   :  { %v1158_v61 = vpop.f32.mrb[20].mxu1 }
 0x9fa   :  { %v2254_v62 = vpop.f32.mrb[21].mxu1 }
 0x9fb   :  { %v1161_v63 = vpop.f32.mrb[22].mxu1  ;;  %v2439_v62 = vld [vmem:[#allocation9 + $0x18] sm:$0xff]  }
 0x9fc   :  { %v1212_v0 = vpack.c.bf16 %v1161_v63, %v1158_v61  ;;  %v2255_v1 = vpop.f32.mrb[23].mxu1  ;;  %v2438_v61 = vld [vmem:[#allocation9 + $0x10] sm:$0xff]   ;;  %v2440_v63 = vld [vmem:[#allocation9 + $0x20] sm:$0xff]  }
 0xa06   :  { %v1269_v3 = vpop.f32.mrb[24].mxu1 }
 0xa07   :  { %v2266_v6 = vpop.f32.mrb[25].mxu1  ;;  %v1327_v7 = vsel %vm570_vm2, %v1269_v3, -inf }
 0xa08   :  { %1328 = vmax.xlane.f32.xlu0 %v1327_v7  ;;  %v1272_v8 = vpop.f32.mrb[26].mxu1 }
 0xa09   :  { %v2267_v9 = vpop.f32.mrb[27].mxu1  ;;  %v1330_v10 = vsel %vm570_vm2, %v1272_v8, -inf }
 0xa0a   :  { %1331 = vmax.xlane.f32.xlu1 %v1330_v10  ;;  %v2442_v9 = vld [vmem:[#allocation9 + $0x30] sm:$0xff]   ;;  %v2443_v10 = vld [vmem:[#allocation9 + $0x38] sm:$0xff]  }
 0xa11   :  { %v1205_v11 = vpop.f32.mrb[32].mxu0 }
 0xa12   :  { %v2260_v12 = vpop.f32.mrb[33].mxu0 }
 0xa13   :  { %v1208_v13 = vpop.f32.mrb[34].mxu0 }
 0xa14   :  { %v1213_v15 = vpack.c.bf16 %v1208_v13, %v1205_v11  ;;  %v2261_v14 = vpop.f32.mrb[35].mxu0 }
 0xa19   :  { %v1320_v16 = vpop.f32.mrb[36].mxu0 }
 0xa1a   :  { %v2272_v17 = vpop.f32.mrb[37].mxu0  ;;  %v1333_v18 = vsel %vm570_vm2, %v1320_v16, -inf }
 0xa1b   :  { %1334 = vmax.xlane.f32.xlu0 %v1333_v18  ;;  %v1323_v19 = vpop.f32.mrb[38].mxu0 }
 0xa1c   :  { %v2273_v20 = vpop.f32.mrb[39].mxu0  ;;  %v1336_v21 = vsel %vm570_vm2, %v1323_v19, -inf }
 0xa1d   :  { %v2063_v20 = vld [vmem:[#allocation6 + $0x5] ss:$0 sm:$0xff] }
 0xa1f   :  { %1337 = vmax.xlane.f32.xlu0 %v1336_v21 }
 0xa95   :  { %v1329_v22 = vpop.xlane.xlu0 %1328 }
 0xa96   :  { %v1339_v23 = vsub.f32 %v1269_v3, %v1329_v22 }
 0xa97   :  { %v1332_v24 = vpop.xlane.xlu1 %1331 }
 0xa98   :  { %v1343_v25 = vmul.f32 1.442695, %v1339_v23  ;;  %v1340_v26 = vsub.f32 %v1272_v8, %v1332_v24 }
 0xa9a   :  { %2500 = vpow2.f32 %v1343_v25  ;;  %v1345_v27 = vmul.f32 1.442695, %v1340_v26 }
 0xa9c   :  { %2502 = vpow2.f32 %v1345_v27 }
 0xaa4   :  { %v2501_v28 = vpop.eup %2500 }
 0xaa5   :  { %v1351_v30 = vsel %vm570_vm2, %v2501_v28, 0.0 }
 0xaa6   :  { %v2503_v32 = vpop.eup %2502  ;;  %1352 = vadd.xlane.f32.xlu0 %v1351_v30 }
 0xaa7   :  { %v1354_v33 = vsel %vm570_vm2, %v2503_v32, 0.0 }
 0xaa8   :  { %1355 = vadd.xlane.f32.xlu1 %v1354_v33  ;;  %v1335_v34 = vpop.xlane.xlu0 %1334 }
 0xaa9   :  { %v1341_v35 = vsub.f32 %v1320_v16, %v1335_v34 }
 0xaab   :  { %v1347_v29 = vmul.f32 1.442695, %v1341_v35  ;;  %v2526_v35 = vld [vmem:[#allocation3 + $0x10] sm:$0xff] }
 0xaac   :  { %v1338_v36 = vpop.xlane.xlu0 %1337 }
 0xaad   :  { %2504 = vpow2.f32 %v1347_v29  ;;  %v1342_v37 = vsub.f32 %v1323_v19, %v1338_v36  ;;  %v2527_v36 = vld [vmem:[#allocation3 + $0x18] sm:$0xff] }
 0xaaf   :  { %v1349_v38 = vmul.f32 1.442695, %v1342_v37 }
 0xab1   :  { %2506 = vpow2.f32 %v1349_v38 }
 0xab7   :  { %v2505_v40 = vpop.eup %2504 }
 0xab8   :  { %v1357_v41 = vsel %vm570_vm2, %v2505_v40, 0.0 }
 0xab9   :  { %1358 = vadd.xlane.f32.xlu0 %v1357_v41 }
 0xabb   :  { %v2507_v43 = vpop.eup %2506 }
 0xabc   :  { %v1360_v44 = vsel %vm570_vm2, %v2507_v43, 0.0 }
 0xabd   :  { %1361 = vadd.xlane.f32.xlu1 %v1360_v44 }
 0xace   :  { %1420 = vrot.lane.b32.xlu1 %v2949_v39, %s2772_s21 }
 0xacf   :  { %1373 = vrot.lane.b32.xlu0 %v2951_v42, %s2772_s21 }
 0xad2   :  { %961 = vrot.lane.b32.xlu1 %v957_v58, %s2772_s21 }
 0xad3   :  { %1216 = vrot.lane.b32.xlu0 %v1212_v0, %s2760_s1  ;;  %v2441_v0 = vld [vmem:[#allocation9 + $0x28] sm:$0xff]  }
 0xad6   :  { %963 = vrot.lane.b32.xlu1 %v958_v5, %s2772_s21 }
 0xada   :  { %1218 = vrot.lane.b32.xlu1 %v1213_v15, %s2760_s1  ;;  %s3157_s1 = smov 0  }
 0xb33   :  { %v1353_v45 = vpop.xlane.xlu0 %1352 }
 0xb35   :  { %v1356_v31 = vpop.xlane.xlu1 %1355 }
 0xb36   :  { %2508 = vrcp.f32 %v1356_v31 }
 0xb37   :  { %2510 = vrcp.f32 %v1353_v45 }
 0xb40   :  { %v2509_v39 = vpop.eup %2508 }
 0xb41   :  { %v2511_v50 = vpop.eup %2510  ;;  %v1366_v51 = vmul.f32 %v2509_v39, %v2503_v32  ;;  %v2525_v32 = vld [vmem:[#allocation3 + $0x8] sm:$0xff] }
 0xb42   :  { %v1364_v55 = vmul.f32 %v2511_v50, %v2501_v28  ;;  %v2524_v28 = vld [vmem:[#allocation3] sm:$0xff] }
 0xb44   :  { %v1371_v46 = vpack.c.bf16 %v1366_v51, %v1364_v55 }
 0xb46   :  { %v1359_v42 = vpop.xlane.xlu0 %1358 }
 0xb47   :  { %2512 = vrcp.f32 %v1359_v42 }
 0xb4a   :  { %v1362_v57 = vpop.xlane.xlu1 %1361  ;;  %v1374_v58 = vpop.permute.xlu0 %1373 }
 0xb4b   :  { %2514 = vrcp.f32 %v1362_v57  ;;  %2275 = vmatpush3.bf16.msra.mxu1 %v1374_v58 }
 0xb4c   :  { %2286 = vmatprep.subr.bf16.mxu1 %v2436_v59 }
 0xb4e   :  { %v1421_v47 = vpop.permute.xlu1 %1420  ;;  %2277 = vmatmul.mubr.msk.bf16.vlgmr.msra.gmra.mrb[28].mxu1 %vm570_vm2, %v1371_v46  ;;  %v1217_v5 = vpop.permute.xlu0 %1216 }
 0xb4f   :  { %2281 = vmatpush3.bf16.msra.mxu0 %v1421_v47  ;;  %2287 = vmatpush3.bf16.msra.mxu1 %v2436_v59 }
 0xb50   :  { %2288 = vmatprep.subr.bf16.mxu1 %v2437_v60 }
 0xb51   :  { %v2513_v4 = vpop.eup %2512 }
 0xb52   :  { %v962_v2 = vpop.permute.xlu1 %961  ;;  %v1368_v49 = vmul.f32 %v2513_v4, %v2505_v40 }
 0xb53   :  { %968 = vst.msk [vmem:[#allocation2] sm:$0xff] %vm967_vm3, %v962_v2  ;;  %2289 = vmatpush3.bf16.msra.mxu1 %v2437_v60 }
 0xb54   :  { %1223 = vst.msk [vmem:[#allocation2] sm:$0xff] %vm1222_vm4, %v1217_v5  ;;  %2290 = vmatprep.subr.bf16.mxu1 %v2438_v61 }
 0xb55   :  { %v2515_v48 = vpop.eup %2514 }
 0xb56   :  { %v1370_v52 = vmul.f32 %v2515_v48, %v2507_v43  ;;  %v964_v53 = vpop.permute.xlu1 %963 }
 0xb57   :  { %969 = vst.msk [vmem:[#allocation2 + $0x8] sm:$0xff] %vm967_vm3, %v964_v53  ;;  %2291 = vmatpush3.bf16.msra.mxu1 %v2438_v61 }
 0xb58   :  { %v1372_v54 = vpack.c.bf16 %v1370_v52, %v1368_v49  ;;  %2292 = vmatprep.subr.bf16.mxu1 %v2439_v62 }
 0xb5a   :  { %v1219_v56 = vpop.permute.xlu1 %1218  ;;  %2283 = vmatmul.mubr.msk.bf16.vlgmr.msra.gmra.mrb[40].mxu0 %vm570_vm2, %v1372_v54 }
 0xb5b   :  { %1224 = vst.msk [vmem:[#allocation2 + $0x8] sm:$0xff] %vm1222_vm4, %v1219_v56  ;;  %2293 = vmatpush3.bf16.msra.mxu1 %v2439_v62 }
 0xb5c   :  { %2294 = vmatprep.subr.bf16.mxu1 %v2440_v63 }
 0xb5f   :  { %2295 = vmatpush3.bf16.msra.mxu1 %v2440_v63  ;;  %v2072_v63 = vld [vmem:[#allocation6 + $0x6] ss:$0 sm:$0xff] }
 0xb60   :  { %2296 = vmatprep.subr.bf16.mxu1 %v2441_v0 }
 0xb63   :  { %2297 = vmatpush3.bf16.msra.mxu1 %v2441_v0 }
 0xb64   :  { %2298 = vmatprep.subr.bf16.mxu1 %v2442_v9 }
 0xb67   :  { %2299 = vmatpush3.bf16.msra.mxu1 %v2442_v9 }
 0xb68   :  { %2300 = vmatprep.subr.bf16.mxu1 %v2443_v10 }
 0xb6b   :  { %2301 = vmatpush3.bf16.msra.mxu1 %v2443_v10 }
 0xc21   :  { %v1413_v1 = vpop.f32.mrb[28].mxu1 }
 0xc22   :  { %v2278_v3 = vpop.f32.mrb[29].mxu1 }
 0xc23   :  { %v1416_v6 = vpop.f32.mrb[30].mxu1 }
 0xc24   :  { %v1467_v7 = vpack.c.bf16 %v1416_v6, %v1413_v1  ;;  %v2279_v8 = vpop.f32.mrb[31].mxu1 }
 0xc25   :  { %v2073_v8 = vld [vmem:[#allocation6 + $0x7] ss:$0 sm:$0xff] }
 0xc26   :  { %1471 = vrot.lane.b32.xlu0 %v1467_v7, %s2771_s5 }
 0xc2d   :  { %v1460_v11 = vpop.f32.mrb[40].mxu0 }
 0xc2e   :  { %v2284_v12 = vpop.f32.mrb[41].mxu0 }
 0xc2f   :  { %v1463_v13 = vpop.f32.mrb[42].mxu0 }
 0xc30   :  { %v1468_v15 = vpack.c.bf16 %v1463_v13, %v1460_v11  ;;  %v2285_v14 = vpop.f32.mrb[43].mxu0 }
 0xc32   :  { %1473 = vrot.lane.b32.xlu1 %v1468_v15, %s2771_s5 }
 0xc98   :  { %v1472_v16 = vpop.permute.xlu0 %1471 }
 0xc99   :  { %1478 = vst.msk [vmem:[#allocation2] sm:$0xff] %vm1477_vm5, %v1472_v16 }
 0xca0   :  { %v1480_v17 = vld [vmem:[#allocation2] sm:$0xff] }
 0xca1   :  { %2302 = vmatprep.mubr.bf16.mxu1 %v1480_v17 }
 0xca4   :  { %v1474_v18 = vpop.permute.xlu1 %1473 }
 0xca5   :  { %1479 = vst.msk [vmem:[#allocation2 + $0x8] sm:$0xff] %vm1477_vm5, %v1474_v18 }
 0xcac   :  { %v1481_v19 = vld [vmem:[#allocation2 + $0x8] sm:$0xff] }
 0xcad   :  { %2303 = vmatmul.mubr.bf16.vlgmr.msra.gmra.mrb[32].mxu1 %v1481_v19 }
 0xd80   :  { %v2304_v21 = vpop.f32.mrb[32].mxu1 }
 0xd81   :  { %v1585_v22 = vpop.f32.mrb[33].mxu1  ;;  %v1594_v26 = vadd.f32 %v2304_v21, %v2063_v20  ;;  %v3149_v21 = vmov 0.0  }
 0xd82   :  { %v1586_v23 = vadd.f32 %v2063_v20, %v1585_v22  ;;  %v2305_v24 = vpop.f32.mrb[34].mxu1  ;;  %v3151_v22 = vmov 0.0  }
 0xd83   :  { %v1588_v25 = vpop.f32.mrb[35].mxu1  ;;  %v1597_v34 = vadd.f32 %v2305_v24, %v2063_v20  ;;  %v3127_v29 = vadd.f32 %v2526_v35, %v1594_v26  ;;  %v3155_v24 = vmov 0.0  }
 0xd84   :  { %v1589_v27 = vadd.f32 %v2063_v20, %v1588_v25  ;;  %v3121_v30 = vadd.f32 %v2524_v28, %v1586_v23  ;;  %v3153_v23 = vmov 0.0  }
 0xd85   :  { %v3130_v37 = vadd.f32 %v2527_v36, %v1597_v34 }
 0xd86   :  { %1606 = vadd.xlane.f32.xlu0 %v3121_v30  ;;  %v3124_v33 = vadd.f32 %v2525_v32, %v1589_v27 }
 0xd88   :  { %1608 = vadd.xlane.f32.xlu1 %v3124_v33 }
 0xd8a   :  { %1610 = vadd.xlane.f32.xlu0 %v3127_v29 }
 0xd8e   :  { %1612 = vadd.xlane.f32.xlu0 %v3130_v37 }
 0xe13   :  { %v1607_v38 = vpop.xlane.xlu0 %1606 }
 0xe14   :  { %v1614_v40 = vmul.f32 0.0078125, %v1607_v38 }
 0xe15   :  { %v1609_v41 = vpop.xlane.xlu1 %1608 }
 0xe16   :  { %v1618_v43 = vsub.f32 %v3121_v30, %v1614_v40  ;;  %v1615_v44 = vmul.f32 0.0078125, %v1609_v41 }
 0xe17   :  { %v1611_v31 = vpop.xlane.xlu0 %1610 }
 0xe18   :  { %v1619_v45 = vsub.f32 %v3124_v33, %v1615_v44  ;;  %v1616_v39 = vmul.f32 0.0078125, %v1611_v31  ;;  %v1622_v42 = vmul.f32 %v1618_v43, %v1618_v43 }
 0xe1a   :  { %v1620_v50 = vsub.f32 %v3127_v29, %v1616_v39  ;;  %1626 = vadd.xlane.f32.xlu0 %v1622_v42  ;;  %v1623_v51 = vmul.f32 %v1619_v45, %v1619_v45 }
 0xe1b   :  { %v1613_v55 = vpop.xlane.xlu0 %1612 }
 0xe1c   :  { %v1617_v57 = vmul.f32 0.0078125, %v1613_v55  ;;  %1628 = vadd.xlane.f32.xlu1 %v1623_v51  ;;  %v1624_v58 = vmul.f32 %v1620_v50, %v1620_v50 }
 0xe1e   :  { %v1621_v46 = vsub.f32 %v3130_v37, %v1617_v57  ;;  %1630 = vadd.xlane.f32.xlu0 %v1624_v58 }
 0xe20   :  { %v1625_v47 = vmul.f32 %v1621_v46, %v1621_v46 }
 0xe22   :  { %1632 = vadd.xlane.f32.xlu1 %v1625_v47 }
 0xea7   :  { %v1627_v2 = vpop.xlane.xlu0 %1626 }
 0xea8   :  { %v1634_v4 = vmul.f32 0.0078125, %v1627_v2 }
 0xea9   :  { %v1629_v5 = vpop.xlane.xlu1 %1628 }
 0xeaa   :  { %v1638_v48 = vadd.f32 1e-05, %v1634_v4  ;;  %v1635_v49 = vmul.f32 0.0078125, %v1629_v5 }
 0xeab   :  { %v1631_v52 = vpop.xlane.xlu0 %1630 }
 0xeac   :  { %2516 = vrsqrt.f32 %v1638_v48  ;;  %v1639_v53 = vadd.f32 1e-05, %v1635_v49  ;;  %v1636_v54 = vmul.f32 0.0078125, %v1631_v52 }
 0xeae   :  { %2518 = vrsqrt.f32 %v1639_v53  ;;  %v1640_v56 = vadd.f32 1e-05, %v1636_v54 }
 0xeaf   :  { %v1633_v59 = vpop.xlane.xlu1 %1632 }
 0xeb0   :  { %2520 = vrsqrt.f32 %v1640_v56  ;;  %v1637_v60 = vmul.f32 0.0078125, %v1633_v59 }
 0xeb2   :  { %v1641_v61 = vadd.f32 1e-05, %v1637_v60 }
 0xeb4   :  { %2522 = vrsqrt.f32 %v1641_v61 }
 0xeb6   :  { %v2517_v62 = vpop.eup %2516 }
 0xeb7   :  { %v1646_v0 = vmul.f32 %v2517_v62, %v1618_v43 }
 0xeb8   :  { %v2519_v1 = vpop.eup %2518 }
 0xeb9   :  { %v1654_v3 = vmul.f32 %v2072_v63, %v1646_v0  ;;  %v1647_v6 = vmul.f32 %v2519_v1, %v1619_v45 }
 0xeba   :  { %v2521_v7 = vpop.eup %2520 }
 0xebb   :  { %v1655_v9 = vmul.f32 %v2072_v63, %v1647_v6  ;;  %v1648_v10 = vmul.f32 %v2521_v7, %v1620_v50  ;;  %v3137_v11 = vadd.f32 %v2073_v8, %v1654_v3 }
 0xebd   :  { %v3139_v12 = vadd.f32 %v2073_v8, %v1655_v9  ;;  %v1656_v14 = vmul.f32 %v2072_v63, %v1648_v10 }
 0xebe   :  { %v2523_v13 = vpop.eup %2522 }
 0xebf   :  { %v1666_v15 = vpack.c.bf16 %v3139_v12, %v3137_v11  ;;  %v1649_v16 = vmul.f32 %v2523_v13, %v1621_v46  ;;  %v3143_v18 = vadd.f32 %v2073_v8, %v1656_v14 }
 0xec1   :  { %v1657_v17 = vmul.f32 %v2072_v63, %v1649_v16 }
 0xec3   :  { %v3145_v19 = vadd.f32 %v2073_v8, %v1657_v17 }
 0xec5   :  { %v1667_v20 = vpack.c.bf16 %v3145_v19, %v3143_v18 }
 0xec6 LB: > { %2322 = vmatprep.mubr.bf16.mxu0 %v1666_v15  ;;  %s2096_s27 = sshll.u32 %s2754_s1, 6  ;;  %s1997_s7 = scalar_lea.vmem [#allocation6], %s2754_s1  ;;  %s2754_s1 = sphi %s3157_s1, %s1673_s1   ;;  %v2750_v24 = vphi %v3155_v24, %v3226_v24   ;;  %v2746_v23 = vphi %v3153_v23, %v3225_v23   ;;  %v2742_v22 = vphi %v3151_v22, %v3224_v22   ;;  %v2738_v21 = vphi %v3149_v21, %v3223_v21  }
 0xec7   : > { %s1680_s29 = scalar_lea.vmem [#allocation11], %s2096_s27  ;;  %s1840_s30 = scalar_lea.vmem [#allocation12], %s2096_s27  ;;  %v2077_v42 = vld [vmem:[%s1997_s7 + $0x8] ss:$0 sm:$0xff] }
 0xec8   : > { %v2528_v25 = vld [vmem:[%s1680_s29] sm:$0xff]   ;;  %v2529_v26 = vld [vmem:[%s1680_s29 + $0x8] sm:$0xff]   ;;  %v2530_v27 = vld [vmem:[%s1680_s29 + $0x10] sm:$0xff]   ;;  %s1673_s1 = sadd.s32 1, %s2754_s1  }
 0xec9   : > { %2306 = vmatprep.subr.bf16.mxu0 %v2528_v25  ;;  %v2531_v28 = vld [vmem:[%s1680_s29 + $0x18] sm:$0xff]   ;;  %v2532_v32 = vld [vmem:[%s1680_s29 + $0x20] sm:$0xff]   ;;  %v2533_v34 = vld [vmem:[%s1680_s29 + $0x28] sm:$0xff]   ;;  %p1670_p6 = scmp.ge.s32.totalorder %s1673_s1, 4  }
 0xeca   : > { %2307 = vmatpush3.bf16.msra.mxu0 %v2528_v25  ;;  %v2534_v35 = vld [vmem:[%s1680_s29 + $0x30] sm:$0xff]   ;;  %v2535_v36 = vld [vmem:[%s1680_s29 + $0x38] sm:$0xff]   ;;  %v2536_v38 = vld [vmem:[%s1840_s30] sm:$0xff]   ;;  %s2773_s8 = smov (%p1670_p6), [#allocation14]  }
 0xecb   : > { %2308 = vmatprep.subr.bf16.mxu0 %v2529_v26  ;;  %2326 = vmatprep.subr.bf16.mxu1 %v2536_v38  ;;  %v2537_v40 = vld [vmem:[%s1840_s30 + $0x8] sm:$0xff]   ;;  %v2538_v41 = vld [vmem:[%s1840_s30 + $0x10] sm:$0xff]   ;;  %v2539_v43 = vld [vmem:[%s1840_s30 + $0x18] sm:$0xff]   ;;  %s1980_s11 = sshll.u32 (%p1670_p6), %s2773_s8, 4  ;;  %s1981_s11 = int_to_ptr.vmem [resolvable:$true] %s1980_s11 }
 0xecc   : > { %2327 = vmatpush3.bf16.msra.mxu1 %v2536_v38  ;;  %v2540_v44 = vld [vmem:[%s1840_s30 + $0x20] sm:$0xff]   ;;  %v2541_v31 = vld [vmem:[%s1840_s30 + $0x28] sm:$0xff]   ;;  %v2542_v45 = vld [vmem:[%s1840_s30 + $0x30] sm:$0xff]   ;;  %s2684_s12 = scalar_lea.vmem (%p1670_p6), %s1981_s11, 512  ;;  %p2689_p8 = scmp.lt.s32.totalorder (%p1670_p6), %s1981_s11, %s1981_s11 }
 0xecd   : > { %2328 = vmatprep.subr.bf16.mxu1 %v2537_v40  ;;  %v2543_v39 = vld [vmem:[%s1840_s30 + $0x38] sm:$0xff]   ;;  %p2685_p7 = scmp.ne.s32.totalorder (%p1670_p6), %s1981_s11, %s2684_s12  ;;  %p2690_p9 = scmp.lt.s32.totalorder (%p1670_p6), %s2684_s12, %s2684_s12 }
 0xece   : > { %2309 = vmatpush3.bf16.msra.mxu0 %v2529_v26 }
 0xecf   : > { %2310 = vmatprep.subr.bf16.mxu0 %v2530_v27  ;;  %p2691_p10 = por (%p1670_p6), %p2690_p9, %p2689_p8 }
 0xed0   : > { %2329 = vmatpush3.bf16.msra.mxu1 %v2537_v40 }
 0xed1   : > { %2330 = vmatprep.subr.bf16.mxu1 %v2538_v41  ;;  %p2692_p11 = pnand (%p1670_p6), %p2691_p10, %p2685_p7 }
 0xed2   : > { %2311 = vmatpush3.bf16.msra.mxu0 %v2530_v27 }
 0xed3   : > { %2312 = vmatprep.subr.bf16.mxu0 %v2531_v28 }
 0xed4   : > { %2331 = vmatpush3.bf16.msra.mxu1 %v2538_v41 }
 0xed5   : > { %2332 = vmatprep.subr.bf16.mxu1 %v2539_v43 }
 0xed6   : > { %2313 = vmatpush3.bf16.msra.mxu0 %v2531_v28 }
 0xed7   : > { %2314 = vmatprep.subr.bf16.mxu0 %v2532_v32 }
 0xed8   : > { %2333 = vmatpush3.bf16.msra.mxu1 %v2539_v43 }
 0xed9   : > { %2334 = vmatprep.subr.bf16.mxu1 %v2540_v44 }
 0xeda   : > { %2315 = vmatpush3.bf16.msra.mxu0 %v2532_v32 }
 0xedb   : > { %2316 = vmatprep.subr.bf16.mxu0 %v2533_v34 }
 0xedc   : > { %2335 = vmatpush3.bf16.msra.mxu1 %v2540_v44 }
 0xedd   : > { %2336 = vmatprep.subr.bf16.mxu1 %v2541_v31 }
 0xede   : > { %2317 = vmatpush3.bf16.msra.mxu0 %v2533_v34 }
 0xedf   : > { %2318 = vmatprep.subr.bf16.mxu0 %v2534_v35 }
 0xee0   : > { %2337 = vmatpush3.bf16.msra.mxu1 %v2541_v31 }
 0xee1   : > { %2338 = vmatprep.subr.bf16.mxu1 %v2542_v45 }
 0xee2   : > { %2319 = vmatpush3.bf16.msra.mxu0 %v2534_v35 }
 0xee3   : > { %2320 = vmatprep.subr.bf16.mxu0 %v2535_v36 }
 0xee4   : > { %2339 = vmatpush3.bf16.msra.mxu1 %v2542_v45 }
 0xee5   : > { %2340 = vmatprep.subr.bf16.mxu1 %v2543_v39 }
 0xee6   : > { %2321 = vmatpush3.bf16.msra.mxu0 %v2535_v36 }
 0xee8   : > { %2341 = vmatpush3.bf16.msra.mxu1 %v2543_v39 }
 0xee9   : > { %2323 = vmatmul.mubr.bf16.vlgmr.msra.gmra.mrb[0].mxu0 %v1667_v20 }
 0xfbc   : > { %v2324_v50 = vpop.f32.mrb[0].mxu0 }
 0xfbd   : > { %v1795_v51 = vadd.f32 %v2324_v50, %v2077_v42  ;;  %v1786_v55 = vpop.f32.mrb[1].mxu0 }
 0xfbe   : > { %v1787_v57 = vadd.f32 %v2077_v42, %v1786_v55  ;;  %v2325_v58 = vpop.f32.mrb[2].mxu0 }
 0xfbf   : > { %v1807_v46 = vmul.f32 %v1795_v51, %v1795_v51  ;;  %v1798_v47 = vadd.f32 %v2325_v58, %v2077_v42  ;;  %v1789_v2 = vpop.f32.mrb[3].mxu0  ;;  %v1803_v26 = vmul.f32 0.5, %v1795_v51  ;;  %v2095_v58 = vld [vmem:[#allocation6 + $0xc] ss:$0 sm:$0xff] (%p1670_p6) }
 0xfc0   : > { %v1805_v4 = vmul.f32 %v1787_v57, %v1787_v57  ;;  %v1790_v5 = vadd.f32 %v2077_v42, %v1789_v2  ;;  %v1801_v32 = vmul.f32 0.5, %v1787_v57 }
 0xfc1   : > { %v1811_v48 = vmul.f32 %v1807_v46, %v1795_v51  ;;  %v1808_v49 = vmul.f32 %v1798_v47, %v1798_v47  ;;  %v1804_v27 = vmul.f32 0.5, %v1798_v47 }
 0xfc2   : > { %v1809_v52 = vmul.f32 %v1805_v4, %v1787_v57  ;;  %v1806_v53 = vmul.f32 %v1790_v5, %v1790_v5  ;;  %v1802_v34 = vmul.f32 0.5, %v1790_v5 }
 0xfc3   : > { %v1815_v54 = vmul.f32 0.044715, %v1811_v48  ;;  %v1812_v56 = vmul.f32 %v1808_v49, %v1798_v47 }
 0xfc4   : > { %v1813_v59 = vmul.f32 0.044715, %v1809_v52  ;;  %v1810_v60 = vmul.f32 %v1806_v53, %v1790_v5 }
 0xfc5   : > { %v1819_v61 = vadd.f32 %v1815_v54, %v1795_v51  ;;  %v1816_v62 = vmul.f32 0.044715, %v1812_v56 }
 0xfc6   : > { %v1814_v63 = vmul.f32 0.044715, %v1810_v60  ;;  %v1817_v0 = vadd.f32 %v1813_v59, %v1787_v57 }
 0xfc7   : > { %v1823_v1 = vmul.f32 0.7978846, %v1819_v61  ;;  %v1820_v3 = vadd.f32 %v1816_v62, %v1798_v47 }
 0xfc8   : > { %v1818_v6 = vadd.f32 %v1814_v63, %v1790_v5  ;;  %v1821_v7 = vmul.f32 0.7978846, %v1817_v0 }
 0xfc9   : > { %2544 = vtanh.f32 %v1823_v1  ;;  %v1824_v8 = vmul.f32 0.7978846, %v1820_v3 }
 0xfca   : > { %v1822_v9 = vmul.f32 0.7978846, %v1818_v6  ;;  %2546 = vtanh.f32 %v1821_v7 }
 0xfcb   : > { %2548 = vtanh.f32 %v1824_v8 }
 0xfcc   : > { %2550 = vtanh.f32 %v1822_v9 }
 0xfd3   : > { %v2545_v10 = vpop.eup %2544 }
 0xfd4   : > { %v2547_v13 = vpop.eup %2546  ;;  %v1831_v14 = vadd.f32 1.0, %v2545_v10 }
 0xfd5   : > { %v2549_v16 = vpop.eup %2548  ;;  %v1829_v17 = vadd.f32 1.0, %v2547_v13 }
 0xfd6   : > { %v2551_v25 = vpop.eup %2550  ;;  %v1832_v28 = vadd.f32 1.0, %v2549_v16  ;;  %v1835_v36 = vmul.f32 %v1831_v14, %v1803_v26 }
 0xfd7   : > { %v1830_v35 = vadd.f32 1.0, %v2551_v25  ;;  %v1833_v40 = vmul.f32 %v1829_v17, %v1801_v32 }
 0xfd8   : > { %v1836_v38 = vmul.f32 %v1832_v28, %v1804_v27 }
 0xfd9   : > { %v1834_v41 = vmul.f32 %v1830_v35, %v1802_v34 }
 0xfda   : > { %v1838_v43 = vpack.c.bf16 %v1836_v38, %v1835_v36 }
 0xfdb   : > { %v1837_v44 = vpack.c.bf16 %v1834_v41, %v1833_v40 }
 0xfdd   : > { %2342 = vmatprep.mubr.bf16.mxu1 %v1837_v44 }
 0xfde   : > { %2343 = vmatmul.mubr.bf16.vlgmr.msra.gmra.mrb[0].mxu1 %v1838_v43 }
0x10b1   : > { %v2344_v31 = vpop.f32.mrb[0].mxu1  ;;  %1672 = sbr.rel (!%p1670_p6) target bundleno = 3782 (0xec6), region = 78 }
0x10b2   : > { %v1956_v45 = vadd.f32 %v2742_v22, %v2344_v31   ;;  %v1939_v39 = vpop.f32.mrb[1].mxu1 }
0x10b3   : > { %v1954_v42 = vadd.f32 %v2750_v24, %v1939_v39   ;;  %v2345_v50 = vpop.f32.mrb[2].mxu1 }
0x10b4   : > { %v1957_v51 = vadd.f32 %v2738_v21, %v2345_v50   ;;  %v1942_v55 = vpop.f32.mrb[3].mxu1  ;;  %v3224_v22 = vmov %v1956_v45  ;;  %v1960_v47 = vadd.f32 (%p1670_p6), %v1956_v45, %v3127_v29 }
0x10b5   : > { %v1955_v57 = vadd.f32 %v2746_v23, %v1942_v55   ;;  %v3226_v24 = vmov %v1954_v42 }
0x10b6   : > { %v3223_v21 = vmov %v1957_v51  ;;  %v1958_v24 = vadd.f32 (%p1670_p6), %v1954_v42, %v3121_v30  ;;  %v1961_v2 = vadd.f32 (%p1670_p6), %v1957_v51, %v3130_v37  ;;  %v1969_v48 = vadd.f32 (%p1670_p6), %v2095_v58, %v1960_v47 }
0x10b7   : > { %v3225_v23 = vmov %v1955_v57  ;;  %v1959_v46 = vadd.f32 (%p1670_p6), %v1955_v57, %v3124_v33 }
0x10b8   :  { %v1967_v4 = vadd.f32 %v2095_v58, %v1958_v24  ;;  %v1970_v49 = vadd.f32 %v2095_v58, %v1961_v2  ;;  %1973 = vst [vmem:[#allocation14 + $0x10] sm:$0xff] %v1969_v48 }
0x10b9   :  { %v1968_v5 = vadd.f32 %v2095_v58, %v1959_v46 }
0x10ba   :  { %1971 = vst [vmem:[#allocation14] sm:$0xff] %v1967_v4  ;;  %1974 = vst [vmem:[#allocation14 + $0x18] sm:$0xff] %v1970_v49 }
0x10bb   :  { %1972 = vst [vmem:[#allocation14 + $0x8] sm:$0xff] %v1968_v5 }
0x10bc   :  { %2695 = shalt.err (!%p2692_p11)
}
0x10bd   :  { %s2696_s24 = scalar_lea.hbm %s3222_s6, 512 }
0x10be   :  { %p2697_p12 = scmp.ne.s32.totalorder %s3222_s6, %s2696_s24  ;;  %p2700_p13 = scmp.lt.u32.totalorder %s2696_s24, %s3222_s6 }
0x10c0   :  { %p2702_p0 = pnand %p2700_p13, %p2697_p12 }
0x10c2   :  { %2705 = shalt.err (!%p2702_p0)
}
0x10c3   :  { %1986 = dma.vmem_to_hbm [thread:$0]  %s1981_s11, 512, %s3222_s6, [#allocation5], %s2758_s9, %s2758_s9, %s2759_s10  }
0x10c4   :  { %2734 = dma.done.wait [#allocation5], 512  }
0x10c5   :  { %2735 = vsyncadd [#allocation5], 4294966784 }
0x10c6   :  { %1990 = vsyncpa [#allocation4], 1 }
0x10c7   :  { %1991 = vsyncpa [#allocation7], 1 }
0x10c8   :  { %1992 = vsyncpa [#allocation10], 1 }
0x10c9   :  { %1993 = vsyncpa [#allocation13], 1 }
0x10ca   :  { %1994 = vsyncpa [#allocation5], 1 }

// kernel: tpu_custom_call.1
= control target key start
LH: loop header
LB: loop body
LE: loop exit
PB: predicated region body
PF: predicated region fallthrough
CT: control target
= control target key end

     0   :  { %11 = vsyncpa [#allocation4], 0  ;;  %s3216_s0 = inlined_call_operand.hbm [shape: f32[2,16,128], index: 0, kind: input, shape index: {}]   ;;  %s3217_s1 = inlined_call_operand.hbm [shape: f32[13,128], index: 1, kind: input, shape index: {}]   ;;  %s3218_s2 = inlined_call_operand.hbm [shape: bf16[128,384], index: 2, kind: input, shape index: {}]   ;;  %s3219_s3 = inlined_call_operand.hbm [shape: bf16[128,128], index: 3, kind: input, shape index: {}]   ;;  %s3220_s4 = inlined_call_operand.hbm [shape: bf16[4,128,128], index: 4, kind: input, shape index: {}]   ;;  %s3221_s5 = inlined_call_operand.hbm [shape: bf16[4,128,128], index: 5, kind: input, shape index: {}]   ;;  %s3222_s6 = inlined_call_operand.hbm [shape: f32[2,16,128], index: 6, kind: output, shape index: {}]  }
   0x1   :  { %12 = vsyncpa [#allocation7], 0 }
   0x2   :  { %13 = vsyncpa [#allocation10], 0 }
   0x3   :  { %14 = vsyncpa [#allocation13], 0 }
   0x4   :  { %15 = vsyncpa [#allocation5], 0  ;;  %s2756_s21 = smov [#allocation6]   ;;  %s2757_s23 = smov [#allocation9]  }
   0x5   :  { %s33_s22 = sshll.u32 %s2756_s21, 4  ;;  %s57_s24 = sshll.u32 %s2757_s23, 4  ;;  %s34_s22 = int_to_ptr.vmem [resolvable:$true] %s33_s22  ;;  %s2809_s24 = int_to_ptr.vmem [resolvable:$true] %s57_s24 }
   0x6   :  { %s2552_s27 = scalar_lea.hbm %s3217_s1, 256 }
   0x7   :  { %p2553_p0 = scmp.ne.s32.totalorder %s3217_s1, %s2552_s27  ;;  %p2556_p1 = scmp.lt.u32.totalorder %s2552_s27, %s3217_s1 }
   0x9   :  { %p2558_p2 = pnand %p2556_p1, %p2553_p0 }
   0xb   :  { %2561 = shalt.err (!%p2558_p2)
}
   0xc   :  { %s2562_s8 = scalar_lea.vmem %s34_s22, 256  ;;  %p2567_p4 = scmp.lt.s32.totalorder %s34_s22, %s34_s22 }
   0xd   :  { %p2563_p3 = scmp.ne.s32.totalorder %s34_s22, %s2562_s8  ;;  %p2568_p5 = scmp.lt.s32.totalorder %s2562_s8, %s2562_s8 }
   0xf   :  { %p2569_p6 = por %p2568_p5, %p2567_p4 }
  0x11   :  { %p2570_p7 = pnand %p2569_p6, %p2563_p3 }
  0x13   :  { %2573 = shalt.err (!%p2570_p7)
}
  0x14   :  { %s2758_s9 = smov 128   ;;  %s2759_s10 = smov 8  }
  0x15   :  { %39 = dma.hbm_to_vmem [thread:$0]  %s3217_s1, 256, %s34_s22, [#allocation7], %s2758_s9, %s2758_s9, %s2759_s10  }
  0x16   :  { %s2574_s15 = scalar_lea.hbm %s3219_s3, 1024 }
  0x17   :  { %p2575_p8 = scmp.ne.s32.totalorder %s3219_s3, %s2574_s15  ;;  %p2578_p9 = scmp.lt.u32.totalorder %s2574_s15, %s3219_s3 }
  0x19   :  { %p2580_p10 = pnand %p2578_p9, %p2575_p8 }
  0x1b   :  { %2583 = shalt.err (!%p2580_p10)
}
  0x1c   :  { %s2584_s20 = scalar_lea.vmem %s2809_s24, 1024  ;;  %p2589_p12 = scmp.lt.s32.totalorder %s2809_s24, %s2809_s24 }
  0x1d   :  { %p2585_p11 = scmp.ne.s32.totalorder %s2809_s24, %s2584_s20  ;;  %p2590_p13 = scmp.lt.s32.totalorder %s2584_s20, %s2584_s20 }
  0x1f   :  { %p2591_p0 = por %p2590_p13, %p2589_p12 }
  0x21   :  { %p2592_p1 = pnand %p2591_p0, %p2585_p11 }
  0x23   :  { %2595 = shalt.err (!%p2592_p1)
}
  0x24   :  { %s2760_s1 = smov 64   ;;  %s2761_s21 = smov 4  }
  0x25   :  { %63 = dma.hbm_to_vmem [thread:$0]  %s3219_s3, 1024, %s2809_s24, [#allocation10], %s2760_s1, %s2760_s1, %s2761_s21  }
  0x26   :  { %s2762_s25 = smov [#allocation3]   ;;  %s2763_s27 = smov [#allocation8]  }
  0x27   :  { %s21_s26 = sshll.u32 %s2762_s25, 4  ;;  %s45_s28 = sshll.u32 %s2763_s27, 4  ;;  %s22_s26 = int_to_ptr.vmem [resolvable:$true] %s21_s26  ;;  %s2846_s28 = int_to_ptr.vmem [resolvable:$true] %s45_s28 }
  0x28   :  { %s2596_s7 = scalar_lea.hbm %s3216_s0, 512 }
  0x29   :  { %p2597_p2 = scmp.ne.s32.totalorder %s3216_s0, %s2596_s7  ;;  %p2600_p3 = scmp.lt.u32.totalorder %s2596_s7, %s3216_s0 }
  0x2b   :  { %p2602_p4 = pnand %p2600_p3, %p2597_p2 }
  0x2d   :  { %2605 = shalt.err (!%p2602_p4)
}
  0x2e   :  { %s2606_s3 = scalar_lea.vmem %s22_s26, 512  ;;  %p2611_p6 = scmp.lt.s32.totalorder %s22_s26, %s22_s26 }
  0x2f   :  { %p2607_p5 = scmp.ne.s32.totalorder %s22_s26, %s2606_s3  ;;  %p2612_p7 = scmp.lt.s32.totalorder %s2606_s3, %s2606_s3 }
  0x31   :  { %p2613_p8 = por %p2612_p7, %p2611_p6 }
  0x33   :  { %p2614_p9 = pnand %p2613_p8, %p2607_p5 }
  0x35   :  { %2617 = shalt.err (!%p2614_p9)
}
  0x36   :  { %27 = dma.hbm_to_vmem [thread:$0]  %s3216_s0, 512, %s22_s26, [#allocation4], %s2758_s9, %s2758_s9, %s2759_s10  }
  0x37   :  { %s2618_s17 = scalar_lea.hbm %s3218_s2, 3072 }
  0x38   :  { %p2619_p10 = scmp.ne.s32.totalorder %s3218_s2, %s2618_s17  ;;  %p2622_p11 = scmp.lt.u32.totalorder %s2618_s17, %s3218_s2 }
  0x3a   :  { %p2624_p12 = pnand %p2622_p11, %p2619_p10 }
  0x3c   :  { %2627 = shalt.err (!%p2624_p12)
}
  0x3d   :  { %s2628_s23 = scalar_lea.vmem %s2846_s28, 3072  ;;  %p2633_p0 = scmp.lt.s32.totalorder %s2846_s28, %s2846_s28 }
  0x3e   :  { %p2629_p13 = scmp.ne.s32.totalorder %s2846_s28, %s2628_s23  ;;  %p2634_p1 = scmp.lt.s32.totalorder %s2628_s23, %s2628_s23 }
  0x40   :  { %p2635_p2 = por %p2634_p1, %p2633_p0 }
  0x42   :  { %p2636_p3 = pnand %p2635_p2, %p2629_p13 }
  0x44   :  { %2639 = shalt.err (!%p2636_p3)
}
  0x45   :  { %s2764_s0 = smov 192   ;;  %s2765_s25 = smov 12  }
  0x46   :  { %51 = dma.hbm_to_vmem [thread:$0]  %s3218_s2, 3072, %s2846_s28, [#allocation7], %s2764_s0, %s2764_s0, %s2765_s25  }
  0x47   :  { %s2766_s29 = smov [#allocation11]   ;;  %s2767_s7 = smov [#allocation12]  }
  0x48   :  { %s69_s30 = sshll.u32 %s2766_s29, 4  ;;  %s81_s8 = sshll.u32 %s2767_s7, 4  ;;  %s70_s30 = int_to_ptr.vmem [resolvable:$true] %s69_s30  ;;  %s2880_s8 = int_to_ptr.vmem [resolvable:$true] %s81_s8 }
  0x49   :  { %s2640_s13 = scalar_lea.hbm %s3220_s4, 4096 }
  0x4a   :  { %p2641_p4 = scmp.ne.s32.totalorder %s3220_s4, %s2640_s13  ;;  %p2644_p5 = scmp.lt.u32.totalorder %s2640_s13, %s3220_s4 }
  0x4c   :  { %p2646_p6 = pnand %p2644_p5, %p2641_p4 }
  0x4e   :  { %2649 = shalt.err (!%p2646_p6)
}
  0x4f   :  { %s2650_s2 = scalar_lea.vmem %s70_s30, 4096  ;;  %p2655_p8 = scmp.lt.s32.totalorder %s70_s30, %s70_s30 }
  0x50   :  { %p2651_p7 = scmp.ne.s32.totalorder %s70_s30, %s2650_s2  ;;  %p2656_p9 = scmp.lt.s32.totalorder %s2650_s2, %s2650_s2 }
  0x52   :  { %p2657_p10 = por %p2656_p9, %p2655_p8 }
  0x54   :  { %p2658_p11 = pnand %p2657_p10, %p2651_p7 }
  0x56   :  { %2661 = shalt.err (!%p2658_p11)
}
  0x57   :  { %75 = dma.hbm_to_vmem [thread:$0]  %s3220_s4, 4096, %s70_s30, [#allocation10], %s2760_s1, %s2760_s1, %s2761_s21  }
  0x58   :  { %s2662_s19 = scalar_lea.hbm %s3221_s5, 4096 }
  0x59   :  { %p2663_p12 = scmp.ne.s32.totalorder %s3221_s5, %s2662_s19  ;;  %p2666_p13 = scmp.lt.u32.totalorder %s2662_s19, %s3221_s5 }
  0x5b   :  { %p2668_p0 = pnand %p2666_p13, %p2663_p12 }
  0x5d   :  { %2671 = shalt.err (!%p2668_p0)
}
  0x5e   :  { %s2672_s25 = scalar_lea.vmem %s2880_s8, 4096  ;;  %p2677_p2 = scmp.lt.s32.totalorder %s2880_s8, %s2880_s8 }
  0x5f   :  { %p2673_p1 = scmp.ne.s32.totalorder %s2880_s8, %s2672_s25  ;;  %p2678_p3 = scmp.lt.s32.totalorder %s2672_s25, %s2672_s25 }
  0x61   :  { %p2679_p4 = por %p2678_p3, %p2677_p2 }
  0x63   :  { %p2680_p5 = pnand %p2679_p4, %p2673_p1 }
  0x65   :  { %2683 = shalt.err (!%p2680_p5)
}
  0x66   :  { %87 = dma.hbm_to_vmem [thread:$0]  %s3221_s5, 4096, %s2880_s8, [#allocation13], %s2760_s1, %s2760_s1, %s2761_s21  }
  0x67   :  { %2726 = dma.done.wait [#allocation4], 512  }
  0x68   :  { %2727 = vsyncadd [#allocation4], 4294966784 }
  0x69   :  { %2728 = dma.done.wait [#allocation7], 3328  }
  0x6a   :  { %2729 = vsyncadd [#allocation7], 4294963968 }
  0x6b   :  { %2730 = dma.done.wait [#allocation10], 5120  }
  0x6c   :  { %2731 = vsyncadd [#allocation10], 4294962176 }
  0x6d   :  { %2732 = dma.done.wait [#allocation13], 4096  }
  0x6e   :  { %2733 = vsyncadd [#allocation13], 4294963200  ;;  %v107_v0 = vld [vmem:[#allocation3] sm:$0xff]  ;;  %v109_v1 = vld [vmem:[#allocation3 + $0x10] sm:$0xff]  ;;  %v2768_v39 = vmov 0   ;;  %vm2770_vm0 = vmmov 0  }
  0x6f   :  { %v108_v2 = vld [vmem:[#allocation3 + $0x8] sm:$0xff]  ;;  %113 = vadd.xlane.f32.xlu0 %v107_v0  ;;  %117 = vadd.xlane.f32.xlu1 %v109_v1  ;;  %v110_v3 = vld [vmem:[#allocation3 + $0x18] sm:$0xff]  ;;  %v2404_v4 = vld [vmem:[#allocation8 + $0x4] ss:$12 sps:$4 sm:$0xff]   ;;  %vm475_vm1 = vcmask 261120   ;;  %vm570_vm2 = vcmask 130048  }
  0x70   :  { %v2406_v5 = vld [vmem:[#allocation8] ss:$12 sps:$4 sm:$0xff]   ;;  %v2407_v6 = vld [vmem:[#allocation8 + $0x1c] ss:$12 sps:$4 sm:$0xff]   ;;  %336 = vmatprep.subr.bf16.mxu0 %v2404_v4  ;;  %v2410_v24 = vld [vmem:[#allocation8 + $0x18] ss:$12 sps:$4 sm:$0xff]   ;;  %368 = vmatprep.mubr.bf16.mxu0 %v2768_v39 }
  0x71   :  { %v2409_v7 = vld [vmem:[#allocation8 + $0x8] ss:$12 sps:$4 sm:$0xff]   ;;  %337 = vmatpush1.bf16.msra.mxu0 %v2406_v5  ;;  %v2413_v26 = vld [vmem:[#allocation8 + $0x20] ss:$12 sps:$4 sm:$0xff]   ;;  %v2414_v27 = vld [vmem:[#allocation8 + $0x30] ss:$12 sps:$4 sm:$0xff]  }
  0x72   :  { %2170 = vmatprep.subr.bf16.mxu1 %v2409_v7  ;;  %338 = vmatprep.subr.bf16.mxu0 %v2407_v6  ;;  %v2411_v25 = vld [vmem:[#allocation8 + $0x34] ss:$12 sps:$4 sm:$0xff]   ;;  %v2415_v28 = vld [vmem:[#allocation8 + $0x4c] ss:$12 sps:$4 sm:$0xff]   ;;  %v2419_v31 = vld [vmem:[#allocation8 + $0x64] ss:$12 sps:$4 sm:$0xff]  }
  0x73   :  { %115 = vadd.xlane.f32.xlu0 %v108_v2  ;;  %119 = vadd.xlane.f32.xlu1 %v110_v3  ;;  %v2417_v29 = vld [vmem:[#allocation8 + $0x38] ss:$12 sps:$4 sm:$0xff]   ;;  %v2418_v30 = vld [vmem:[#allocation8 + $0x48] ss:$12 sps:$4 sm:$0xff]   ;;  %v2421_v32 = vld [vmem:[#allocation8 + $0x50] ss:$12 sps:$4 sm:$0xff]  }
  0x74   :  { %2171 = vmatpush3.bf16.msra.mxu1 %v2409_v7  ;;  %v2422_v33 = vld [vmem:[#allocation8 + $0x60] ss:$12 sps:$4 sm:$0xff]   ;;  %v2423_v34 = vld [vmem:[#allocation8 + $0x7c] ss:$12 sps:$4 sm:$0xff]   ;;  %v2426_v36 = vld [vmem:[#allocation8 + $0x78] ss:$12 sps:$4 sm:$0xff]  }
  0x75   :  { %339 = vmatpush1.bf16.msra.mxu0 %v2410_v24  ;;  %2172 = vmatprep.subr.bf16.mxu1 %v2413_v26  ;;  %v2425_v35 = vld [vmem:[#allocation8 + $0x68] ss:$12 sps:$4 sm:$0xff]   ;;  %v2429_v38 = vld [vmem:[#allocation8 + $0x80] ss:$12 sps:$4 sm:$0xff]   ;;  %v2430_v40 = vld [vmem:[#allocation8 + $0x90] ss:$12 sps:$4 sm:$0xff]  }
  0x76   :  { %340 = vmatprep.subr.bf16.mxu0 %v2411_v25  ;;  %v2427_v37 = vld [vmem:[#allocation8 + $0x94] ss:$12 sps:$4 sm:$0xff]   ;;  %v2431_v41 = vld [vmem:[#allocation8 + $0xac] ss:$12 sps:$4 sm:$0xff]   ;;  %v2435_v44 = vld [vmem:[#allocation8 + $0xb0] ss:$12 sps:$4 sm:$0xff]  }
  0x77   :  { %v2433_v42 = vld [vmem:[#allocation8 + $0x98] ss:$12 sps:$4 sm:$0xff]   ;;  %v2434_v43 = vld [vmem:[#allocation8 + $0xa8] ss:$12 sps:$4 sm:$0xff]   ;;  %v2018_v59 = vld [vmem:[#allocation6] ss:$0 sm:$0xff] }
  0x78   :  { %2173 = vmatpush3.bf16.msra.mxu1 %v2413_v26  ;;  %v2046_v25 = vld [vmem:[#allocation6 + $0x4] ss:$0 sm:$0xff]  ;;  %s2771_s5 = smov 96   ;;  %s2772_s21 = smov 32   ;;  %vm967_vm3 = vcmask 523520   ;;  %vm1222_vm4 = vcmask 785920  }
  0x79   :  { %341 = vmatpush1.bf16.msra.mxu0 %v2414_v27  ;;  %2174 = vmatprep.subr.bf16.mxu1 %v2417_v29  ;;  %vm1477_vm5 = vcmask 1048320  }
  0x7a   :  { %342 = vmatprep.subr.bf16.mxu0 %v2415_v28 }
  0x7c   :  { %2175 = vmatpush3.bf16.msra.mxu1 %v2417_v29 }
  0x7d   :  { %343 = vmatpush1.bf16.msra.mxu0 %v2418_v30  ;;  %2176 = vmatprep.subr.bf16.mxu1 %v2421_v32 }
  0x7e   :  { %344 = vmatprep.subr.bf16.mxu0 %v2419_v31 }
  0x80   :  { %2177 = vmatpush3.bf16.msra.mxu1 %v2421_v32 }
  0x81   :  { %345 = vmatpush1.bf16.msra.mxu0 %v2422_v33  ;;  %2178 = vmatprep.subr.bf16.mxu1 %v2425_v35 }
  0x82   :  { %346 = vmatprep.subr.bf16.mxu0 %v2423_v34 }
  0x84   :  { %2179 = vmatpush3.bf16.msra.mxu1 %v2425_v35 }
  0x85   :  { %347 = vmatpush1.bf16.msra.mxu0 %v2426_v36  ;;  %2180 = vmatprep.subr.bf16.mxu1 %v2429_v38 }
  0x86   :  { %348 = vmatprep.subr.bf16.mxu0 %v2427_v37 }
  0x88   :  { %2181 = vmatpush3.bf16.msra.mxu1 %v2429_v38 }
  0x89   :  { %349 = vmatpush1.bf16.msra.mxu0 %v2430_v40  ;;  %2182 = vmatprep.subr.bf16.mxu1 %v2433_v42 }
  0x8a   :  { %350 = vmatprep.subr.bf16.mxu0 %v2431_v41 }
  0x8c   :  { %2183 = vmatpush3.bf16.msra.mxu1 %v2433_v42 }
  0x8d   :  { %351 = vmatpush1.bf16.msra.mxu0 %v2434_v43  ;;  %2184 = vmatprep.subr.bf16.mxu1 %v2435_v44 }
  0x90   :  { %2185 = vmatpush3.bf16.msra.mxu1 %v2435_v44 }
  0xfc   :  { %v114_v8 = vpop.xlane.xlu0 %113  ;;  %v118_v9 = vpop.xlane.xlu1 %117 }
  0xfd   :  { %v122_v10 = vmul.f32 0.0078125, %v114_v8  ;;  %v124_v11 = vmul.f32 0.0078125, %v118_v9 }
  0xff   :  { %v2917_v12 = vsub.f32 %v107_v0, %v122_v10  ;;  %v2919_v13 = vsub.f32 %v109_v1, %v124_v11  ;;  %v2019_v0 = vld [vmem:[#allocation6 + $0x1] ss:$0 sm:$0xff] }
 0x100   :  { %v116_v14 = vpop.xlane.xlu0 %115  ;;  %v120_v15 = vpop.xlane.xlu1 %119 }
 0x101   :  { %v123_v16 = vmul.f32 0.0078125, %v116_v14  ;;  %v130_v17 = vmul.f32 %v2917_v12, %v2917_v12  ;;  %v125_v18 = vmul.f32 0.0078125, %v120_v15  ;;  %v132_v21 = vmul.f32 %v2919_v13, %v2919_v13 }
 0x102   :  { %v2769_v14 = vmov 0.0  }
 0x103   :  { %v2923_v19 = vsub.f32 %v108_v2, %v123_v16  ;;  %134 = vadd.xlane.f32.xlu0 %v130_v17  ;;  %v2925_v20 = vsub.f32 %v110_v3, %v125_v18  ;;  %2190 = vmatprep.subr.bf16.mxu0 %v2769_v14  ;;  %v2045_v18 = vld [vmem:[#allocation6 + $0x3] ss:$0 sm:$0xff] }
 0x104   :  { %2202 = vmatprep.subr.bf16.mxu1 %v2769_v14 }
 0x105   :  { %v131_v22 = vmul.f32 %v2923_v19, %v2923_v19  ;;  %v133_v23 = vmul.f32 %v2925_v20, %v2925_v20 }
 0x107   :  { %138 = vadd.xlane.f32.xlu0 %v132_v21  ;;  %136 = vadd.xlane.f32.xlu1 %v131_v22 }
 0x10b   :  { %140 = vadd.xlane.f32.xlu1 %v133_v23 }
 0x190   :  { %v135_v45 = vpop.xlane.xlu0 %134 }
 0x191   :  { %v142_v46 = vmul.f32 0.0078125, %v135_v45 }
 0x193   :  { %v146_v47 = vadd.f32 1e-05, %v142_v46 }
 0x194   :  { %v137_v48 = vpop.xlane.xlu1 %136  ;;  %v139_v49 = vpop.xlane.xlu0 %138 }
 0x195   :  { %2444 = vrsqrt.f32 %v146_v47  ;;  %v143_v50 = vmul.f32 0.0078125, %v137_v48  ;;  %v144_v51 = vmul.f32 0.0078125, %v139_v49 }
 0x197   :  { %v147_v52 = vadd.f32 1e-05, %v143_v50  ;;  %v148_v53 = vadd.f32 1e-05, %v144_v51 }
 0x198   :  { %v141_v54 = vpop.xlane.xlu1 %140 }
 0x199   :  { %2446 = vrsqrt.f32 %v147_v52  ;;  %v145_v55 = vmul.f32 0.0078125, %v141_v54 }
 0x19a   :  { %2448 = vrsqrt.f32 %v148_v53 }
 0x19b   :  { %v149_v56 = vadd.f32 1e-05, %v145_v55 }
 0x19d   :  { %2450 = vrsqrt.f32 %v149_v56 }
 0x19f   :  { %v2445_v57 = vpop.eup %2444 }
 0x1a0   :  { %v154_v58 = vmul.f32 %v2445_v57, %v2917_v12 }
 0x1a2   :  { %v162_v63 = vmul.f32 %v2018_v59, %v154_v58 }
 0x1a3   :  { %v2447_v60 = vpop.eup %2446 }
 0x1a4   :  { %v2449_v61 = vpop.eup %2448  ;;  %v155_v62 = vmul.f32 %v2447_v60, %v2923_v19  ;;  %v170_v4 = vadd.f32 %v2019_v0, %v162_v63 }
 0x1a5   :  { %v156_v1 = vmul.f32 %v2449_v61, %v2919_v13  ;;  %v2044_v13 = vld [vmem:[#allocation6 + $0x2] ss:$0 sm:$0xff] }
 0x1a6   :  { %v163_v2 = vmul.f32 %v2018_v59, %v155_v62 }
 0x1a7   :  { %v2451_v3 = vpop.eup %2450  ;;  %v164_v7 = vmul.f32 %v2018_v59, %v156_v1 }
 0x1a8   :  { %v171_v5 = vadd.f32 %v2019_v0, %v163_v2  ;;  %v157_v6 = vmul.f32 %v2451_v3, %v2925_v20 }
 0x1a9   :  { %v172_v10 = vadd.f32 %v2019_v0, %v164_v7 }
 0x1aa   :  { %v174_v8 = vpack.c.bf16 %v171_v5, %v170_v4  ;;  %v165_v9 = vmul.f32 %v2018_v59, %v157_v6 }
 0x1ac   :  { %369 = vmatmul.mubr.bf16.vlgmr.msra.gmra.mrb[0].mxu0 %v174_v8  ;;  %2186 = vmatprep.mubr.bf16.mxu1 %v174_v8  ;;  %v173_v11 = vadd.f32 %v2019_v0, %v165_v9 }
 0x1ad   :  { %378 = vmatprep.mubr.bf16.mxu0 %v2768_v39 }
 0x1ae   :  { %v175_v12 = vpack.c.bf16 %v173_v11, %v172_v10 }
 0x1b0   :  { %2187 = vmatmul.mubr.bf16.vlgmr.msra.gmra.mrb[0].mxu1 %v175_v12 }
 0x1b1   :  { %2204 = vmatprep.mubr.msk.bf16.mxu1 %vm2770_vm0, %v2769_v14 }
 0x1b4   :  { %379 = vmatmul.mubr.bf16.gmra.mrb[4].mxu0 %v175_v12 }
 0x1b5   :  { %2192 = vmatprep.mubr.msk.bf16.mxu0 %vm2770_vm0, %v2769_v14 }
 0x27f   :  { %v370_v15 = vpop.f32.mrb[0].mxu0 }
 0x280   :  { %v443_v16 = vadd.f32 %v2044_v13, %v370_v15  ;;  %v372_v17 = vpop.f32.mrb[1].mxu0 }
 0x281   :  { %v374_v19 = vpop.f32.mrb[2].mxu0  ;;  %v452_v22 = vadd.f32 %v2045_v18, %v372_v17 }
 0x282   :  { %v444_v20 = vadd.f32 %v2044_v13, %v374_v19  ;;  %v376_v21 = vpop.f32.mrb[3].mxu0  ;;  %v465_v26 = vmul.f32 0.17677669, %v443_v16 }
 0x283   :  { %v453_v23 = vadd.f32 %v2045_v18, %v376_v21  ;;  %v2188_v24 = vpop.f32.mrb[0].mxu1 }
 0x284   :  { %v466_v27 = vmul.f32 0.17677669, %v444_v20  ;;  %v423_v28 = vpop.f32.mrb[1].mxu1  ;;  %v463_v32 = vadd.f32 %v2188_v24, %v2046_v25 }
 0x285   :  { %v2943_v29 = vpack.c.bf16 %v453_v23, %v452_v22  ;;  %v2189_v30 = vpop.f32.mrb[2].mxu1  ;;  %v461_v35 = vadd.f32 %v2046_v25, %v423_v28 }
 0x286   :  { %v2945_v31 = vpack.c.bf16 %v466_v27, %v465_v26  ;;  %v464_v33 = vadd.f32 %v2189_v30, %v2046_v25  ;;  %v426_v34 = vpop.f32.mrb[3].mxu1 }
 0x287   :  { %v462_v36 = vadd.f32 %v2046_v25, %v426_v34  ;;  %v380_v37 = vpop.f32.mrb[4].mxu0  ;;  %v480_v38 = vsel %vm475_vm1, %v2943_v29, 0 }
 0x288   :  { %v2949_v39 = vpack.c.bf16 %v464_v33, %v463_v32  ;;  %v445_v40 = vadd.f32 %v2044_v13, %v380_v37  ;;  %v382_v41 = vpop.f32.mrb[5].mxu0  ;;  %2191 = vmatpush3.bf16.xpose.msra.mxu0 %v480_v38 }
 0x289   :  { %v2951_v42 = vpack.c.bf16 %v462_v36, %v461_v35  ;;  %v384_v43 = vpop.f32.mrb[6].mxu0  ;;  %2196 = vmatprep.subr.bf16.mxu0 %v2769_v14  ;;  %v454_v46 = vadd.f32 %v2045_v18, %v382_v41 }
 0x28a   :  { %v446_v44 = vadd.f32 %v2044_v13, %v384_v43  ;;  %v386_v45 = vpop.f32.mrb[7].mxu0  ;;  %v467_v48 = vmul.f32 0.17677669, %v445_v40 }
 0x28b   :  { %v455_v47 = vadd.f32 %v2045_v18, %v386_v45  ;;  %2203 = vmatpush3.bf16.msra.mxu1 %v2951_v42 }
 0x28c   :  { %v468_v49 = vmul.f32 0.17677669, %v446_v44  ;;  %2214 = vmatprep.subr.bf16.mxu1 %v2769_v14 }
 0x28d   :  { %v2956_v50 = vpack.c.bf16 %v455_v47, %v454_v46 }
 0x28e   :  { %v2958_v51 = vpack.c.bf16 %v468_v49, %v467_v48 }
 0x28f   :  { %2193 = vmatmul.mubr.msk.bf16.vlgmr.msra.gmra.mrb[8].mxu0 %vm475_vm1, %v2945_v31  ;;  %v527_v52 = vsel %vm475_vm1, %v2956_v50, 0 }
 0x290   :  { %2197 = vmatpush3.bf16.xpose.msra.mxu0 %v527_v52  ;;  %2198 = vmatprep.mubr.msk.bf16.mxu0 %vm2770_vm0, %v2769_v14 }
 0x291   :  { %2208 = vmatprep.subr.bf16.mxu0 %v2769_v14 }
 0x297   :  { %2199 = vmatmul.mubr.msk.bf16.vlgmr.msra.gmra.mrb[12].mxu0 %vm475_vm1, %v2958_v51 }
 0x298   :  { %2209 = vmatpush3.bf16.msra.mxu0 %v2949_v39  ;;  %2210 = vmatprep.mubr.msk.bf16.mxu0 %vm2770_vm0, %v2769_v14 }
 0x299   :  { %2220 = vmatprep.subr.bf16.mxu0 %v2769_v14 }
 0x362   :  { %v516_v53 = vpop.f32.mrb[8].mxu0 }
 0x363   :  { %v2194_v54 = vpop.f32.mrb[9].mxu0  ;;  %v571_v55 = vsel %vm570_vm2, %v516_v53, -inf }
 0x364   :  { %572 = vmax.xlane.f32.xlu0 %v571_v55  ;;  %v519_v56 = vpop.f32.mrb[10].mxu0 }
 0x365   :  { %v2195_v57 = vpop.f32.mrb[11].mxu0  ;;  %v574_v58 = vsel %vm570_vm2, %v519_v56, -inf }
 0x366   :  { %575 = vmax.xlane.f32.xlu1 %v574_v58 }
 0x36a   :  { %v563_v59 = vpop.f32.mrb[12].mxu0 }
 0x36b   :  { %v2200_v60 = vpop.f32.mrb[13].mxu0  ;;  %v577_v61 = vsel %vm570_vm2, %v563_v59, -inf }
 0x36c   :  { %578 = vmax.xlane.f32.xlu0 %v577_v61  ;;  %v566_v62 = vpop.f32.mrb[14].mxu0 }
 0x36d   :  { %v2201_v63 = vpop.f32.mrb[15].mxu0  ;;  %v580_v0 = vsel %vm570_vm2, %v566_v62, -inf }
 0x36e   :  { %581 = vmax.xlane.f32.xlu1 %v580_v0 }
 0x3f1   :  { %v573_v1 = vpop.xlane.xlu0 %572 }
 0x3f2   :  { %v583_v2 = vsub.f32 %v516_v53, %v573_v1 }
 0x3f3   :  { %v576_v3 = vpop.xlane.xlu1 %575 }
 0x3f4   :  { %v587_v4 = vmul.f32 1.442695, %v583_v2  ;;  %v584_v5 = vsub.f32 %v519_v56, %v576_v3 }
 0x3f6   :  { %2452 = vpow2.f32 %v587_v4  ;;  %v589_v6 = vmul.f32 1.442695, %v584_v5 }
 0x3f8   :  { %2454 = vpow2.f32 %v589_v6 }
 0x3f9   :  { %v579_v7 = vpop.xlane.xlu0 %578 }
 0x3fa   :  { %v585_v8 = vsub.f32 %v563_v59, %v579_v7 }
 0x3fb   :  { %v582_v17 = vpop.xlane.xlu1 %581 }
 0x3fc   :  { %v591_v9 = vmul.f32 1.442695, %v585_v8  ;;  %v586_v18 = vsub.f32 %v566_v62, %v582_v17 }
 0x3fe   :  { %2456 = vpow2.f32 %v591_v9  ;;  %v593_v19 = vmul.f32 1.442695, %v586_v18 }
 0x400   :  { %v2453_v10 = vpop.eup %2452  ;;  %2458 = vpow2.f32 %v593_v19 }
 0x401   :  { %v595_v11 = vsel %vm570_vm2, %v2453_v10, 0.0 }
 0x402   :  { %v2455_v12 = vpop.eup %2454  ;;  %596 = vadd.xlane.f32.xlu0 %v595_v11 }
 0x403   :  { %v598_v13 = vsel %vm570_vm2, %v2455_v12, 0.0 }
 0x404   :  { %599 = vadd.xlane.f32.xlu1 %v598_v13 }
 0x408   :  { %v2457_v15 = vpop.eup %2456 }
 0x409   :  { %v601_v16 = vsel %vm570_vm2, %v2457_v15, 0.0 }
 0x40a   :  { %602 = vadd.xlane.f32.xlu0 %v601_v16  ;;  %v2459_v20 = vpop.eup %2458 }
 0x40b   :  { %v604_v21 = vsel %vm570_vm2, %v2459_v20, 0.0 }
 0x415   :  { %766 = vrot.lane.b32.xlu1 %v2956_v50, %s2771_s5 }
 0x420   :  { %713 = vrot.lane.b32.xlu0 %v2943_v29, %s2771_s5 }
 0x439   :  { %605 = vadd.xlane.f32.xlu1 %v604_v21 }
 0x44a   :  { %710 = vrot.lane.b32.xlu1 %v2945_v31, %s2771_s5 }
 0x44e   :  { %763 = vrot.lane.b32.xlu1 %v2958_v51, %s2771_s5 }
 0x48f   :  { %v597_v22 = vpop.xlane.xlu0 %596 }
 0x490   :  { %2460 = vrcp.f32 %v597_v22 }
 0x491   :  { %v600_v23 = vpop.xlane.xlu1 %599 }
 0x492   :  { %2462 = vrcp.f32 %v600_v23 }
 0x495   :  { %v767_v34 = vpop.permute.xlu1 %766 }
 0x496   :  { %v772_v44 = vsel %vm475_vm1, %v767_v34, 0 }
 0x497   :  { %v603_v24 = vpop.xlane.xlu0 %602 }
 0x498   :  { %2464 = vrcp.f32 %v603_v24 }
 0x49a   :  { %v2461_v25 = vpop.eup %2460 }
 0x49b   :  { %v608_v27 = vmul.f32 %v2461_v25, %v2453_v10  ;;  %v714_v30 = vpop.permute.xlu0 %713 }
 0x49c   :  { %v2463_v26 = vpop.eup %2462  ;;  %v719_v33 = vsel %vm475_vm1, %v714_v30, 0 }
 0x49d   :  { %v610_v28 = vmul.f32 %v2463_v26, %v2455_v12 }
 0x49f   :  { %v615_v32 = vpack.c.bf16 %v610_v28, %v608_v27 }
 0x4a1   :  { %2205 = vmatmul.mubr.msk.bf16.vlgmr.msra.gmra.mrb[4].mxu1 %vm570_vm2, %v615_v32 }
 0x4a2   :  { %2215 = vmatpush3.bf16.xpose.msra.mxu1 %v719_v33  ;;  %2216 = vmatprep.mubr.msk.bf16.mxu1 %vm2770_vm0, %v2769_v14  ;;  %v2465_v37 = vpop.eup %2464 }
 0x4a3   :  { %2226 = vmatprep.subr.bf16.mxu1 %v2769_v14  ;;  %v612_v40 = vmul.f32 %v2465_v37, %v2457_v15 }
 0x4c6   :  { %v606_v35 = vpop.xlane.xlu1 %605 }
 0x4c7   :  { %2466 = vrcp.f32 %v606_v35 }
 0x4ca   :  { %v711_v36 = vpop.permute.xlu1 %710 }
 0x4cb   :  { %2217 = vmatmul.mubr.msk.bf16.vlgmr.msra.gmra.mrb[8].mxu1 %vm475_vm1, %v711_v36 }
 0x4cc   :  { %2228 = vmatprep.mubr.msk.bf16.mxu1 %vm2770_vm0, %v2769_v14 }
 0x4ce   :  { %v764_v45 = vpop.permute.xlu1 %763 }
 0x4d1   :  { %v2467_v38 = vpop.eup %2466 }
 0x4d2   :  { %v614_v41 = vmul.f32 %v2467_v38, %v2459_v20 }
 0x4d4   :  { %v616_v43 = vpack.c.bf16 %v614_v41, %v612_v40 }
 0x4d6   :  { %2211 = vmatmul.mubr.msk.bf16.vlgmr.msra.gmra.mrb[16].mxu0 %vm570_vm2, %v616_v43 }
 0x4d7   :  { %2221 = vmatpush3.bf16.xpose.msra.mxu0 %v772_v44  ;;  %2222 = vmatprep.mubr.msk.bf16.mxu0 %vm2770_vm0, %v2769_v14 }
 0x4d8   :  { %2232 = vmatprep.subr.bf16.mxu0 %v2769_v14 }
 0x4de   :  { %2223 = vmatmul.mubr.msk.bf16.vlgmr.msra.gmra.mrb[20].mxu0 %vm475_vm1, %v764_v45 }
 0x4df   :  { %2234 = vmatprep.mubr.msk.bf16.mxu0 %vm2770_vm0, %v2769_v14 }
 0x574   :  { %v654_v46 = vpop.f32.mrb[4].mxu1 }
 0x575   :  { %v2206_v47 = vpop.f32.mrb[5].mxu1 }
 0x576   :  { %v657_v48 = vpop.f32.mrb[6].mxu1 }
 0x577   :  { %v705_v49 = vpack.c.bf16 %v657_v48, %v654_v46  ;;  %v2207_v52 = vpop.f32.mrb[7].mxu1 }
 0x579   :  { %707 = vst.msk [vmem:[#allocation2] sm:$0xff] %vm475_vm1, %v705_v49 }
 0x59e   :  { %v755_v53 = vpop.f32.mrb[8].mxu1 }
 0x59f   :  { %v2218_v54 = vpop.f32.mrb[9].mxu1  ;;  %v815_v55 = vsel %vm570_vm2, %v755_v53, -inf }
 0x5a0   :  { %816 = vmax.xlane.f32.xlu0 %v815_v55  ;;  %v758_v56 = vpop.f32.mrb[10].mxu1 }
 0x5a1   :  { %v2219_v57 = vpop.f32.mrb[11].mxu1  ;;  %v818_v58 = vsel %vm570_vm2, %v758_v56, -inf }
 0x5a2   :  { %819 = vmax.xlane.f32.xlu1 %v818_v58 }
 0x5a9   :  { %v698_v59 = vpop.f32.mrb[16].mxu0 }
 0x5aa   :  { %v2212_v60 = vpop.f32.mrb[17].mxu0 }
 0x5ab   :  { %v701_v61 = vpop.f32.mrb[18].mxu0 }
 0x5ac   :  { %v706_v62 = vpack.c.bf16 %v701_v61, %v698_v59  ;;  %v2213_v63 = vpop.f32.mrb[19].mxu0 }
 0x5ae   :  { %708 = vst.msk [vmem:[#allocation2 + $0x8] sm:$0xff] %vm475_vm1, %v706_v62 }
 0x5b1   :  { %v808_v0 = vpop.f32.mrb[20].mxu0 }
 0x5b2   :  { %v2224_v1 = vpop.f32.mrb[21].mxu0  ;;  %v821_v2 = vsel %vm570_vm2, %v808_v0, -inf }
 0x5b3   :  { %822 = vmax.xlane.f32.xlu0 %v821_v2  ;;  %v811_v3 = vpop.f32.mrb[22].mxu0 }
 0x5b4   :  { %v2225_v4 = vpop.f32.mrb[23].mxu0  ;;  %v824_v5 = vsel %vm570_vm2, %v811_v3, -inf }
 0x5b7   :  { %825 = vmax.xlane.f32.xlu0 %v824_v5 }
 0x62d   :  { %v817_v6 = vpop.xlane.xlu0 %816 }
 0x62e   :  { %v827_v7 = vsub.f32 %v755_v53, %v817_v6 }
 0x62f   :  { %v820_v8 = vpop.xlane.xlu1 %819 }
 0x630   :  { %v831_v9 = vmul.f32 1.442695, %v827_v7  ;;  %v828_v10 = vsub.f32 %v758_v56, %v820_v8 }
 0x632   :  { %2468 = vpow2.f32 %v831_v9  ;;  %v833_v11 = vmul.f32 1.442695, %v828_v10 }
 0x634   :  { %2470 = vpow2.f32 %v833_v11 }
 0x63c   :  { %v2469_v12 = vpop.eup %2468 }
 0x63d   :  { %v839_v13 = vsel %vm570_vm2, %v2469_v12, 0.0 }
 0x63e   :  { %v2471_v15 = vpop.eup %2470  ;;  %840 = vadd.xlane.f32.xlu0 %v839_v13 }
 0x63f   :  { %v842_v16 = vsel %vm570_vm2, %v2471_v15, 0.0 }
 0x640   :  { %843 = vadd.xlane.f32.xlu1 %v842_v16  ;;  %v823_v17 = vpop.xlane.xlu0 %822 }
 0x641   :  { %v829_v18 = vsub.f32 %v808_v0, %v823_v17 }
 0x643   :  { %v835_v19 = vmul.f32 1.442695, %v829_v18 }
 0x644   :  { %v826_v22 = vpop.xlane.xlu0 %825 }
 0x645   :  { %2472 = vpow2.f32 %v835_v19  ;;  %v830_v23 = vsub.f32 %v811_v3, %v826_v22 }
 0x647   :  { %v837_v24 = vmul.f32 1.442695, %v830_v23 }
 0x649   :  { %2474 = vpow2.f32 %v837_v24 }
 0x64f   :  { %v2473_v20 = vpop.eup %2472 }
 0x650   :  { %v845_v21 = vsel %vm570_vm2, %v2473_v20, 0.0 }
 0x651   :  { %910 = vrot.lane.b32.xlu1 %v2949_v39, %s2771_s5  ;;  %846 = vadd.xlane.f32.xlu0 %v845_v21 }
 0x653   :  { %v2475_v25 = vpop.eup %2474 }
 0x654   :  { %v848_v26 = vsel %vm570_vm2, %v2475_v25, 0.0 }
 0x655   :  { %972 = vrot.lane.b32.xlu1 %v2943_v29, %s2760_s1 }
 0x667   :  { %862 = vrot.lane.b32.xlu0 %v2951_v42, %s2771_s5 }
 0x66b   :  { %970 = vrot.lane.b32.xlu0 %v2945_v31, %s2760_s1 }
 0x679   :  { %849 = vadd.xlane.f32.xlu1 %v848_v26 }
 0x68a   :  { %1023 = vrot.lane.b32.xlu1 %v2956_v50, %s2760_s1 }
 0x68e   :  { %1021 = vrot.lane.b32.xlu1 %v2958_v51, %s2760_s1 }
 0x6cb   :  { %v841_v30 = vpop.xlane.xlu0 %840 }
 0x6cd   :  { %v844_v27 = vpop.xlane.xlu1 %843 }
 0x6ce   :  { %2476 = vrcp.f32 %v844_v27 }
 0x6cf   :  { %2478 = vrcp.f32 %v841_v30 }
 0x6d1   :  { %v911_v28 = vpop.permute.xlu1 %910 }
 0x6d2   :  { %2233 = vmatpush3.bf16.msra.mxu0 %v911_v28 }
 0x6d3   :  { %2244 = vmatprep.subr.bf16.mxu0 %v2769_v14 }
 0x6d5   :  { %v973_v40 = vpop.permute.xlu1 %972 }
 0x6d6   :  { %v978_v41 = vsel %vm475_vm1, %v973_v40, 0 }
 0x6d8   :  { %v2477_v32 = vpop.eup %2476 }
 0x6d9   :  { %v2479_v34 = vpop.eup %2478  ;;  %v854_v35 = vmul.f32 %v2477_v32, %v2471_v15 }
 0x6da   :  { %v852_v36 = vmul.f32 %v2479_v34, %v2469_v12 }
 0x6dc   :  { %v859_v38 = vpack.c.bf16 %v854_v35, %v852_v36 }
 0x6de   :  { %v847_v33 = vpop.xlane.xlu0 %846 }
 0x6df   :  { %2480 = vrcp.f32 %v847_v33 }
 0x6e2   :  { %v863_v37 = vpop.permute.xlu0 %862 }
 0x6e3   :  { %2227 = vmatpush3.bf16.msra.mxu1 %v863_v37 }
 0x6e4   :  { %2238 = vmatprep.subr.bf16.mxu1 %v2769_v14 }
 0x6e6   :  { %2229 = vmatmul.mubr.msk.bf16.vlgmr.msra.gmra.mrb[12].mxu1 %vm570_vm2, %v859_v38  ;;  %v971_v43 = vpop.permute.xlu0 %970 }
 0x6e7   :  { %2240 = vmatprep.mubr.msk.bf16.mxu1 %vm2770_vm0, %v2769_v14 }
 0x6e9   :  { %v2481_v45 = vpop.eup %2480 }
 0x6ea   :  { %v856_v47 = vmul.f32 %v2481_v45, %v2473_v20 }
 0x6ec   :  { %2239 = vmatpush3.bf16.xpose.msra.mxu1 %v978_v41 }
 0x6ed   :  { %2250 = vmatprep.subr.bf16.mxu1 %v2769_v14 }
 0x6f3   :  { %2241 = vmatmul.mubr.msk.bf16.vlgmr.msra.gmra.mrb[16].mxu1 %vm475_vm1, %v971_v43 }
 0x6f4   :  { %2252 = vmatprep.mubr.msk.bf16.mxu1 %vm2770_vm0, %v2769_v14 }
 0x706   :  { %v850_v44 = vpop.xlane.xlu1 %849 }
 0x707   :  { %2482 = vrcp.f32 %v850_v44 }
 0x70a   :  { %v1024_v49 = vpop.permute.xlu1 %1023 }
 0x70b   :  { %v1029_v53 = vsel %vm475_vm1, %v1024_v49, 0 }
 0x70e   :  { %v1022_v54 = vpop.permute.xlu1 %1021 }
 0x711   :  { %v2483_v46 = vpop.eup %2482 }
 0x712   :  { %v858_v48 = vmul.f32 %v2483_v46, %v2475_v25 }
 0x714   :  { %v860_v52 = vpack.c.bf16 %v858_v48, %v856_v47 }
 0x716   :  { %2235 = vmatmul.mubr.msk.bf16.vlgmr.msra.gmra.mrb[24].mxu0 %vm570_vm2, %v860_v52 }
 0x717   :  { %2245 = vmatpush3.bf16.xpose.msra.mxu0 %v1029_v53  ;;  %2246 = vmatprep.mubr.msk.bf16.mxu0 %vm2770_vm0, %v2769_v14 }
 0x718   :  { %2256 = vmatprep.subr.bf16.mxu0 %v2769_v14 }
 0x71e   :  { %2247 = vmatmul.mubr.msk.bf16.vlgmr.msra.gmra.mrb[28].mxu0 %vm475_vm1, %v1022_v54 }
 0x71f   :  { %2258 = vmatprep.mubr.msk.bf16.mxu0 %vm2770_vm0, %v2769_v14 }
 0x7b9   :  { %v3045_v55 = vpop.f32.mrb[12].mxu1 }
 0x7ba   :  { %v2230_v56 = vpop.f32.mrb[13].mxu1 }
 0x7bb   :  { %v3047_v57 = vpop.f32.mrb[14].mxu1 }
 0x7bc   :  { %v957_v58 = vpack.c.bf16 %v3047_v57, %v3045_v55  ;;  %v2231_v59 = vpop.f32.mrb[15].mxu1 }
 0x7c6   :  { %v1014_v60 = vpop.f32.mrb[16].mxu1 }
 0x7c7   :  { %v2242_v61 = vpop.f32.mrb[17].mxu1  ;;  %v1072_v62 = vsel %vm570_vm2, %v1014_v60, -inf }
 0x7c8   :  { %1073 = vmax.xlane.f32.xlu0 %v1072_v62  ;;  %v1017_v63 = vpop.f32.mrb[18].mxu1 }
 0x7c9   :  { %v2243_v0 = vpop.f32.mrb[19].mxu1  ;;  %v1075_v1 = vsel %vm570_vm2, %v1017_v63, -inf }
 0x7ca   :  { %1076 = vmax.xlane.f32.xlu1 %v1075_v1 }
 0x7e9   :  { %v3053_v2 = vpop.f32.mrb[24].mxu0 }
 0x7ea   :  { %v2236_v3 = vpop.f32.mrb[25].mxu0 }
 0x7eb   :  { %v3055_v4 = vpop.f32.mrb[26].mxu0 }
 0x7ec   :  { %v958_v5 = vpack.c.bf16 %v3055_v4, %v3053_v2  ;;  %v2237_v6 = vpop.f32.mrb[27].mxu0 }
 0x7f1   :  { %v1065_v7 = vpop.f32.mrb[28].mxu0 }
 0x7f2   :  { %v2248_v8 = vpop.f32.mrb[29].mxu0  ;;  %v1078_v9 = vsel %vm570_vm2, %v1065_v7, -inf }
 0x7f3   :  { %1079 = vmax.xlane.f32.xlu0 %v1078_v9  ;;  %v1068_v10 = vpop.f32.mrb[30].mxu0 }
 0x7f4   :  { %v2249_v11 = vpop.f32.mrb[31].mxu0  ;;  %v1081_v12 = vsel %vm570_vm2, %v1068_v10, -inf }
 0x7f7   :  { %1082 = vmax.xlane.f32.xlu0 %v1081_v12 }
 0x855   :  { %v1074_v13 = vpop.xlane.xlu0 %1073 }
 0x856   :  { %v1084_v15 = vsub.f32 %v1014_v60, %v1074_v13 }
 0x857   :  { %v1077_v16 = vpop.xlane.xlu1 %1076 }
 0x858   :  { %v1088_v17 = vmul.f32 1.442695, %v1084_v15  ;;  %v1085_v18 = vsub.f32 %v1017_v63, %v1077_v16 }
 0x85a   :  { %2484 = vpow2.f32 %v1088_v17  ;;  %v1090_v19 = vmul.f32 1.442695, %v1085_v18 }
 0x85c   :  { %2486 = vpow2.f32 %v1090_v19 }
 0x864   :  { %v2485_v20 = vpop.eup %2484 }
 0x865   :  { %v1096_v21 = vsel %vm570_vm2, %v2485_v20, 0.0 }
 0x866   :  { %v2487_v22 = vpop.eup %2486  ;;  %1097 = vadd.xlane.f32.xlu0 %v1096_v21 }
 0x867   :  { %v1099_v23 = vsel %vm570_vm2, %v2487_v22, 0.0 }
 0x868   :  { %1100 = vadd.xlane.f32.xlu1 %v1099_v23 }
 0x879   :  { %1165 = vrot.lane.b32.xlu1 %v2949_v39, %s2760_s1 }
 0x87d   :  { %1227 = vrot.lane.b32.xlu1 %v2943_v29, %s2772_s21 }
 0x880   :  { %v1080_v24 = vpop.xlane.xlu0 %1079 }
 0x881   :  { %v1086_v25 = vsub.f32 %v1065_v7, %v1080_v24 }
 0x883   :  { %v1092_v26 = vmul.f32 1.442695, %v1086_v25 }
 0x884   :  { %v1083_v27 = vpop.xlane.xlu0 %1082 }
 0x885   :  { %2488 = vpow2.f32 %v1092_v26  ;;  %v1087_v28 = vsub.f32 %v1068_v10, %v1083_v27 }
 0x887   :  { %v1094_v32 = vmul.f32 1.442695, %v1087_v28 }
 0x889   :  { %2490 = vpow2.f32 %v1094_v32 }
 0x88f   :  { %v2489_v30 = vpop.eup %2488 }
 0x890   :  { %v1102_v33 = vsel %vm570_vm2, %v2489_v30, 0.0 }
 0x891   :  { %1103 = vadd.xlane.f32.xlu0 %v1102_v33 }
 0x893   :  { %v2491_v34 = vpop.eup %2490 }
 0x894   :  { %v1105_v35 = vsel %vm570_vm2, %v2491_v34, 0.0 }
 0x8a1   :  { %1106 = vadd.xlane.f32.xlu1 %v1105_v35 }
 0x8a7   :  { %1118 = vrot.lane.b32.xlu0 %v2951_v42, %s2760_s1 }
 0x8ab   :  { %1225 = vrot.lane.b32.xlu0 %v2945_v31, %s2772_s21 }
 0x8b2   :  { %1278 = vrot.lane.b32.xlu1 %v2956_v50, %s2772_s21 }
 0x8b6   :  { %1276 = vrot.lane.b32.xlu1 %v2958_v51, %s2772_s21 }
 0x8f3   :  { %v1098_v37 = vpop.xlane.xlu0 %1097 }
 0x8f5   :  { %v1101_v29 = vpop.xlane.xlu1 %1100 }
 0x8f6   :  { %2492 = vrcp.f32 %v1101_v29 }
 0x8f7   :  { %2494 = vrcp.f32 %v1098_v37 }
 0x8f9   :  { %v1166_v36 = vpop.permute.xlu1 %1165 }
 0x8fa   :  { %2257 = vmatpush3.bf16.msra.mxu0 %v1166_v36 }
 0x8fb   :  { %2268 = vmatprep.subr.bf16.mxu0 %v2769_v14 }
 0x8fd   :  { %v1228_v50 = vpop.permute.xlu1 %1227 }
 0x8fe   :  { %v1233_v51 = vsel %vm475_vm1, %v1228_v50, 0 }
 0x900   :  { %v2493_v38 = vpop.eup %2492 }
 0x901   :  { %v2495_v41 = vpop.eup %2494  ;;  %v1111_v43 = vmul.f32 %v2493_v38, %v2487_v22 }
 0x902   :  { %v1109_v44 = vmul.f32 %v2495_v41, %v2485_v20 }
 0x904   :  { %v1116_v45 = vpack.c.bf16 %v1111_v43, %v1109_v44 }
 0x91e   :  { %v1104_v40 = vpop.xlane.xlu0 %1103 }
 0x91f   :  { %2496 = vrcp.f32 %v1104_v40 }
 0x922   :  { %v1119_v31 = vpop.permute.xlu0 %1118 }
 0x923   :  { %2251 = vmatpush3.bf16.msra.mxu1 %v1119_v31 }
 0x924   :  { %2262 = vmatprep.subr.bf16.mxu1 %v2769_v14 }
 0x926   :  { %2253 = vmatmul.mubr.msk.bf16.vlgmr.msra.gmra.mrb[20].mxu1 %vm570_vm2, %v1116_v45  ;;  %v1226_v47 = vpop.permute.xlu0 %1225 }
 0x927   :  { %2264 = vmatprep.mubr.msk.bf16.mxu1 %vm2770_vm0, %v2769_v14 }
 0x929   :  { %v2497_v48 = vpop.eup %2496 }
 0x92a   :  { %v1113_v52 = vmul.f32 %v2497_v48, %v2489_v30 }
 0x92c   :  { %2263 = vmatpush3.bf16.xpose.msra.mxu1 %v1233_v51 }
 0x92d   :  { %2274 = vmatprep.subr.bf16.mxu1 %v2769_v14 }
 0x92e   :  { %v1107_v46 = vpop.xlane.xlu1 %1106 }
 0x92f   :  { %2498 = vrcp.f32 %v1107_v46 }
 0x932   :  { %v1279_v54 = vpop.permute.xlu1 %1278 }
 0x933   :  { %2265 = vmatmul.mubr.msk.bf16.vlgmr.msra.gmra.mrb[24].mxu1 %vm475_vm1, %v1226_v47  ;;  %v1284_v59 = vsel %vm475_vm1, %v1279_v54, 0 }
 0x934   :  { %2276 = vmatprep.mubr.msk.bf16.mxu1 %vm2770_vm0, %v2769_v14 }
 0x936   :  { %v1277_v60 = vpop.permute.xlu1 %1276 }
 0x939   :  { %v2499_v49 = vpop.eup %2498 }
 0x93a   :  { %v1115_v53 = vmul.f32 %v2499_v49, %v2491_v34 }
 0x93c   :  { %v1117_v56 = vpack.c.bf16 %v1115_v53, %v1113_v52 }
 0x93e   :  { %2259 = vmatmul.mubr.msk.bf16.vlgmr.msra.gmra.mrb[32].mxu0 %vm570_vm2, %v1117_v56 }
 0x93f   :  { %2269 = vmatpush3.bf16.xpose.msra.mxu0 %v1284_v59  ;;  %2270 = vmatprep.mubr.msk.bf16.mxu0 %vm2770_vm0, %v2769_v14  ;;  %v2436_v59 = vld [vmem:[#allocation9] sm:$0xff]  }
 0x940   :  { %2280 = vmatprep.subr.bf16.mxu0 %v2769_v14 }
 0x946   :  { %2271 = vmatmul.mubr.msk.bf16.vlgmr.msra.gmra.mrb[36].mxu0 %vm475_vm1, %v1277_v60  ;;  %v2437_v60 = vld [vmem:[#allocation9 + $0x8] sm:$0xff]  }
 0x947   :  { %2282 = vmatprep.mubr.msk.bf16.mxu0 %vm2770_vm0, %v2769_v14 }
 0x9f9   :  { %v1158_v61 = vpop.f32.mrb[20].mxu1 }
 0x9fa   :  { %v2254_v62 = vpop.f32.mrb[21].mxu1 }
 0x9fb   :  { %v1161_v63 = vpop.f32.mrb[22].mxu1  ;;  %v2439_v62 = vld [vmem:[#allocation9 + $0x18] sm:$0xff]  }
 0x9fc   :  { %v1212_v0 = vpack.c.bf16 %v1161_v63, %v1158_v61  ;;  %v2255_v1 = vpop.f32.mrb[23].mxu1  ;;  %v2438_v61 = vld [vmem:[#allocation9 + $0x10] sm:$0xff]   ;;  %v2440_v63 = vld [vmem:[#allocation9 + $0x20] sm:$0xff]  }
 0xa06   :  { %v1269_v3 = vpop.f32.mrb[24].mxu1 }
 0xa07   :  { %v2266_v6 = vpop.f32.mrb[25].mxu1  ;;  %v1327_v7 = vsel %vm570_vm2, %v1269_v3, -inf }
 0xa08   :  { %1328 = vmax.xlane.f32.xlu0 %v1327_v7  ;;  %v1272_v8 = vpop.f32.mrb[26].mxu1 }
 0xa09   :  { %v2267_v9 = vpop.f32.mrb[27].mxu1  ;;  %v1330_v10 = vsel %vm570_vm2, %v1272_v8, -inf }
 0xa0a   :  { %1331 = vmax.xlane.f32.xlu1 %v1330_v10  ;;  %v2442_v9 = vld [vmem:[#allocation9 + $0x30] sm:$0xff]   ;;  %v2443_v10 = vld [vmem:[#allocation9 + $0x38] sm:$0xff]  }
 0xa11   :  { %v1205_v11 = vpop.f32.mrb[32].mxu0 }
 0xa12   :  { %v2260_v12 = vpop.f32.mrb[33].mxu0 }
 0xa13   :  { %v1208_v13 = vpop.f32.mrb[34].mxu0 }
 0xa14   :  { %v1213_v15 = vpack.c.bf16 %v1208_v13, %v1205_v11  ;;  %v2261_v14 = vpop.f32.mrb[35].mxu0 }
 0xa19   :  { %v1320_v16 = vpop.f32.mrb[36].mxu0 }
 0xa1a   :  { %v2272_v17 = vpop.f32.mrb[37].mxu0  ;;  %v1333_v18 = vsel %vm570_vm2, %v1320_v16, -inf }
 0xa1b   :  { %1334 = vmax.xlane.f32.xlu0 %v1333_v18  ;;  %v1323_v19 = vpop.f32.mrb[38].mxu0 }
 0xa1c   :  { %v2273_v20 = vpop.f32.mrb[39].mxu0  ;;  %v1336_v21 = vsel %vm570_vm2, %v1323_v19, -inf }
 0xa1d   :  { %v2063_v20 = vld [vmem:[#allocation6 + $0x5] ss:$0 sm:$0xff] }
 0xa1f   :  { %1337 = vmax.xlane.f32.xlu0 %v1336_v21 }
 0xa95   :  { %v1329_v22 = vpop.xlane.xlu0 %1328 }
 0xa96   :  { %v1339_v23 = vsub.f32 %v1269_v3, %v1329_v22 }
 0xa97   :  { %v1332_v24 = vpop.xlane.xlu1 %1331 }
 0xa98   :  { %v1343_v25 = vmul.f32 1.442695, %v1339_v23  ;;  %v1340_v26 = vsub.f32 %v1272_v8, %v1332_v24 }
 0xa9a   :  { %2500 = vpow2.f32 %v1343_v25  ;;  %v1345_v27 = vmul.f32 1.442695, %v1340_v26 }
 0xa9c   :  { %2502 = vpow2.f32 %v1345_v27 }
 0xaa4   :  { %v2501_v28 = vpop.eup %2500 }
 0xaa5   :  { %v1351_v30 = vsel %vm570_vm2, %v2501_v28, 0.0 }
 0xaa6   :  { %v2503_v32 = vpop.eup %2502  ;;  %1352 = vadd.xlane.f32.xlu0 %v1351_v30 }
 0xaa7   :  { %v1354_v33 = vsel %vm570_vm2, %v2503_v32, 0.0 }
 0xaa8   :  { %1355 = vadd.xlane.f32.xlu1 %v1354_v33  ;;  %v1335_v34 = vpop.xlane.xlu0 %1334 }
 0xaa9   :  { %v1341_v35 = vsub.f32 %v1320_v16, %v1335_v34 }
 0xaab   :  { %v1347_v29 = vmul.f32 1.442695, %v1341_v35  ;;  %v2526_v35 = vld [vmem:[#allocation3 + $0x10] sm:$0xff] }
 0xaac   :  { %v1338_v36 = vpop.xlane.xlu0 %1337 }
 0xaad   :  { %2504 = vpow2.f32 %v1347_v29  ;;  %v1342_v37 = vsub.f32 %v1323_v19, %v1338_v36  ;;  %v2527_v36 = vld [vmem:[#allocation3 + $0x18] sm:$0xff] }
 0xaaf   :  { %v1349_v38 = vmul.f32 1.442695, %v1342_v37 }
 0xab1   :  { %2506 = vpow2.f32 %v1349_v38 }
 0xab7   :  { %v2505_v40 = vpop.eup %2504 }
 0xab8   :  { %v1357_v41 = vsel %vm570_vm2, %v2505_v40, 0.0 }
 0xab9   :  { %1358 = vadd.xlane.f32.xlu0 %v1357_v41 }
 0xabb   :  { %v2507_v43 = vpop.eup %2506 }
 0xabc   :  { %v1360_v44 = vsel %vm570_vm2, %v2507_v43, 0.0 }
 0xabd   :  { %1361 = vadd.xlane.f32.xlu1 %v1360_v44 }
 0xace   :  { %1420 = vrot.lane.b32.xlu1 %v2949_v39, %s2772_s21 }
 0xacf   :  { %1373 = vrot.lane.b32.xlu0 %v2951_v42, %s2772_s21 }
 0xad2   :  { %961 = vrot.lane.b32.xlu1 %v957_v58, %s2772_s21 }
 0xad3   :  { %1216 = vrot.lane.b32.xlu0 %v1212_v0, %s2760_s1  ;;  %v2441_v0 = vld [vmem:[#allocation9 + $0x28] sm:$0xff]  }
 0xad6   :  { %963 = vrot.lane.b32.xlu1 %v958_v5, %s2772_s21 }
 0xada   :  { %1218 = vrot.lane.b32.xlu1 %v1213_v15, %s2760_s1  ;;  %s3157_s1 = smov 0  }
 0xb33   :  { %v1353_v45 = vpop.xlane.xlu0 %1352 }
 0xb35   :  { %v1356_v31 = vpop.xlane.xlu1 %1355 }
 0xb36   :  { %2508 = vrcp.f32 %v1356_v31 }
 0xb37   :  { %2510 = vrcp.f32 %v1353_v45 }
 0xb40   :  { %v2509_v39 = vpop.eup %2508 }
 0xb41   :  { %v2511_v50 = vpop.eup %2510  ;;  %v1366_v51 = vmul.f32 %v2509_v39, %v2503_v32  ;;  %v2525_v32 = vld [vmem:[#allocation3 + $0x8] sm:$0xff] }
 0xb42   :  { %v1364_v55 = vmul.f32 %v2511_v50, %v2501_v28  ;;  %v2524_v28 = vld [vmem:[#allocation3] sm:$0xff] }
 0xb44   :  { %v1371_v46 = vpack.c.bf16 %v1366_v51, %v1364_v55 }
 0xb46   :  { %v1359_v42 = vpop.xlane.xlu0 %1358 }
 0xb47   :  { %2512 = vrcp.f32 %v1359_v42 }
 0xb4a   :  { %v1362_v57 = vpop.xlane.xlu1 %1361  ;;  %v1374_v58 = vpop.permute.xlu0 %1373 }
 0xb4b   :  { %2514 = vrcp.f32 %v1362_v57  ;;  %2275 = vmatpush3.bf16.msra.mxu1 %v1374_v58 }
 0xb4c   :  { %2286 = vmatprep.subr.bf16.mxu1 %v2436_v59 }
 0xb4e   :  { %v1421_v47 = vpop.permute.xlu1 %1420  ;;  %2277 = vmatmul.mubr.msk.bf16.vlgmr.msra.gmra.mrb[28].mxu1 %vm570_vm2, %v1371_v46  ;;  %v1217_v5 = vpop.permute.xlu0 %1216 }
 0xb4f   :  { %2281 = vmatpush3.bf16.msra.mxu0 %v1421_v47  ;;  %2287 = vmatpush3.bf16.msra.mxu1 %v2436_v59 }
 0xb50   :  { %2288 = vmatprep.subr.bf16.mxu1 %v2437_v60 }
 0xb51   :  { %v2513_v4 = vpop.eup %2512 }
 0xb52   :  { %v962_v2 = vpop.permute.xlu1 %961  ;;  %v1368_v49 = vmul.f32 %v2513_v4, %v2505_v40 }
 0xb53   :  { %968 = vst.msk [vmem:[#allocation2] sm:$0xff] %vm967_vm3, %v962_v2  ;;  %2289 = vmatpush3.bf16.msra.mxu1 %v2437_v60 }
 0xb54   :  { %1223 = vst.msk [vmem:[#allocation2] sm:$0xff] %vm1222_vm4, %v1217_v5  ;;  %2290 = vmatprep.subr.bf16.mxu1 %v2438_v61 }
 0xb55   :  { %v2515_v48 = vpop.eup %2514 }
 0xb56   :  { %v1370_v52 = vmul.f32 %v2515_v48, %v2507_v43  ;;  %v964_v53 = vpop.permute.xlu1 %963 }
 0xb57   :  { %969 = vst.msk [vmem:[#allocation2 + $0x8] sm:$0xff] %vm967_vm3, %v964_v53  ;;  %2291 = vmatpush3.bf16.msra.mxu1 %v2438_v61 }
 0xb58   :  { %v1372_v54 = vpack.c.bf16 %v1370_v52, %v1368_v49  ;;  %2292 = vmatprep.subr.bf16.mxu1 %v2439_v62 }
 0xb5a   :  { %v1219_v56 = vpop.permute.xlu1 %1218  ;;  %2283 = vmatmul.mubr.msk.bf16.vlgmr.msra.gmra.mrb[40].mxu0 %vm570_vm2, %v1372_v54 }
 0xb5b   :  { %1224 = vst.msk [vmem:[#allocation2 + $0x8] sm:$0xff] %vm1222_vm4, %v1219_v56  ;;  %2293 = vmatpush3.bf16.msra.mxu1 %v2439_v62 }
 0xb5c   :  { %2294 = vmatprep.subr.bf16.mxu1 %v2440_v63 }
 0xb5f   :  { %2295 = vmatpush3.bf16.msra.mxu1 %v2440_v63  ;;  %v2072_v63 = vld [vmem:[#allocation6 + $0x6] ss:$0 sm:$0xff] }
 0xb60   :  { %2296 = vmatprep.subr.bf16.mxu1 %v2441_v0 }
 0xb63   :  { %2297 = vmatpush3.bf16.msra.mxu1 %v2441_v0 }
 0xb64   :  { %2298 = vmatprep.subr.bf16.mxu1 %v2442_v9 }
 0xb67   :  { %2299 = vmatpush3.bf16.msra.mxu1 %v2442_v9 }
 0xb68   :  { %2300 = vmatprep.subr.bf16.mxu1 %v2443_v10 }
 0xb6b   :  { %2301 = vmatpush3.bf16.msra.mxu1 %v2443_v10 }
 0xc21   :  { %v1413_v1 = vpop.f32.mrb[28].mxu1 }
 0xc22   :  { %v2278_v3 = vpop.f32.mrb[29].mxu1 }
 0xc23   :  { %v1416_v6 = vpop.f32.mrb[30].mxu1 }
 0xc24   :  { %v1467_v7 = vpack.c.bf16 %v1416_v6, %v1413_v1  ;;  %v2279_v8 = vpop.f32.mrb[31].mxu1 }
 0xc25   :  { %v2073_v8 = vld [vmem:[#allocation6 + $0x7] ss:$0 sm:$0xff] }
 0xc26   :  { %1471 = vrot.lane.b32.xlu0 %v1467_v7, %s2771_s5 }
 0xc2d   :  { %v1460_v11 = vpop.f32.mrb[40].mxu0 }
 0xc2e   :  { %v2284_v12 = vpop.f32.mrb[41].mxu0 }
 0xc2f   :  { %v1463_v13 = vpop.f32.mrb[42].mxu0 }
 0xc30   :  { %v1468_v15 = vpack.c.bf16 %v1463_v13, %v1460_v11  ;;  %v2285_v14 = vpop.f32.mrb[43].mxu0 }
 0xc32   :  { %1473 = vrot.lane.b32.xlu1 %v1468_v15, %s2771_s5 }
 0xc98   :  { %v1472_v16 = vpop.permute.xlu0 %1471 }
 0xc99   :  { %1478 = vst.msk [vmem:[#allocation2] sm:$0xff] %vm1477_vm5, %v1472_v16 }
 0xca0   :  { %v1480_v17 = vld [vmem:[#allocation2] sm:$0xff] }
 0xca1   :  { %2302 = vmatprep.mubr.bf16.mxu1 %v1480_v17 }
 0xca4   :  { %v1474_v18 = vpop.permute.xlu1 %1473 }
 0xca5   :  { %1479 = vst.msk [vmem:[#allocation2 + $0x8] sm:$0xff] %vm1477_vm5, %v1474_v18 }
 0xcac   :  { %v1481_v19 = vld [vmem:[#allocation2 + $0x8] sm:$0xff] }
 0xcad   :  { %2303 = vmatmul.mubr.bf16.vlgmr.msra.gmra.mrb[32].mxu1 %v1481_v19 }
 0xd80   :  { %v2304_v21 = vpop.f32.mrb[32].mxu1 }
 0xd81   :  { %v1585_v22 = vpop.f32.mrb[33].mxu1  ;;  %v1594_v26 = vadd.f32 %v2304_v21, %v2063_v20  ;;  %v3149_v21 = vmov 0.0  }
 0xd82   :  { %v1586_v23 = vadd.f32 %v2063_v20, %v1585_v22  ;;  %v2305_v24 = vpop.f32.mrb[34].mxu1  ;;  %v3151_v22 = vmov 0.0  }
 0xd83   :  { %v1588_v25 = vpop.f32.mrb[35].mxu1  ;;  %v1597_v34 = vadd.f32 %v2305_v24, %v2063_v20  ;;  %v3127_v29 = vadd.f32 %v2526_v35, %v1594_v26  ;;  %v3155_v24 = vmov 0.0  }
 0xd84   :  { %v1589_v27 = vadd.f32 %v2063_v20, %v1588_v25  ;;  %v3121_v30 = vadd.f32 %v2524_v28, %v1586_v23  ;;  %v3153_v23 = vmov 0.0  }
 0xd85   :  { %v3130_v37 = vadd.f32 %v2527_v36, %v1597_v34 }
 0xd86   :  { %1606 = vadd.xlane.f32.xlu0 %v3121_v30  ;;  %v3124_v33 = vadd.f32 %v2525_v32, %v1589_v27 }
 0xd88   :  { %1608 = vadd.xlane.f32.xlu1 %v3124_v33 }
 0xd8a   :  { %1610 = vadd.xlane.f32.xlu0 %v3127_v29 }
 0xd8e   :  { %1612 = vadd.xlane.f32.xlu0 %v3130_v37 }
 0xe13   :  { %v1607_v38 = vpop.xlane.xlu0 %1606 }
 0xe14   :  { %v1614_v40 = vmul.f32 0.0078125, %v1607_v38 }
 0xe15   :  { %v1609_v41 = vpop.xlane.xlu1 %1608 }
 0xe16   :  { %v1618_v43 = vsub.f32 %v3121_v30, %v1614_v40  ;;  %v1615_v44 = vmul.f32 0.0078125, %v1609_v41 }
 0xe17   :  { %v1611_v31 = vpop.xlane.xlu0 %1610 }
 0xe18   :  { %v1619_v45 = vsub.f32 %v3124_v33, %v1615_v44  ;;  %v1616_v39 = vmul.f32 0.0078125, %v1611_v31  ;;  %v1622_v42 = vmul.f32 %v1618_v43, %v1618_v43 }
 0xe1a   :  { %v1620_v50 = vsub.f32 %v3127_v29, %v1616_v39  ;;  %1626 = vadd.xlane.f32.xlu0 %v1622_v42  ;;  %v1623_v51 = vmul.f32 %v1619_v45, %v1619_v45 }
 0xe1b   :  { %v1613_v55 = vpop.xlane.xlu0 %1612 }
 0xe1c   :  { %v1617_v57 = vmul.f32 0.0078125, %v1613_v55  ;;  %1628 = vadd.xlane.f32.xlu1 %v1623_v51  ;;  %v1624_v58 = vmul.f32 %v1620_v50, %v1620_v50 }
 0xe1e   :  { %v1621_v46 = vsub.f32 %v3130_v37, %v1617_v57  ;;  %1630 = vadd.xlane.f32.xlu0 %v1624_v58 }
 0xe20   :  { %v1625_v47 = vmul.f32 %v1621_v46, %v1621_v46 }
 0xe22   :  { %1632 = vadd.xlane.f32.xlu1 %v1625_v47 }
 0xea7   :  { %v1627_v2 = vpop.xlane.xlu0 %1626 }
 0xea8   :  { %v1634_v4 = vmul.f32 0.0078125, %v1627_v2 }
 0xea9   :  { %v1629_v5 = vpop.xlane.xlu1 %1628 }
 0xeaa   :  { %v1638_v48 = vadd.f32 1e-05, %v1634_v4  ;;  %v1635_v49 = vmul.f32 0.0078125, %v1629_v5 }
 0xeab   :  { %v1631_v52 = vpop.xlane.xlu0 %1630 }
 0xeac   :  { %2516 = vrsqrt.f32 %v1638_v48  ;;  %v1639_v53 = vadd.f32 1e-05, %v1635_v49  ;;  %v1636_v54 = vmul.f32 0.0078125, %v1631_v52 }
 0xeae   :  { %2518 = vrsqrt.f32 %v1639_v53  ;;  %v1640_v56 = vadd.f32 1e-05, %v1636_v54 }
 0xeaf   :  { %v1633_v59 = vpop.xlane.xlu1 %1632 }
 0xeb0   :  { %2520 = vrsqrt.f32 %v1640_v56  ;;  %v1637_v60 = vmul.f32 0.0078125, %v1633_v59 }
 0xeb2   :  { %v1641_v61 = vadd.f32 1e-05, %v1637_v60 }
 0xeb4   :  { %2522 = vrsqrt.f32 %v1641_v61 }
 0xeb6   :  { %v2517_v62 = vpop.eup %2516 }
 0xeb7   :  { %v1646_v0 = vmul.f32 %v2517_v62, %v1618_v43 }
 0xeb8   :  { %v2519_v1 = vpop.eup %2518 }
 0xeb9   :  { %v1654_v3 = vmul.f32 %v2072_v63, %v1646_v0  ;;  %v1647_v6 = vmul.f32 %v2519_v1, %v1619_v45 }
 0xeba   :  { %v2521_v7 = vpop.eup %2520 }
 0xebb   :  { %v1655_v9 = vmul.f32 %v2072_v63, %v1647_v6  ;;  %v1648_v10 = vmul.f32 %v2521_v7, %v1620_v50  ;;  %v3137_v11 = vadd.f32 %v2073_v8, %v1654_v3 }
 0xebd   :  { %v3139_v12 = vadd.f32 %v2073_v8, %v1655_v9  ;;  %v1656_v14 = vmul.f32 %v2072_v63, %v1648_v10 }
 0xebe   :  { %v2523_v13 = vpop.eup %2522 }
 0xebf   :  { %v1666_v15 = vpack.c.bf16 %v3139_v12, %v3137_v11  ;;  %v1649_v16 = vmul.f32 %v2523_v13, %v1621_v46  ;;  %v3143_v18 = vadd.f32 %v2073_v8, %v1656_v14 }
 0xec1   :  { %v1657_v17 = vmul.f32 %v2072_v63, %v1649_v16 }
 0xec3   :  { %v3145_v19 = vadd.f32 %v2073_v8, %v1657_v17 }
 0xec5   :  { %v1667_v20 = vpack.c.bf16 %v3145_v19, %v3143_v18 }
 0xec6 LB: > { %2322 = vmatprep.mubr.bf16.mxu0 %v1666_v15  ;;  %s2096_s27 = sshll.u32 %s2754_s1, 6  ;;  %s1997_s7 = scalar_lea.vmem [#allocation6], %s2754_s1  ;;  %s2754_s1 = sphi %s3157_s1, %s1673_s1   ;;  %v2750_v24 = vphi %v3155_v24, %v3226_v24   ;;  %v2746_v23 = vphi %v3153_v23, %v3225_v23   ;;  %v2742_v22 = vphi %v3151_v22, %v3224_v22   ;;  %v2738_v21 = vphi %v3149_v21, %v3223_v21  }
 0xec7   : > { %s1680_s29 = scalar_lea.vmem [#allocation11], %s2096_s27  ;;  %s1840_s30 = scalar_lea.vmem [#allocation12], %s2096_s27  ;;  %v2077_v42 = vld [vmem:[%s1997_s7 + $0x8] ss:$0 sm:$0xff] }
 0xec8   : > { %v2528_v25 = vld [vmem:[%s1680_s29] sm:$0xff]   ;;  %v2529_v26 = vld [vmem:[%s1680_s29 + $0x8] sm:$0xff]   ;;  %v2530_v27 = vld [vmem:[%s1680_s29 + $0x10] sm:$0xff]   ;;  %s1673_s1 = sadd.s32 1, %s2754_s1  }
 0xec9   : > { %2306 = vmatprep.subr.bf16.mxu0 %v2528_v25  ;;  %v2531_v28 = vld [vmem:[%s1680_s29 + $0x18] sm:$0xff]   ;;  %v2532_v32 = vld [vmem:[%s1680_s29 + $0x20] sm:$0xff]   ;;  %v2533_v34 = vld [vmem:[%s1680_s29 + $0x28] sm:$0xff]   ;;  %p1670_p6 = scmp.ge.s32.totalorder %s1673_s1, 4  }
 0xeca   : > { %2307 = vmatpush3.bf16.msra.mxu0 %v2528_v25  ;;  %v2534_v35 = vld [vmem:[%s1680_s29 + $0x30] sm:$0xff]   ;;  %v2535_v36 = vld [vmem:[%s1680_s29 + $0x38] sm:$0xff]   ;;  %v2536_v38 = vld [vmem:[%s1840_s30] sm:$0xff]   ;;  %s2773_s8 = smov (%p1670_p6), [#allocation14]  }
 0xecb   : > { %2308 = vmatprep.subr.bf16.mxu0 %v2529_v26  ;;  %2326 = vmatprep.subr.bf16.mxu1 %v2536_v38  ;;  %v2537_v40 = vld [vmem:[%s1840_s30 + $0x8] sm:$0xff]   ;;  %v2538_v41 = vld [vmem:[%s1840_s30 + $0x10] sm:$0xff]   ;;  %v2539_v43 = vld [vmem:[%s1840_s30 + $0x18] sm:$0xff]   ;;  %s1980_s11 = sshll.u32 (%p1670_p6), %s2773_s8, 4  ;;  %s1981_s11 = int_to_ptr.vmem [resolvable:$true] %s1980_s11 }
 0xecc   : > { %2327 = vmatpush3.bf16.msra.mxu1 %v2536_v38  ;;  %v2540_v44 = vld [vmem:[%s1840_s30 + $0x20] sm:$0xff]   ;;  %v2541_v31 = vld [vmem:[%s1840_s30 + $0x28] sm:$0xff]   ;;  %v2542_v45 = vld [vmem:[%s1840_s30 + $0x30] sm:$0xff]   ;;  %s2684_s12 = scalar_lea.vmem (%p1670_p6), %s1981_s11, 512  ;;  %p2689_p8 = scmp.lt.s32.totalorder (%p1670_p6), %s1981_s11, %s1981_s11 }
 0xecd   : > { %2328 = vmatprep.subr.bf16.mxu1 %v2537_v40  ;;  %v2543_v39 = vld [vmem:[%s1840_s30 + $0x38] sm:$0xff]   ;;  %p2685_p7 = scmp.ne.s32.totalorder (%p1670_p6), %s1981_s11, %s2684_s12  ;;  %p2690_p9 = scmp.lt.s32.totalorder (%p1670_p6), %s2684_s12, %s2684_s12 }
 0xece   : > { %2309 = vmatpush3.bf16.msra.mxu0 %v2529_v26 }
 0xecf   : > { %2310 = vmatprep.subr.bf16.mxu0 %v2530_v27  ;;  %p2691_p10 = por (%p1670_p6), %p2690_p9, %p2689_p8 }
 0xed0   : > { %2329 = vmatpush3.bf16.msra.mxu1 %v2537_v40 }
 0xed1   : > { %2330 = vmatprep.subr.bf16.mxu1 %v2538_v41  ;;  %p2692_p11 = pnand (%p1670_p6), %p2691_p10, %p2685_p7 }
 0xed2   : > { %2311 = vmatpush3.bf16.msra.mxu0 %v2530_v27 }
 0xed3   : > { %2312 = vmatprep.subr.bf16.mxu0 %v2531_v28 }
 0xed4   : > { %2331 = vmatpush3.bf16.msra.mxu1 %v2538_v41 }
 0xed5   : > { %2332 = vmatprep.subr.bf16.mxu1 %v2539_v43 }
 0xed6   : > { %2313 = vmatpush3.bf16.msra.mxu0 %v2531_v28 }
 0xed7   : > { %2314 = vmatprep.subr.bf16.mxu0 %v2532_v32 }
 0xed8   : > { %2333 = vmatpush3.bf16.msra.mxu1 %v2539_v43 }
 0xed9   : > { %2334 = vmatprep.subr.bf16.mxu1 %v2540_v44 }
 0xeda   : > { %2315 = vmatpush3.bf16.msra.mxu0 %v2532_v32 }
 0xedb   : > { %2316 = vmatprep.subr.bf16.mxu0 %v2533_v34 }
 0xedc   : > { %2335 = vmatpush3.bf16.msra.mxu1 %v2540_v44 }
 0xedd   : > { %2336 = vmatprep.subr.bf16.mxu1 %v2541_v31 }
 0xede   : > { %2317 = vmatpush3.bf16.msra.mxu0 %v2533_v34 }
 0xedf   : > { %2318 = vmatprep.subr.bf16.mxu0 %v2534_v35 }
 0xee0   : > { %2337 = vmatpush3.bf16.msra.mxu1 %v2541_v31 }
 0xee1   : > { %2338 = vmatprep.subr.bf16.mxu1 %v2542_v45 }
 0xee2   : > { %2319 = vmatpush3.bf16.msra.mxu0 %v2534_v35 }
 0xee3   : > { %2320 = vmatprep.subr.bf16.mxu0 %v2535_v36 }
 0xee4   : > { %2339 = vmatpush3.bf16.msra.mxu1 %v2542_v45 }
 0xee5   : > { %2340 = vmatprep.subr.bf16.mxu1 %v2543_v39 }
 0xee6   : > { %2321 = vmatpush3.bf16.msra.mxu0 %v2535_v36 }
 0xee8   : > { %2341 = vmatpush3.bf16.msra.mxu1 %v2543_v39 }
 0xee9   : > { %2323 = vmatmul.mubr.bf16.vlgmr.msra.gmra.mrb[0].mxu0 %v1667_v20 }
 0xfbc   : > { %v2324_v50 = vpop.f32.mrb[0].mxu0 }
 0xfbd   : > { %v1795_v51 = vadd.f32 %v2324_v50, %v2077_v42  ;;  %v1786_v55 = vpop.f32.mrb[1].mxu0 }
 0xfbe   : > { %v1787_v57 = vadd.f32 %v2077_v42, %v1786_v55  ;;  %v2325_v58 = vpop.f32.mrb[2].mxu0 }
 0xfbf   : > { %v1807_v46 = vmul.f32 %v1795_v51, %v1795_v51  ;;  %v1798_v47 = vadd.f32 %v2325_v58, %v2077_v42  ;;  %v1789_v2 = vpop.f32.mrb[3].mxu0  ;;  %v1803_v26 = vmul.f32 0.5, %v1795_v51  ;;  %v2095_v58 = vld [vmem:[#allocation6 + $0xc] ss:$0 sm:$0xff] (%p1670_p6) }
 0xfc0   : > { %v1805_v4 = vmul.f32 %v1787_v57, %v1787_v57  ;;  %v1790_v5 = vadd.f32 %v2077_v42, %v1789_v2  ;;  %v1801_v32 = vmul.f32 0.5, %v1787_v57 }
 0xfc1   : > { %v1811_v48 = vmul.f32 %v1807_v46, %v1795_v51  ;;  %v1808_v49 = vmul.f32 %v1798_v47, %v1798_v47  ;;  %v1804_v27 = vmul.f32 0.5, %v1798_v47 }
 0xfc2   : > { %v1809_v52 = vmul.f32 %v1805_v4, %v1787_v57  ;;  %v1806_v53 = vmul.f32 %v1790_v5, %v1790_v5  ;;  %v1802_v34 = vmul.f32 0.5, %v1790_v5 }
 0xfc3   : > { %v1815_v54 = vmul.f32 0.044715, %v1811_v48  ;;  %v1812_v56 = vmul.f32 %v1808_v49, %v1798_v47 }
 0xfc4   : > { %v1813_v59 = vmul.f32 0.044715, %v1809_v52  ;;  %v1810_v60 = vmul.f32 %v1806_v53, %v1790_v5 }
 0xfc5   : > { %v1819_v61 = vadd.f32 %v1815_v54, %v1795_v51  ;;  %v1816_v62 = vmul.f32 0.044715, %v1812_v56 }
 0xfc6   : > { %v1814_v63 = vmul.f32 0.044715, %v1810_v60  ;;  %v1817_v0 = vadd.f32 %v1813_v59, %v1787_v57 }
 0xfc7   : > { %v1823_v1 = vmul.f32 0.7978846, %v1819_v61  ;;  %v1820_v3 = vadd.f32 %v1816_v62, %v1798_v47 }
 0xfc8   : > { %v1818_v6 = vadd.f32 %v1814_v63, %v1790_v5  ;;  %v1821_v7 = vmul.f32 0.7978846, %v1817_v0 }
 0xfc9   : > { %2544 = vtanh.f32 %v1823_v1  ;;  %v1824_v8 = vmul.f32 0.7978846, %v1820_v3 }
 0xfca   : > { %v1822_v9 = vmul.f32 0.7978846, %v1818_v6  ;;  %2546 = vtanh.f32 %v1821_v7 }
 0xfcb   : > { %2548 = vtanh.f32 %v1824_v8 }
 0xfcc   : > { %2550 = vtanh.f32 %v1822_v9 }
 0xfd3   : > { %v2545_v10 = vpop.eup %2544 }
 0xfd4   : > { %v2547_v13 = vpop.eup %2546  ;;  %v1831_v14 = vadd.f32 1.0, %v2545_v10 }
 0xfd5   : > { %v2549_v16 = vpop.eup %2548  ;;  %v1829_v17 = vadd.f32 1.0, %v2547_v13 }
 0xfd6   : > { %v2551_v25 = vpop.eup %2550  ;;  %v1832_v28 = vadd.f32 1.0, %v2549_v16  ;;  %v1835_v36 = vmul.f32 %v1831_v14, %v1803_v26 }
 0xfd7   : > { %v1830_v35 = vadd.f32 1.0, %v2551_v25  ;;  %v1833_v40 = vmul.f32 %v1829_v17, %v1801_v32 }
 0xfd8   : > { %v1836_v38 = vmul.f32 %v1832_v28, %v1804_v27 }
 0xfd9   : > { %v1834_v41 = vmul.f32 %v1830_v35, %v1802_v34 }
 0xfda   : > { %v1838_v43 = vpack.c.bf16 %v1836_v38, %v1835_v36 }
 0xfdb   : > { %v1837_v44 = vpack.c.bf16 %v1834_v41, %v1833_v40 }
 0xfdd   : > { %2342 = vmatprep.mubr.bf16.mxu1 %v1837_v44 }
 0xfde   : > { %2343 = vmatmul.mubr.bf16.vlgmr.msra.gmra.mrb[0].mxu1 %v1838_v43 }
0x10b1   : > { %v2344_v31 = vpop.f32.mrb[0].mxu1  ;;  %1672 = sbr.rel (!%p1670_p6) target bundleno = 3782 (0xec6), region = 78 }
0x10b2   : > { %v1956_v45 = vadd.f32 %v2742_v22, %v2344_v31   ;;  %v1939_v39 = vpop.f32.mrb[1].mxu1 }
0x10b3   : > { %v1954_v42 = vadd.f32 %v2750_v24, %v1939_v39   ;;  %v2345_v50 = vpop.f32.mrb[2].mxu1 }
0x10b4   : > { %v1957_v51 = vadd.f32 %v2738_v21, %v2345_v50   ;;  %v1942_v55 = vpop.f32.mrb[3].mxu1  ;;  %v3224_v22 = vmov %v1956_v45  ;;  %v1960_v47 = vadd.f32 (%p1670_p6), %v1956_v45, %v3127_v29 }
0x10b5   : > { %v1955_v57 = vadd.f32 %v2746_v23, %v1942_v55   ;;  %v3226_v24 = vmov %v1954_v42 }
0x10b6   : > { %v3223_v21 = vmov %v1957_v51  ;;  %v1958_v24 = vadd.f32 (%p1670_p6), %v1954_v42, %v3121_v30  ;;  %v1961_v2 = vadd.f32 (%p1670_p6), %v1957_v51, %v3130_v37  ;;  %v1969_v48 = vadd.f32 (%p1670_p6), %v2095_v58, %v1960_v47 }
0x10b7   : > { %v3225_v23 = vmov %v1955_v57  ;;  %v1959_v46 = vadd.f32 (%p1670_p6), %v1955_v57, %v3124_v33 }
0x10b8   :  { %v1967_v4 = vadd.f32 %v2095_v58, %v1958_v24  ;;  %v1970_v49 = vadd.f32 %v2095_v58, %v1961_v2  ;;  %1973 = vst [vmem:[#allocation14 + $0x10] sm:$0xff] %v1969_v48 }
0x10b9   :  { %v1968_v5 = vadd.f32 %v2095_v58, %v1959_v46 }
0x10ba   :  { %1971 = vst [vmem:[#allocation14] sm:$0xff] %v1967_v4  ;;  %1974 = vst [vmem:[#allocation14 + $0x18] sm:$0xff] %v1970_v49 }
0x10bb   :  { %1972 = vst [vmem:[#allocation14 + $0x8] sm:$0xff] %v1968_v5 }
0x10bc   :  { %2695 = shalt.err (!%p2692_p11)
}
0x10bd   :  { %s2696_s24 = scalar_lea.hbm %s3222_s6, 512 }
0x10be   :  { %p2697_p12 = scmp.ne.s32.totalorder %s3222_s6, %s2696_s24  ;;  %p2700_p13 = scmp.lt.u32.totalorder %s2696_s24, %s3222_s6 }
0x10c0   :  { %p2702_p0 = pnand %p2700_p13, %p2697_p12 }
0x10c2   :  { %2705 = shalt.err (!%p2702_p0)
}
0x10c3   :  { %1986 = dma.vmem_to_hbm [thread:$0]  %s1981_s11, 512, %s3222_s6, [#allocation5], %s2758_s9, %s2758_s9, %s2759_s10  }
0x10c4   :  { %2734 = dma.done.wait [#allocation5], 512  }
0x10c5   :  { %2735 = vsyncadd [#allocation5], 4294966784 }
0x10c6   :  { %1990 = vsyncpa [#allocation4], 1 }
0x10c7   :  { %1991 = vsyncpa [#allocation7], 1 }
0x10c8   :  { %1992 = vsyncpa [#allocation10], 1 }
0x10c9   :  { %1993 = vsyncpa [#allocation13], 1 }
0x10ca   :  { %1994 = vsyncpa [#allocation5], 1 }

</bundles_post_ra>
